<compile_context>
chip_gen: v7x
topology: tpu7x:2x2x1
jax: 0.10.0
libtpu: 0.0.40
codegen_flags: <defaults>
</compile_context>

<pallas_src>
import jax
import jax.numpy as jnp
from jax.experimental import pallas as pl
from jax.experimental.pallas import tpu as pltpu


IMG_FEATS = 784                         # 28*28 flattened MNIST image
H1, H2, H3 = 1024, 512, 256
K_PAD = 896                             # layer-1 K padded to a 128 multiple
TAIL_OFF = IMG_FEATS - (K_PAD - 128)    # = 16: embedding's lane offset inside
                                        #   the last 128-lane tile of the pack


def _leaky_relu(h, slope=0.2):
    # max(h, slope*h): 2 VALU ops, cheaper than where(h > 0, h, slope*h).
    return jnp.maximum(h, slope * h)


def discriminator_kernel(x_ref, ctail_ref,
                         w1_ref, b1_ref,
                         w2_ref, b2_ref,
                         w3_ref, b3_ref,
                         w4_ref, b4_ref,
                         o_ref,
                         xc_ref):
    """One batch tile of the 4-layer discriminator MLP.

    x_ref    : (TB, 784) f32 image tile (cast to bf16 in-kernel).
    ctail_ref: (TB, 128) bf16; embedding in cols [16, 16+E), zeros elsewhere,
               so that placed at scratch cols [768, 896) it lands exactly on
               the packed-weight embedding rows [784, 784+E).
    xc_ref   : (TB, 896) bf16 scratch = [x | emb | 0]; one MXU pass for layer 1.
    """
    # ---- Pack the layer-1 LHS: [x | emb | 0] -------------------------------
    # Aligned full-128-lane store of the embedding tail tile (pad cols are 0).
    xc_ref[:, K_PAD - 128:K_PAD] = ctail_ref[...]
    # x store: 6 full lane tiles + a masked 16-lane tail that preserves the
    # embedding columns written above.
    xc_ref[:, 0:IMG_FEATS] = x_ref[...].astype(jnp.bfloat16)

    # ---- Layer 1: single (TB,896)@(896,1024) MXU pass -> LeakyReLU(0.2) ----
    h = jnp.dot(xc_ref[...], w1_ref[...], preferred_element_type=jnp.float32)
    h = _leaky_relu(h + b1_ref[...]).astype(jnp.bfloat16)
    # Dropout(0.3) -> identity (inference mode)

    # ---- Layer 2: (TB,1024)@(1024,512) + b2 -> LeakyReLU(0.2) --------------
    h = jnp.dot(h, w2_ref[...], preferred_element_type=jnp.float32)
    h = _leaky_relu(h + b2_ref[...]).astype(jnp.bfloat16)

    # ---- Layer 3: (TB,512)@(512,256) + b3 -> LeakyReLU(0.2) ----------------
    h = jnp.dot(h, w3_ref[...], preferred_element_type=jnp.float32)
    h = _leaky_relu(h + b3_ref[...])

    # ---- Layer 4: (256 -> 1) as VPU multiply + lane reduce, then Sigmoid ---
    w4_row = w4_ref[...].astype(jnp.float32)                     # (1, 256)
    logit = jnp.sum(h * w4_row, axis=-1, keepdims=True) + b4_ref[0, 0]
    o_ref[...] = jax.nn.sigmoid(logit)


def _round_up(n, m):
    return ((n + m - 1) // m) * m


def _pick_batch_tile(B):
    """>=2 grid steps once B >= 32 (so v7x's two TensorCores both get work),
    big tiles for large batches (per-step overhead amortization), 16-row
    granularity (bf16 sublane tile)."""
    if B < 32:
        return _round_up(max(B, 1), 16)
    if B >= 1024:
        return 512
    return min(256, _round_up((B + 1) // 2, 16))


def discriminator_forward(x_nchw, labels, params):
    """Equivalent of Discriminator.forward (inference mode).

    x_nchw: (B, 1, 28, 28) float32; labels: (B,) int32.
    Returns sigmoid scores with all size-1 dims squeezed (like PyTorch).
    """
    B = x_nchw.shape[0]
    embed_dim = params["emb"].shape[1]
    assert embed_dim <= 128 - TAIL_OFF

    x_flat = x_nchw.reshape(B, IMG_FEATS)                 # f32 view; cast in-kernel
    c = params["emb"][labels].astype(jnp.bfloat16)        # (B, E) embedding gather
    # Pre-shifted embedding tail tile: cols [16, 16+E) hold the embedding.
    c_tail = jnp.pad(c, ((0, 0), (TAIL_OFF, 128 - TAIL_OFF - embed_dim)))

    TB = _pick_batch_tile(B)
    B_pad = _round_up(B, TB)
    if B_pad != B:
        pad = B_pad - B
        x_flat = jnp.pad(x_flat, ((0, pad), (0, 0)))
        c_tail = jnp.pad(c_tail, ((0, pad), (0, 0)))

    grid = (B_pad // TB,)
    tile_map = lambda i: (i, 0)
    const_map = lambda i: (0, 0)

    in_specs = [
        pl.BlockSpec((TB, IMG_FEATS), tile_map),          # x batch tile (f32)
        pl.BlockSpec((TB, 128), tile_map),                # embedding tail tile
        pl.BlockSpec((K_PAD, H1), const_map),             # packed w1 (VMEM-resident)
        pl.BlockSpec((1, H1), const_map),                 # b1
        pl.BlockSpec((H1, H2), const_map),                # w2
        pl.BlockSpec((1, H2), const_map),                 # b2
        pl.BlockSpec((H2, H3), const_map),                # w3
        pl.BlockSpec((1, H3), const_map),                 # b3
        pl.BlockSpec((1, H3), const_map),                 # w4 as a (1,256) row
        pl.BlockSpec((1, 1), const_map,
                     memory_space=pltpu.MemorySpace.SMEM),  # b4 scalar
    ]
    out_specs = pl.BlockSpec((TB, 1), tile_map)

    out = pl.pallas_call(
        discriminator_kernel,
        out_shape=jax.ShapeDtypeStruct((B_pad, 1), jnp.float32),
        grid=grid,
        in_specs=in_specs,
        out_specs=out_specs,
        scratch_shapes=[pltpu.VMEM((TB, K_PAD), jnp.bfloat16)],
        compiler_params=pltpu.CompilerParams(
            dimension_semantics=("parallel",),
            vmem_limit_bytes=32 * 1024 * 1024,
        ),
    )(
        x_flat, c_tail,
        params["w1p"], params["b1"],
        params["w2"], params["b2"],
        params["w3"], params["b3"],
        params["w4_row"], params["b4"],
    )
    return jnp.squeeze(out[:B])                           # out.squeeze()


def init_params(key, num_labels=10, embed_dim=10):
    ks = jax.random.split(key, 9)
    params = {"emb": jax.random.normal(ks[0], (num_labels, embed_dim),
                                       jnp.float32) * 0.1}

    def linear(kw, kb, fan_in, fan_out):
        scale = 1.0 / jnp.sqrt(jnp.float32(fan_in))
        w = (jax.random.normal(kw, (fan_in, fan_out), jnp.float32) * scale
             ).astype(jnp.bfloat16)                       # bf16 weight storage
        b = jax.random.normal(kb, (1, fan_out), jnp.float32) * scale  # f32 bias
        return w, b

    w1, b1 = linear(ks[1], ks[2], IMG_FEATS + embed_dim, H1)   # (794, 1024)
    # Packed layer-1 weight: rows [0,784)=image, [784,784+E)=embedding, rest 0.
    params["w1p"] = (jnp.zeros((K_PAD, H1), jnp.bfloat16)
                     .at[:IMG_FEATS + embed_dim].set(w1))
    params["b1"] = b1
    params["w2"], params["b2"] = linear(ks[3], ks[4], H1, H2)
    params["w3"], params["b3"] = linear(ks[5], ks[6], H2, H3)
    w4, b4 = linear(ks[7], ks[8], H3, 1)
    params["w4_row"] = w4.reshape(1, H3)    # lane-dense row for the VPU reduce
    params["b4"] = b4.reshape(1, 1)         # scalar bias, lives in SMEM
    return params


def _ref_forward(x_nchw, labels, params):
    """Pure-JAX reference (f32 activations, same bf16 weights)."""
    E = params["emb"].shape[1]
    h = jnp.concatenate(
        [x_nchw.reshape(-1, IMG_FEATS), params["emb"][labels]],
        axis=1).astype(jnp.float32)
    w1 = params["w1p"][:IMG_FEATS + E].astype(jnp.float32)
    h = jax.nn.leaky_relu(h @ w1 + params["b1"][0], 0.2)
    h = jax.nn.leaky_relu(h @ params["w2"].astype(jnp.float32)
                          + params["b2"][0], 0.2)
    h = jax.nn.leaky_relu(h @ params["w3"].astype(jnp.float32)
                          + params["b3"][0], 0.2)
    logit = h @ params["w4_row"].astype(jnp.float32).T + params["b4"]
    return jnp.squeeze(jax.nn.sigmoid(logit))


if __name__ == "__main__":
    key = jax.random.PRNGKey(0)
    k_param, k_x, k_lab = jax.random.split(key, 3)

    params = init_params(k_param)

    for B in (4, 37):   # single-tile path and multi-tile (+ padding) path
        kx, kl = jax.random.split(jax.random.fold_in(k_x, B))
        x = jax.random.normal(kx, (B, 1, 28, 28), jnp.float32)    # NCHW MNIST-like
        labels = jax.random.randint(kl, (B,), 0, 10, jnp.int32)

        out = discriminator_forward(x, labels, params)
        jax.block_until_ready(out)

        assert out.shape == (B,)
        assert bool(jnp.all((out >= 0.0) & (out <= 1.0)))
        ref = _ref_forward(x, labels, params)
        assert bool(jnp.max(jnp.abs(out - ref)) < 0.05), "mismatch vs reference"

    print("KERNEL_OK")
</pallas_src>

<mosaic_0001>
module attributes {stable_mosaic.version = 11 : i64} {
  func.func @discriminator_kernel(%arg0: i32, %arg1: memref<16x784xf32, #tpu.memory_space<vmem>>, %arg2: memref<16x128xbf16, #tpu.memory_space<vmem>>, %arg3: memref<896x1024xbf16, #tpu.memory_space<vmem>>, %arg4: memref<1x1024xf32, #tpu.memory_space<vmem>>, %arg5: memref<1024x512xbf16, #tpu.memory_space<vmem>>, %arg6: memref<1x512xf32, #tpu.memory_space<vmem>>, %arg7: memref<512x256xbf16, #tpu.memory_space<vmem>>, %arg8: memref<1x256xf32, #tpu.memory_space<vmem>>, %arg9: memref<1x256xbf16, #tpu.memory_space<vmem>>, %arg10: memref<1x1xf32, #tpu.memory_space<smem>>, %arg11: memref<16x1xf32, #tpu.memory_space<vmem>>, %arg12: memref<16x896xbf16, #tpu.memory_space<vmem>>) attributes {dimension_semantics = [#tpu.dimension_semantics<parallel>], iteration_bounds = array<i64: 1>, scalar_prefetch = 0 : i64, scratch_operands = 1 : i64, tpu.core_type = #tpu.core_type<tc>, window_params = [{transform_indices = @transform_0, window_bounds = array<i64: 16, 784>}, {transform_indices = @transform_1, window_bounds = array<i64: 16, 128>}, {pipeline_mode = #tpu.pipeline_mode<synchronous>, transform_indices = @transform_2, window_bounds = array<i64: 896, 1024>}, {pipeline_mode = #tpu.pipeline_mode<synchronous>, transform_indices = @transform_3, window_bounds = array<i64: 1, 1024>}, {pipeline_mode = #tpu.pipeline_mode<synchronous>, transform_indices = @transform_4, window_bounds = array<i64: 1024, 512>}, {pipeline_mode = #tpu.pipeline_mode<synchronous>, transform_indices = @transform_5, window_bounds = array<i64: 1, 512>}, {pipeline_mode = #tpu.pipeline_mode<synchronous>, transform_indices = @transform_6, window_bounds = array<i64: 512, 256>}, {pipeline_mode = #tpu.pipeline_mode<synchronous>, transform_indices = @transform_7, window_bounds = array<i64: 1, 256>}, {pipeline_mode = #tpu.pipeline_mode<synchronous>, transform_indices = @transform_8, window_bounds = array<i64: 1, 256>}, {transform_indices = @transform_9, window_bounds = array<i64: 1, 1>}, {transform_indices = @transform_10, window_bounds = array<i64: 16, 1>}]} {
    %c0 = arith.constant 0 : index
    %c0_0 = arith.constant 0 : index
    %0 = vector.load %arg2[%c0, %c0_0] : memref<16x128xbf16, #tpu.memory_space<vmem>>, vector<16x128xbf16>
    %c0_1 = arith.constant 0 : index
    %c768 = arith.constant 768 : index
    %1 = vector.load %arg12[%c0_1, %c768] : memref<16x896xbf16, #tpu.memory_space<vmem>>, vector<16x128xbf16>
    tpu.vector_store %arg12[%c0_1, %c768], %0 {strides = array<i32>} : memref<16x896xbf16, #tpu.memory_space<vmem>>, vector<16x128xbf16>,
    %c0_2 = arith.constant 0 : index
    %c0_3 = arith.constant 0 : index
    %2 = vector.load %arg1[%c0_2, %c0_3] : memref<16x784xf32, #tpu.memory_space<vmem>>, vector<16x784xf32>
    %3 = arith.truncf %2 : vector<16x784xf32> to vector<16x784xbf16>
    %c0_4 = arith.constant 0 : index
    %c0_5 = arith.constant 0 : index
    %4 = vector.load %arg12[%c0_4, %c0_5] : memref<16x896xbf16, #tpu.memory_space<vmem>>, vector<16x784xbf16>
    tpu.vector_store %arg12[%c0_4, %c0_5], %3 {strides = array<i32>} : memref<16x896xbf16, #tpu.memory_space<vmem>>, vector<16x784xbf16>,
    %c0_6 = arith.constant 0 : index
    %c0_7 = arith.constant 0 : index
    %5 = vector.load %arg12[%c0_6, %c0_7] : memref<16x896xbf16, #tpu.memory_space<vmem>>, vector<16x896xbf16>
    %c0_8 = arith.constant 0 : index
    %c0_9 = arith.constant 0 : index
    %6 = vector.load %arg3[%c0_8, %c0_9] : memref<896x1024xbf16, #tpu.memory_space<vmem>>, vector<896x1024xbf16>
    %cst = arith.constant dense<0.000000e+00> : vector<16x1024xf32>
    %7 = tpu.matmul %5, %6, %cst {dimension_numbers = #tpu.dot_dimension_numbers<[1], [0], [0], [1], [0, 0, 1, 1], [], []>} : vector<16x896xbf16>, vector<896x1024xbf16>, vector<16x1024xf32> -> vector<16x1024xf32>
    %c0_10 = arith.constant 0 : index
    %c0_11 = arith.constant 0 : index
    %8 = vector.load %arg4[%c0_10, %c0_11] : memref<1x1024xf32, #tpu.memory_space<vmem>>, vector<1x1024xf32>
    %9 = vector.broadcast %8 : vector<1x1024xf32> to vector<16x1024xf32>
    %10 = arith.addf %7, %9 : vector<16x1024xf32>
    %cst_12 = arith.constant 2.000000e-01 : f32
    %11 = vector.broadcast %cst_12 : f32 to vector<16x1024xf32>
    %12 = arith.mulf %11, %10 : vector<16x1024xf32>
    %13 = arith.maximumf %10, %12 : vector<16x1024xf32>
    %14 = arith.truncf %13 : vector<16x1024xf32> to vector<16x1024xbf16>
    %c0_13 = arith.constant 0 : index
    %c0_14 = arith.constant 0 : index
    %15 = vector.load %arg5[%c0_13, %c0_14] : memref<1024x512xbf16, #tpu.memory_space<vmem>>, vector<1024x512xbf16>
    %cst_15 = arith.constant dense<0.000000e+00> : vector<16x512xf32>
    %16 = tpu.matmul %14, %15, %cst_15 {dimension_numbers = #tpu.dot_dimension_numbers<[1], [0], [0], [1], [0, 0, 1, 1], [], []>} : vector<16x1024xbf16>, vector<1024x512xbf16>, vector<16x512xf32> -> vector<16x512xf32>
    %c0_16 = arith.constant 0 : index
    %c0_17 = arith.constant 0 : index
    %17 = vector.load %arg6[%c0_16, %c0_17] : memref<1x512xf32, #tpu.memory_space<vmem>>, vector<1x512xf32>
    %18 = vector.broadcast %17 : vector<1x512xf32> to vector<16x512xf32>
    %19 = arith.addf %16, %18 : vector<16x512xf32>
    %cst_18 = arith.constant 2.000000e-01 : f32
    %20 = vector.broadcast %cst_18 : f32 to vector<16x512xf32>
    %21 = arith.mulf %20, %19 : vector<16x512xf32>
    %22 = arith.maximumf %19, %21 : vector<16x512xf32>
    %23 = arith.truncf %22 : vector<16x512xf32> to vector<16x512xbf16>
    %c0_19 = arith.constant 0 : index
    %c0_20 = arith.constant 0 : index
    %24 = vector.load %arg7[%c0_19, %c0_20] : memref<512x256xbf16, #tpu.memory_space<vmem>>, vector<512x256xbf16>
    %cst_21 = arith.constant dense<0.000000e+00> : vector<16x256xf32>
    %25 = tpu.matmul %23, %24, %cst_21 {dimension_numbers = #tpu.dot_dimension_numbers<[1], [0], [0], [1], [0, 0, 1, 1], [], []>} : vector<16x512xbf16>, vector<512x256xbf16>, vector<16x256xf32> -> vector<16x256xf32>
    %c0_22 = arith.constant 0 : index
    %c0_23 = arith.constant 0 : index
    %26 = vector.load %arg8[%c0_22, %c0_23] : memref<1x256xf32, #tpu.memory_space<vmem>>, vector<1x256xf32>
    %27 = vector.broadcast %26 : vector<1x256xf32> to vector<16x256xf32>
    %28 = arith.addf %25, %27 : vector<16x256xf32>
    %cst_24 = arith.constant 2.000000e-01 : f32
    %29 = vector.broadcast %cst_24 : f32 to vector<16x256xf32>
    %30 = arith.mulf %29, %28 : vector<16x256xf32>
    %31 = arith.maximumf %28, %30 : vector<16x256xf32>
    %c0_25 = arith.constant 0 : index
    %c0_26 = arith.constant 0 : index
    %32 = vector.load %arg9[%c0_25, %c0_26] : memref<1x256xbf16, #tpu.memory_space<vmem>>, vector<1x256xbf16>
    %33 = arith.extf %32 : vector<1x256xbf16> to vector<1x256xf32>
    %34 = vector.broadcast %33 : vector<1x256xf32> to vector<16x256xf32>
    %35 = arith.mulf %31, %34 : vector<16x256xf32>
    %cst_27 = arith.constant dense<0.000000e+00> : vector<16xf32>
    %36 = vector.multi_reduction <add>, %35, %cst_27 [1] : vector<16x256xf32> to vector<16xf32>
    %37 = vector.shape_cast %36 : vector<16xf32> to vector<16x1xf32>
    %c0_28 = arith.constant 0 : index
    %c0_29 = arith.constant 0 : index
    %38 = memref.load %arg10[%c0_28, %c0_29] : memref<1x1xf32, #tpu.memory_space<smem>>
    %39 = vector.broadcast %38 : f32 to vector<16x1xf32>
    %40 = arith.addf %37, %39 : vector<16x1xf32>
    %41 = arith.negf %40 : vector<16x1xf32>
    %42 = math.exp %41 : vector<16x1xf32>
    %cst_30 = arith.constant 1.000000e+00 : f32
    %43 = vector.broadcast %cst_30 : f32 to vector<16x1xf32>
    %44 = arith.addf %43, %42 : vector<16x1xf32>
    %45 = arith.divf %43, %44 : vector<16x1xf32>
    %c0_31 = arith.constant 0 : index
    %c0_32 = arith.constant 0 : index
    %46 = vector.load %arg11[%c0_31, %c0_32] : memref<16x1xf32, #tpu.memory_space<vmem>>, vector<16x1xf32>
    tpu.vector_store %arg11[%c0_31, %c0_32], %45 {strides = array<i32>} : memref<16x1xf32, #tpu.memory_space<vmem>>, vector<16x1xf32>,
    return
  }
  func.func @transform_0(%arg0: i32) -> (i32, i32) {
    %c0_i32 = arith.constant 0 : i32
    %c0_i32_0 = arith.constant 0 : i32
    return %arg0, %c0_i32 : i32, i32
  }
  func.func @transform_1(%arg0: i32) -> (i32, i32) {
    %c0_i32 = arith.constant 0 : i32
    %c0_i32_0 = arith.constant 0 : i32
    return %arg0, %c0_i32 : i32, i32
  }
  func.func @transform_2(%arg0: i32) -> (i32, i32) {
    %c0_i32 = arith.constant 0 : i32
    %c0_i32_0 = arith.constant 0 : i32
    %c0_i32_1 = arith.constant 0 : i32
    return %c0_i32, %c0_i32_0 : i32, i32
  }
  func.func @transform_3(%arg0: i32) -> (i32, i32) {
    %c0_i32 = arith.constant 0 : i32
    %c0_i32_0 = arith.constant 0 : i32
    %c0_i32_1 = arith.constant 0 : i32
    return %c0_i32, %c0_i32_0 : i32, i32
  }
  func.func @transform_4(%arg0: i32) -> (i32, i32) {
    %c0_i32 = arith.constant 0 : i32
    %c0_i32_0 = arith.constant 0 : i32
    %c0_i32_1 = arith.constant 0 : i32
    return %c0_i32, %c0_i32_0 : i32, i32
  }
  func.func @transform_5(%arg0: i32) -> (i32, i32) {
    %c0_i32 = arith.constant 0 : i32
    %c0_i32_0 = arith.constant 0 : i32
    %c0_i32_1 = arith.constant 0 : i32
    return %c0_i32, %c0_i32_0 : i32, i32
  }
  func.func @transform_6(%arg0: i32) -> (i32, i32) {
    %c0_i32 = arith.constant 0 : i32
    %c0_i32_0 = arith.constant 0 : i32
    %c0_i32_1 = arith.constant 0 : i32
    return %c0_i32, %c0_i32_0 : i32, i32
  }
  func.func @transform_7(%arg0: i32) -> (i32, i32) {
    %c0_i32 = arith.constant 0 : i32
    %c0_i32_0 = arith.constant 0 : i32
    %c0_i32_1 = arith.constant 0 : i32
    return %c0_i32, %c0_i32_0 : i32, i32
  }
  func.func @transform_8(%arg0: i32) -> (i32, i32) {
    %c0_i32 = arith.constant 0 : i32
    %c0_i32_0 = arith.constant 0 : i32
    %c0_i32_1 = arith.constant 0 : i32
    return %c0_i32, %c0_i32_0 : i32, i32
  }
  func.func @transform_9(%arg0: i32) -> (i32, i32) {
    %c0_i32 = arith.constant 0 : i32
    %c0_i32_0 = arith.constant 0 : i32
    %c0_i32_1 = arith.constant 0 : i32
    return %c0_i32, %c0_i32_0 : i32, i32
  }
  func.func @transform_10(%arg0: i32) -> (i32, i32) {
    %c0_i32 = arith.constant 0 : i32
    %c0_i32_0 = arith.constant 0 : i32
    return %arg0, %c0_i32 : i32, i32
  }
}

</mosaic_0001>

<bundles_post_ra>
// kernel: tpu_custom_call.1
= control target key start
LH: loop header
LB: loop body
LE: loop exit
PB: predicated region body
PF: predicated region fallthrough
CT: control target
= control target key end

     0   :  { %16 = vsyncpa [#allocation5], 0  ;;  %s8061_s0 = inlined_call_operand.hbm [shape: f32[16,784], index: 0, kind: input, shape index: {}]   ;;  %s8062_s1 = inlined_call_operand.hbm [shape: bf16[16,128], index: 1, kind: input, shape index: {}]   ;;  %s8063_s2 = inlined_call_operand.hbm [shape: bf16[896,1024], index: 2, kind: input, shape index: {}]   ;;  %s8064_s3 = inlined_call_operand.hbm [shape: f32[1,1024], index: 3, kind: input, shape index: {}]   ;;  %s8065_s4 = inlined_call_operand.hbm [shape: bf16[1024,512], index: 4, kind: input, shape index: {}]   ;;  %s8066_s5 = inlined_call_operand.hbm [shape: f32[1,512], index: 5, kind: input, shape index: {}]   ;;  %s8067_s6 = inlined_call_operand.hbm [shape: bf16[512,256], index: 6, kind: input, shape index: {}]   ;;  %s8068_s7 = inlined_call_operand.hbm [shape: f32[1,256], index: 7, kind: input, shape index: {}]   ;;  %s8069_s8 = inlined_call_operand.hbm [shape: bf16[1,256], index: 8, kind: input, shape index: {}]   ;;  %s8070_s9 = inlined_call_operand.<no memory space> [shape: f32[1,1], index: 9, kind: input, shape index: {}]   ;;  %s8071_s10 = inlined_call_operand.vmem [shape: f32[16,1], index: 10, kind: output, shape index: {}]  }
   0x1   :  { %17 = vsyncpa [#allocation7], 0 }
   0x2   :  { %18 = vsyncpa [#allocation10], 0 }
   0x3   :  { %19 = vsyncpa [#allocation13], 0 }
   0x4   :  { %20 = vsyncpa [#allocation16], 0  ;;  %s7730_s13 = smov [#allocation6]   ;;  %s7522_s17 = scalar_lea.hbm %s8062_s1, 128 }
   0x5   :  { %s38_s14 = sshll.u32 %s7730_s13, 4  ;;  %p7523_p0 = scmp.ne.s32.totalorder %s8062_s1, %s7522_s17  ;;  %s39_s14 = int_to_ptr.vmem [resolvable:$true] %s38_s14 }
   0x6   :  { %p7526_p1 = scmp.lt.u32.totalorder %s7522_s17, %s8062_s1 }
   0x8   :  { %p7528_p2 = pnand %p7526_p1, %p7523_p0 }
   0xa   :  { %7531 = shalt.err (!%p7528_p2)
}
   0xb   :  { %s7532_s22 = scalar_lea.vmem %s39_s14, 128  ;;  %p7537_p4 = scmp.lt.s32.totalorder %s39_s14, %s39_s14 }
   0xc   :  { %p7533_p3 = scmp.ne.s32.totalorder %s39_s14, %s7532_s22  ;;  %p7538_p5 = scmp.lt.s32.totalorder %s7532_s22, %s7532_s22 }
   0xe   :  { %p7539_p6 = por %p7538_p5, %p7537_p4 }
  0x10   :  { %p7540_p7 = pnand %p7539_p6, %p7533_p3 }
  0x12   :  { %7543 = shalt.err (!%p7540_p7)
}
  0x13   :  { %s7731_s23 = smov 64   ;;  %s7732_s24 = smov 4  }
  0x14   :  { %44 = dma.hbm_to_vmem [thread:$0]  %s8062_s1, 128, %s39_s14, [#allocation7], %s7731_s23, %s7731_s23, %s7732_s24  }
  0x15   :  { %s7733_s27 = smov [#allocation9]   ;;  %s7734_s29 = smov [#allocation12]  }
  0x16   :  { %s63_s28 = sshll.u32 %s7733_s27, 4  ;;  %s85_s30 = sshll.u32 %s7734_s29, 4  ;;  %s64_s28 = int_to_ptr.vmem [resolvable:$true] %s63_s28  ;;  %s86_s30 = int_to_ptr.vmem [resolvable:$true] %s85_s30 }
  0x17   :  { %s7544_s13 = scalar_lea.hbm %s8064_s3, 128 }
  0x18   :  { %p7545_p8 = scmp.ne.s32.totalorder %s8064_s3, %s7544_s13  ;;  %p7548_p9 = scmp.lt.u32.totalorder %s7544_s13, %s8064_s3 }
  0x1a   :  { %p7550_p10 = pnand %p7548_p9, %p7545_p8 }
  0x1c   :  { %7553 = shalt.err (!%p7550_p10)
}
  0x1d   :  { %s7554_s1 = scalar_lea.vmem %s64_s28, 128  ;;  %p7559_p12 = scmp.lt.s32.totalorder %s64_s28, %s64_s28 }
  0x1e   :  { %p7555_p11 = scmp.ne.s32.totalorder %s64_s28, %s7554_s1  ;;  %p7560_p13 = scmp.lt.s32.totalorder %s7554_s1, %s7554_s1 }
  0x20   :  { %p7561_p0 = por %p7560_p13, %p7559_p12 }
  0x22   :  { %p7562_p1 = pnand %p7561_p0, %p7555_p11 }
  0x24   :  { %7565 = shalt.err (!%p7562_p1)
}
  0x25   :  { %66 = dma.hbm_to_vmem [thread:$0]  %s8064_s3, 128, %s64_s28, [#allocation10]  }
  0x26   :  { %s7566_s22 = scalar_lea.hbm %s8066_s5, 64 }
  0x27   :  { %p7567_p2 = scmp.ne.s32.totalorder %s8066_s5, %s7566_s22  ;;  %p7570_p3 = scmp.lt.u32.totalorder %s7566_s22, %s8066_s5 }
  0x29   :  { %p7572_p4 = pnand %p7570_p3, %p7567_p2 }
  0x2b   :  { %7575 = shalt.err (!%p7572_p4)
}
  0x2c   :  { %s7576_s27 = scalar_lea.vmem %s86_s30, 64  ;;  %p7581_p6 = scmp.lt.s32.totalorder %s86_s30, %s86_s30 }
  0x2d   :  { %p7577_p5 = scmp.ne.s32.totalorder %s86_s30, %s7576_s27  ;;  %p7582_p7 = scmp.lt.s32.totalorder %s7576_s27, %s7576_s27 }
  0x2f   :  { %p7583_p8 = por %p7582_p7, %p7581_p6 }
  0x31   :  { %p7584_p9 = pnand %p7583_p8, %p7577_p5 }
  0x33   :  { %7587 = shalt.err (!%p7584_p9)
}
  0x34   :  { %88 = dma.hbm_to_vmem [thread:$0]  %s8066_s5, 64, %s86_s30, [#allocation13]  }
  0x35   :  { %s7735_s29 = smov [#allocation15]   ;;  %s7736_s12 = smov [#allocation4]  }
  0x36   :  { %s107_s11 = sshll.u32 %s7735_s29, 4  ;;  %s26_s13 = sshll.u32 %s7736_s12, 4  ;;  %s108_s11 = int_to_ptr.vmem [resolvable:$true] %s107_s11  ;;  %s27_s13 = int_to_ptr.vmem [resolvable:$true] %s26_s13 }
  0x37   :  { %s7588_s17 = scalar_lea.hbm %s8068_s7, 32 }
  0x38   :  { %p7589_p10 = scmp.ne.s32.totalorder %s8068_s7, %s7588_s17  ;;  %p7592_p11 = scmp.lt.u32.totalorder %s7588_s17, %s8068_s7 }
  0x3a   :  { %p7594_p12 = pnand %p7592_p11, %p7589_p10 }
  0x3c   :  { %7597 = shalt.err (!%p7594_p12)
}
  0x3d   :  { %s7598_s5 = scalar_lea.vmem %s108_s11, 32  ;;  %p7603_p0 = scmp.lt.s32.totalorder %s108_s11, %s108_s11 }
  0x3e   :  { %p7599_p13 = scmp.ne.s32.totalorder %s108_s11, %s7598_s5  ;;  %p7604_p1 = scmp.lt.s32.totalorder %s7598_s5, %s7598_s5 }
  0x40   :  { %p7605_p2 = por %p7604_p1, %p7603_p0 }
  0x42   :  { %p7606_p3 = pnand %p7605_p2, %p7599_p13 }
  0x44   :  { %7609 = shalt.err (!%p7606_p3)
}
  0x45   :  { %110 = dma.hbm_to_vmem [thread:$0]  %s8068_s7, 32, %s108_s11, [#allocation16]  }
  0x46   :  { %s7610_s23 = scalar_lea.hbm %s8061_s0, 1792 }
  0x47   :  { %p7611_p4 = scmp.ne.s32.totalorder %s8061_s0, %s7610_s23  ;;  %p7614_p5 = scmp.lt.u32.totalorder %s7610_s23, %s8061_s0 }
  0x49   :  { %p7616_p6 = pnand %p7614_p5, %p7611_p4 }
  0x4b   :  { %7619 = shalt.err (!%p7616_p6)
}
  0x4c   :  { %s7620_s3 = scalar_lea.vmem %s27_s13, 1792  ;;  %p7625_p8 = scmp.lt.s32.totalorder %s27_s13, %s27_s13 }
  0x4d   :  { %p7621_p7 = scmp.ne.s32.totalorder %s27_s13, %s7620_s3  ;;  %p7626_p9 = scmp.lt.s32.totalorder %s7620_s3, %s7620_s3 }
  0x4f   :  { %p7627_p10 = por %p7626_p9, %p7625_p8 }
  0x51   :  { %p7628_p11 = pnand %p7627_p10, %p7621_p7 }
  0x53   :  { %7631 = shalt.err (!%p7628_p11)
}
  0x54   :  { %s7737_s7 = smov 896   ;;  %s7738_s28 = smov 56  }
  0x55   :  { %32 = dma.hbm_to_vmem [thread:$0]  %s8061_s0, 1792, %s27_s13, [#allocation5], %s7737_s7, %s7737_s7, %s7738_s28  }
  0x56   :  { %s7739_s12 = smov [#allocation8]   ;;  %s7632_s18 = scalar_lea.hbm %s8063_s2, 57344 }
  0x57   :  { %s50_s15 = sshll.u32 %s7739_s12, 4  ;;  %p7633_p12 = scmp.ne.s32.totalorder %s8063_s2, %s7632_s18  ;;  %s51_s15 = int_to_ptr.vmem [resolvable:$true] %s50_s15 }
  0x58   :  { %p7636_p13 = scmp.lt.u32.totalorder %s7632_s18, %s8063_s2 }
  0x5a   :  { %p7638_p0 = pnand %p7636_p13, %p7633_p12 }
  0x5c   :  { %7641 = shalt.err (!%p7638_p0)
}
  0x5d   :  { %s7642_s30 = scalar_lea.vmem %s51_s15, 57344  ;;  %p7647_p2 = scmp.lt.s32.totalorder %s51_s15, %s51_s15 }
  0x5e   :  { %p7643_p1 = scmp.ne.s32.totalorder %s51_s15, %s7642_s30  ;;  %p7648_p3 = scmp.lt.s32.totalorder %s7642_s30, %s7642_s30 }
  0x60   :  { %p7649_p4 = por %p7648_p3, %p7647_p2 }
  0x62   :  { %p7650_p5 = pnand %p7649_p4, %p7643_p1 }
  0x64   :  { %7653 = shalt.err (!%p7650_p5)
}
  0x65   :  { %s7740_s0 = smov 512   ;;  %s7741_s13 = smov 32  }
  0x66   :  { %56 = dma.hbm_to_vmem [thread:$0]  %s8063_s2, 57344, %s51_s15, [#allocation7], %s7740_s0, %s7740_s0, %s7741_s13  }
  0x67   :  { %s7742_s22 = smov [#allocation11]   ;;  %s7654_s26 = scalar_lea.hbm %s8065_s4, 32768 }
  0x68   :  { %s72_s23 = sshll.u32 %s7742_s22, 4  ;;  %p7655_p6 = scmp.ne.s32.totalorder %s8065_s4, %s7654_s26  ;;  %s73_s23 = int_to_ptr.vmem [resolvable:$true] %s72_s23 }
  0x69   :  { %p7658_p7 = scmp.lt.u32.totalorder %s7654_s26, %s8065_s4 }
  0x6b   :  { %p7660_p8 = pnand %p7658_p7, %p7655_p6 }
  0x6d   :  { %7663 = shalt.err (!%p7660_p8)
}
  0x6e   :  { %s7664_s29 = scalar_lea.vmem %s73_s23, 32768  ;;  %p7669_p10 = scmp.lt.s32.totalorder %s73_s23, %s73_s23 }
  0x6f   :  { %p7665_p9 = scmp.ne.s32.totalorder %s73_s23, %s7664_s29  ;;  %p7670_p11 = scmp.lt.s32.totalorder %s7664_s29, %s7664_s29 }
  0x71   :  { %p7671_p12 = por %p7670_p11, %p7669_p10 }
  0x73   :  { %p7672_p13 = pnand %p7671_p12, %p7665_p9 }
  0x75   :  { %7675 = shalt.err (!%p7672_p13)
}
  0x76   :  { %s7743_s2 = smov 256   ;;  %s7744_s11 = smov 16  }
  0x77   :  { %78 = dma.hbm_to_vmem [thread:$0]  %s8065_s4, 32768, %s73_s23, [#allocation10], %s7743_s2, %s7743_s2, %s7744_s11  }
  0x78   :  { %s7745_s16 = smov [#allocation14]   ;;  %s7676_s14 = scalar_lea.hbm %s8067_s6, 8192 }
  0x79   :  { %s94_s17 = sshll.u32 %s7745_s16, 4  ;;  %p7677_p0 = scmp.ne.s32.totalorder %s8067_s6, %s7676_s14  ;;  %s95_s17 = int_to_ptr.vmem [resolvable:$true] %s94_s17 }
  0x7a   :  { %p7680_p1 = scmp.lt.u32.totalorder %s7676_s14, %s8067_s6 }
  0x7c   :  { %p7682_p2 = pnand %p7680_p1, %p7677_p0 }
  0x7e   :  { %7685 = shalt.err (!%p7682_p2)
}
  0x7f   :  { %s7686_s13 = scalar_lea.vmem %s95_s17, 8192  ;;  %p7691_p4 = scmp.lt.s32.totalorder %s95_s17, %s95_s17 }
  0x80   :  { %p7687_p3 = scmp.ne.s32.totalorder %s95_s17, %s7686_s13  ;;  %p7692_p5 = scmp.lt.s32.totalorder %s7686_s13, %s7686_s13 }
  0x82   :  { %p7693_p6 = por %p7692_p5, %p7691_p4 }
  0x84   :  { %p7694_p7 = pnand %p7693_p6, %p7687_p3 }
  0x86   :  { %7697 = shalt.err (!%p7694_p7)
}
  0x87   :  { %s7746_s4 = smov 128   ;;  %s7747_s20 = smov 8  }
  0x88   :  { %100 = dma.hbm_to_vmem [thread:$0]  %s8067_s6, 8192, %s95_s17, [#allocation13], %s7746_s4, %s7746_s4, %s7747_s20  }
  0x89   :  { %s7748_s23 = smov [#allocation17]   ;;  %s7698_s27 = scalar_lea.hbm %s8069_s8, 32 }
  0x8a   :  { %s117_s24 = sshll.u32 %s7748_s23, 4  ;;  %p7699_p8 = scmp.ne.s32.totalorder %s8069_s8, %s7698_s27  ;;  %s118_s24 = int_to_ptr.vmem [resolvable:$true] %s117_s24 }
  0x8b   :  { %p7702_p9 = scmp.lt.u32.totalorder %s7698_s27, %s8069_s8 }
  0x8d   :  { %p7704_p10 = pnand %p7702_p9, %p7699_p8 }
  0x8f   :  { %7707 = shalt.err (!%p7704_p10)
}
  0x90   :  { %s7708_s2 = scalar_lea.vmem %s118_s24, 32  ;;  %p7713_p12 = scmp.lt.s32.totalorder %s118_s24, %s118_s24 }
  0x91   :  { %p7709_p11 = scmp.ne.s32.totalorder %s118_s24, %s7708_s2  ;;  %p7714_p13 = scmp.lt.s32.totalorder %s7708_s2, %s7708_s2 }
  0x93   :  { %p7715_p0 = por %p7714_p13, %p7713_p12 }
  0x95   :  { %p7716_p1 = pnand %p7715_p0, %p7709_p11 }
  0x97   :  { %7719 = shalt.err (!%p7716_p1)
}
  0x98   :  { %120 = dma.hbm_to_vmem [thread:$0]  %s8069_s8, 32, %s118_s24, [#allocation16]  }
  0x99   :  { %7720 = dma.done.wait [#allocation5], 1792  }
  0x9a   :  { %7721 = vsyncadd [#allocation5], 4294965504 }
  0x9b   :  { %7722 = dma.done.wait [#allocation7], 57472  }
  0x9c   :  { %7723 = vsyncadd [#allocation7], 4294909824 }
  0x9d   :  { %7724 = dma.done.wait [#allocation10], 32896  }
  0x9e   :  { %7725 = vsyncadd [#allocation10], 4294934400 }
  0x9f   :  { %7726 = dma.done.wait [#allocation13], 8256  }
  0xa0   :  { %7727 = vsyncadd [#allocation13], 4294959040 }
  0xa1   :  { %7728 = dma.done.wait [#allocation16], 64  }
  0xa2   :  { %7729 = vsyncadd [#allocation16], 4294967232  ;;  %v196_v0 = vld [vmem:[#allocation8] sm:$0xff]  ;;  %v161_v55 = vld [vmem:[#allocation4 + $0x8] sm:$0xff]  ;;  %vm187_vm0 = vcmask 130048   ;;  %vm6113_vm1 = vcmask 7168  }
  0xa3   :  { %v200_v1 = vld [vmem:[#allocation8 + $0x20] sm:$0xff]  ;;  %v168_v56 = vld [vmem:[#allocation4 + $0x40] sm:$0xff] }
  0xa4   :  { %v324_v2 = vld [vmem:[#allocation8 + $0x400] sm:$0xff]  ;;  %v6127_v3 = vcombine.high %v196_v0, %v200_v1  ;;  %v6126_v5 = vcombine.low %v196_v0, %v200_v1  ;;  %v7913_v58 = vpack.c.bf16 %v168_v56, %v161_v55  ;;  %v160_v59 = vld [vmem:[#allocation4] sm:$0xff]  ;;  %v170_v1 = vld [vmem:[#allocation4 + $0x50] sm:$0xff] }
  0xa5   :  { %v328_v4 = vld [vmem:[#allocation8 + $0x420] sm:$0xff] }
  0xa6   :  { %v204_v6 = vld [vmem:[#allocation8 + $0x40] sm:$0xff]  ;;  %v6255_v8 = vcombine.high %v324_v2, %v328_v4  ;;  %v6254_v9 = vcombine.low %v324_v2, %v328_v4  ;;  %2926 = vmatprep.subr.bf16.mxu1 %v6127_v3  ;;  %182 = vst [vmem:[#allocation2 + $0x8] sm:$0xff] %v7913_v58  ;;  %2958 = vmatprep.mubr.bf16.mxu1 %v7913_v58  ;;  %v162_v4 = vld [vmem:[#allocation4 + $0x10] sm:$0xff] }
  0xa7   :  { %v208_v7 = vld [vmem:[#allocation8 + $0x60] sm:$0xff]  ;;  %2927 = vmatpush1.bf16.msra.mxu1 %v6126_v5 }
  0xa8   :  { %v6135_v10 = vcombine.high %v204_v6, %v208_v7  ;;  %v332_v11 = vld [vmem:[#allocation8 + $0x440] sm:$0xff]  ;;  %2969 = vmatprep.subr.bf16.mxu0 %v6255_v8  ;;  %v6134_v18 = vcombine.low %v204_v6, %v208_v7  ;;  %v169_v7 = vld [vmem:[#allocation4 + $0x48] sm:$0xff] }
  0xa9   :  { %v336_v12 = vld [vmem:[#allocation8 + $0x460] sm:$0xff]  ;;  %2970 = vmatpush1.bf16.msra.mxu0 %v6254_v9 }
  0xaa   :  { %v212_v13 = vld [vmem:[#allocation8 + $0x80] sm:$0xff]  ;;  %v6263_v14 = vcombine.high %v332_v11, %v336_v12  ;;  %2928 = vmatprep.subr.bf16.mxu1 %v6135_v10  ;;  %v6262_v19 = vcombine.low %v332_v11, %v336_v12  ;;  %v7924_v11 = vpack.c.bf16 %v169_v7, %v162_v4 }
  0xab   :  { %v216_v15 = vld [vmem:[#allocation8 + $0xa0] sm:$0xff]  ;;  %2929 = vmatpush1.bf16.msra.mxu1 %v6134_v18 }
  0xac   :  { %v340_v16 = vld [vmem:[#allocation8 + $0x480] sm:$0xff]  ;;  %v6143_v20 = vcombine.high %v212_v13, %v216_v15  ;;  %2971 = vmatprep.subr.bf16.mxu0 %v6263_v14  ;;  %v6142_v26 = vcombine.low %v212_v13, %v216_v15  ;;  %183 = vst [vmem:[#allocation2 + $0x10] sm:$0xff] %v7924_v11 }
  0xad   :  { %v344_v17 = vld [vmem:[#allocation8 + $0x4a0] sm:$0xff]  ;;  %2972 = vmatpush1.bf16.msra.mxu0 %v6262_v19 }
  0xae   :  { %v6271_v21 = vcombine.high %v340_v16, %v344_v17  ;;  %v220_v22 = vld [vmem:[#allocation8 + $0xc0] sm:$0xff]  ;;  %2930 = vmatprep.subr.bf16.mxu1 %v6143_v20  ;;  %v6270_v27 = vcombine.low %v340_v16, %v344_v17 }
  0xaf   :  { %v224_v23 = vld [vmem:[#allocation8 + $0xe0] sm:$0xff]  ;;  %2931 = vmatpush1.bf16.msra.mxu1 %v6142_v26 }
  0xb0   :  { %v348_v24 = vld [vmem:[#allocation8 + $0x4c0] sm:$0xff]  ;;  %v6151_v28 = vcombine.high %v220_v22, %v224_v23  ;;  %2973 = vmatprep.subr.bf16.mxu0 %v6271_v21  ;;  %v6150_v34 = vcombine.low %v220_v22, %v224_v23 }
  0xb1   :  { %v352_v25 = vld [vmem:[#allocation8 + $0x4e0] sm:$0xff]  ;;  %2974 = vmatpush1.bf16.msra.mxu0 %v6270_v27 }
  0xb2   :  { %v6279_v29 = vcombine.high %v348_v24, %v352_v25  ;;  %v228_v30 = vld [vmem:[#allocation8 + $0x100] sm:$0xff]  ;;  %2932 = vmatprep.subr.bf16.mxu1 %v6151_v28  ;;  %v6278_v35 = vcombine.low %v348_v24, %v352_v25 }
  0xb3   :  { %v232_v31 = vld [vmem:[#allocation8 + $0x120] sm:$0xff]  ;;  %2933 = vmatpush1.bf16.msra.mxu1 %v6150_v34 }
  0xb4   :  { %v356_v32 = vld [vmem:[#allocation8 + $0x500] sm:$0xff]  ;;  %v6159_v36 = vcombine.high %v228_v30, %v232_v31  ;;  %2975 = vmatprep.subr.bf16.mxu0 %v6279_v29  ;;  %v6158_v42 = vcombine.low %v228_v30, %v232_v31 }
  0xb5   :  { %v360_v33 = vld [vmem:[#allocation8 + $0x520] sm:$0xff]  ;;  %2976 = vmatpush1.bf16.msra.mxu0 %v6278_v35 }
  0xb6   :  { %v6287_v37 = vcombine.high %v356_v32, %v360_v33  ;;  %v236_v38 = vld [vmem:[#allocation8 + $0x140] sm:$0xff]  ;;  %2934 = vmatprep.subr.bf16.mxu1 %v6159_v36  ;;  %v6286_v43 = vcombine.low %v356_v32, %v360_v33 }
  0xb7   :  { %v240_v39 = vld [vmem:[#allocation8 + $0x160] sm:$0xff]  ;;  %2935 = vmatpush1.bf16.msra.mxu1 %v6158_v42 }
  0xb8   :  { %v364_v40 = vld [vmem:[#allocation8 + $0x540] sm:$0xff]  ;;  %v6167_v44 = vcombine.high %v236_v38, %v240_v39  ;;  %2977 = vmatprep.subr.bf16.mxu0 %v6287_v37  ;;  %v6166_v50 = vcombine.low %v236_v38, %v240_v39 }
  0xb9   :  { %v368_v41 = vld [vmem:[#allocation8 + $0x560] sm:$0xff]  ;;  %2978 = vmatpush1.bf16.msra.mxu0 %v6286_v43 }
  0xba   :  { %v6295_v45 = vcombine.high %v364_v40, %v368_v41  ;;  %v244_v46 = vld [vmem:[#allocation8 + $0x180] sm:$0xff]  ;;  %2936 = vmatprep.subr.bf16.mxu1 %v6167_v44  ;;  %v6294_v52 = vcombine.low %v364_v40, %v368_v41 }
  0xbb   :  { %v248_v47 = vld [vmem:[#allocation8 + $0x1a0] sm:$0xff]  ;;  %2937 = vmatpush1.bf16.msra.mxu1 %v6166_v50  ;;  %v172_v50 = vld [vmem:[#allocation4 + $0x60] sm:$0xff] }
  0xbc   :  { %v372_v48 = vld [vmem:[#allocation8 + $0x580] sm:$0xff]  ;;  %v6175_v53 = vcombine.high %v244_v46, %v248_v47  ;;  %2979 = vmatprep.subr.bf16.mxu0 %v6295_v45  ;;  %v6174_v2 = vcombine.low %v244_v46, %v248_v47 }
  0xbd   :  { %v376_v49 = vld [vmem:[#allocation8 + $0x5a0] sm:$0xff]  ;;  %2980 = vmatpush1.bf16.msra.mxu0 %v6294_v52 }
  0xbe   :  { %v252_v51 = vld [vmem:[#allocation8 + $0x1c0] sm:$0xff]  ;;  %v6303_v57 = vcombine.high %v372_v48, %v376_v49  ;;  %2938 = vmatprep.subr.bf16.mxu1 %v6175_v53  ;;  %v6302_v5 = vcombine.low %v372_v48, %v376_v49  ;;  %v165_v49 = vld [vmem:[#allocation4 + $0x28] sm:$0xff] }
  0xbf   :  { %v256_v54 = vld [vmem:[#allocation8 + $0x1e0] sm:$0xff]  ;;  %2939 = vmatpush1.bf16.msra.mxu1 %v6174_v2  ;;  %v7927_v55 = vpack.c.bf16 %v172_v50, %v165_v49  ;;  %v225_v49 = vld [vmem:[#allocation8 + $0xe8] sm:$0xff] }
  0xc0   :  { %v167_v60 = vld [vmem:[#allocation4 + $0x38] sm:$0xff]  ;;  %v6183_v6 = vcombine.high %v252_v51, %v256_v54  ;;  %2981 = vmatprep.subr.bf16.mxu0 %v6303_v57  ;;  %v6182_v14 = vcombine.low %v252_v51, %v256_v54  ;;  %v164_v57 = vld [vmem:[#allocation4 + $0x20] sm:$0xff] }
  0xc1   :  { %v163_v61 = vld [vmem:[#allocation4 + $0x18] sm:$0xff]  ;;  %v7915_v0 = vpack.c.bf16 %v167_v60, %v160_v59  ;;  %2982 = vmatpush1.bf16.msra.mxu0 %v6302_v5  ;;  %186 = vst [vmem:[#allocation2 + $0x28] sm:$0xff] %v7927_v55 }
  0xc2   :  { %v380_v62 = vld [vmem:[#allocation8 + $0x5c0] sm:$0xff]  ;;  %v7919_v3 = vpack.c.bf16 %v170_v1, %v163_v61  ;;  %2940 = vmatprep.subr.bf16.mxu1 %v6183_v6 }
  0xc3   :  { %v384_v63 = vld [vmem:[#allocation8 + $0x5e0] sm:$0xff]  ;;  %181 = vst [vmem:[#allocation2] sm:$0xff] %v7915_v0  ;;  %2941 = vmatpush1.bf16.msra.mxu1 %v6182_v14 }
  0xc4   :  { %v6311_v8 = vcombine.high %v380_v62, %v384_v63  ;;  %v260_v9 = vld [vmem:[#allocation8 + $0x200] sm:$0xff]  ;;  %184 = vst [vmem:[#allocation2 + $0x18] sm:$0xff] %v7919_v3  ;;  %3001 = vmatprep.mubr.bf16.mxu0 %v7919_v3  ;;  %v6310_v15 = vcombine.low %v380_v62, %v384_v63 }
  0xc5   :  { %v264_v10 = vld [vmem:[#allocation8 + $0x220] sm:$0xff] }
  0xc6   :  { %v388_v12 = vld [vmem:[#allocation8 + $0x600] sm:$0xff]  ;;  %v6191_v16 = vcombine.high %v260_v9, %v264_v10  ;;  %2983 = vmatprep.subr.bf16.mxu0 %v6311_v8  ;;  %v6190_v22 = vcombine.low %v260_v9, %v264_v10 }
  0xc7   :  { %v392_v13 = vld [vmem:[#allocation8 + $0x620] sm:$0xff]  ;;  %2984 = vmatpush1.bf16.msra.mxu0 %v6310_v15 }
  0xc8   :  { %v6319_v17 = vcombine.high %v388_v12, %v392_v13  ;;  %v268_v18 = vld [vmem:[#allocation8 + $0x240] sm:$0xff]  ;;  %2942 = vmatprep.subr.bf16.mxu1 %v6191_v16  ;;  %v6318_v23 = vcombine.low %v388_v12, %v392_v13 }
  0xc9   :  { %v272_v19 = vld [vmem:[#allocation8 + $0x260] sm:$0xff]  ;;  %2943 = vmatpush1.bf16.msra.mxu1 %v6190_v22  ;;  %v7020_v22 = vld [vmem:[#allocation6] sm:$0xff]  }
  0xca   :  { %v396_v20 = vld [vmem:[#allocation8 + $0x640] sm:$0xff]  ;;  %v6199_v24 = vcombine.high %v268_v18, %v272_v19  ;;  %2985 = vmatprep.subr.bf16.mxu0 %v6319_v17  ;;  %v6198_v30 = vcombine.low %v268_v18, %v272_v19  ;;  %v197_v17 = vld [vmem:[#allocation8 + $0x8] sm:$0xff]  ;;  %159 = vst [vmem:[#allocation2 + $0x30] sm:$0xff] %v7020_v22 }
  0xcb   :  { %v400_v21 = vld [vmem:[#allocation8 + $0x660] sm:$0xff]  ;;  %2986 = vmatpush1.bf16.msra.mxu0 %v6318_v23  ;;  %v166_v23 = vld [vmem:[#allocation4 + $0x30] sm:$0xff]  ;;  %v257_v22 = vld [vmem:[#allocation8 + $0x1e8] sm:$0xff] }
  0xcc   :  { %v6327_v25 = vcombine.high %v396_v20, %v400_v21  ;;  %v276_v26 = vld [vmem:[#allocation8 + $0x280] sm:$0xff]  ;;  %2944 = vmatprep.subr.bf16.mxu1 %v6199_v24  ;;  %v6326_v31 = vcombine.low %v396_v20, %v400_v21  ;;  %v201_v20 = vld [vmem:[#allocation8 + $0x28] sm:$0xff]  ;;  %v173_v24 = vld [vmem:[#allocation4 + $0x68] sm:$0xff] }
  0xcd   :  { %v280_v27 = vld [vmem:[#allocation8 + $0x2a0] sm:$0xff]  ;;  %2945 = vmatpush1.bf16.msra.mxu1 %v6198_v30  ;;  %v6129_v30 = vcombine.high %v197_v17, %v201_v20 }
  0xce   :  { %v404_v28 = vld [vmem:[#allocation8 + $0x680] sm:$0xff]  ;;  %v6207_v32 = vcombine.high %v276_v26, %v280_v27  ;;  %2987 = vmatprep.subr.bf16.mxu0 %v6327_v25  ;;  %v6206_v38 = vcombine.low %v276_v26, %v280_v27  ;;  %v180_v27 = vpack.c.bf16 %v173_v24, %v166_v23 }
  0xcf   :  { %v408_v29 = vld [vmem:[#allocation8 + $0x6a0] sm:$0xff]  ;;  %2988 = vmatpush1.bf16.msra.mxu0 %v6326_v31 }
  0xd0   :  { %v6335_v33 = vcombine.high %v404_v28, %v408_v29  ;;  %v284_v34 = vld [vmem:[#allocation8 + $0x2c0] sm:$0xff]  ;;  %2946 = vmatprep.subr.bf16.mxu1 %v6207_v32  ;;  %v6334_v39 = vcombine.low %v404_v28, %v408_v29  ;;  %188 = vst.msk [vmem:[#allocation2 + $0x30] sm:$0xff] %vm187_vm0, %v180_v27  ;;  %v205_v32 = vld [vmem:[#allocation8 + $0x48] sm:$0xff] }
  0xd1   :  { %v288_v35 = vld [vmem:[#allocation8 + $0x2e0] sm:$0xff]  ;;  %2947 = vmatpush1.bf16.msra.mxu1 %v6206_v38 }
  0xd2   :  { %v412_v36 = vld [vmem:[#allocation8 + $0x6c0] sm:$0xff]  ;;  %v6215_v40 = vcombine.high %v284_v34, %v288_v35  ;;  %2989 = vmatprep.subr.bf16.mxu0 %v6335_v33  ;;  %v6214_v46 = vcombine.low %v284_v34, %v288_v35  ;;  %v209_v33 = vld [vmem:[#allocation8 + $0x68] sm:$0xff] }
  0xd3   :  { %v416_v37 = vld [vmem:[#allocation8 + $0x6e0] sm:$0xff]  ;;  %2990 = vmatpush1.bf16.msra.mxu0 %v6334_v39  ;;  %v6137_v38 = vcombine.high %v205_v32, %v209_v33 }
  0xd4   :  { %v6343_v41 = vcombine.high %v412_v36, %v416_v37  ;;  %v292_v42 = vld [vmem:[#allocation8 + $0x300] sm:$0xff]  ;;  %2948 = vmatprep.subr.bf16.mxu1 %v6215_v40  ;;  %v6342_v47 = vcombine.low %v412_v36, %v416_v37  ;;  %v6128_v36 = vcombine.low %v197_v17, %v201_v20  ;;  %v213_v40 = vld [vmem:[#allocation8 + $0x88] sm:$0xff] }
  0xd5   :  { %v296_v43 = vld [vmem:[#allocation8 + $0x320] sm:$0xff]  ;;  %2949 = vmatpush1.bf16.msra.mxu1 %v6214_v46  ;;  %v253_v20 = vld [vmem:[#allocation8 + $0x1c8] sm:$0xff] }
  0xd6   :  { %v420_v44 = vld [vmem:[#allocation8 + $0x700] sm:$0xff]  ;;  %v6223_v48 = vcombine.high %v292_v42, %v296_v43  ;;  %2991 = vmatprep.subr.bf16.mxu0 %v6343_v41  ;;  %v6222_v60 = vcombine.low %v292_v42, %v296_v43  ;;  %v217_v41 = vld [vmem:[#allocation8 + $0xa8] sm:$0xff] }
  0xd7   :  { %v424_v45 = vld [vmem:[#allocation8 + $0x720] sm:$0xff]  ;;  %2992 = vmatpush1.bf16.msra.mxu0 %v6342_v47  ;;  %v6145_v46 = vcombine.high %v213_v40, %v217_v41 }
  0xd8   :  { %v6351_v51 = vcombine.high %v420_v44, %v424_v45  ;;  %v300_v52 = vld [vmem:[#allocation8 + $0x340] sm:$0xff]  ;;  %2950 = vmatprep.subr.bf16.mxu1 %v6223_v48  ;;  %v6350_v62 = vcombine.low %v420_v44, %v424_v45  ;;  %v6136_v44 = vcombine.low %v205_v32, %v209_v33  ;;  %v221_v48 = vld [vmem:[#allocation8 + $0xc8] sm:$0xff] }
  0xd9   :  { %v304_v53 = vld [vmem:[#allocation8 + $0x360] sm:$0xff]  ;;  %2951 = vmatpush1.bf16.msra.mxu1 %v6222_v60  ;;  %v233_v60 = vld [vmem:[#allocation8 + $0x128] sm:$0xff] }
  0xda   :  { %v428_v54 = vld [vmem:[#allocation8 + $0x740] sm:$0xff]  ;;  %v6231_v63 = vcombine.high %v300_v52, %v304_v53  ;;  %2993 = vmatprep.subr.bf16.mxu0 %v6351_v51  ;;  %v6230_v7 = vcombine.low %v300_v52, %v304_v53  ;;  %v6144_v52 = vcombine.low %v213_v40, %v217_v41  ;;  %v6153_v53 = vcombine.high %v221_v48, %v225_v49 }
  0xdb   :  { %v432_v56 = vld [vmem:[#allocation8 + $0x760] sm:$0xff]  ;;  %2994 = vmatpush1.bf16.msra.mxu0 %v6350_v62  ;;  %v6152_v62 = vcombine.low %v221_v48, %v225_v49 }
  0xdc   :  { %v171_v59 = vld [vmem:[#allocation4 + $0x58] sm:$0xff]  ;;  %v6359_v1 = vcombine.high %v428_v54, %v432_v56  ;;  %2952 = vmatprep.subr.bf16.mxu1 %v6231_v63  ;;  %v6358_v8 = vcombine.low %v428_v54, %v432_v56 }
  0xdd   :  { %v7930_v61 = vpack.c.bf16 %v171_v59, %v164_v57  ;;  %v308_v2 = vld [vmem:[#allocation8 + $0x380] sm:$0xff]  ;;  %2953 = vmatpush1.bf16.msra.mxu1 %v6230_v7  ;;  %v229_v57 = vld [vmem:[#allocation8 + $0x108] sm:$0xff] }
  0xde   :  { %v312_v4 = vld [vmem:[#allocation8 + $0x3a0] sm:$0xff]  ;;  %2995 = vmatprep.subr.bf16.mxu0 %v6359_v1  ;;  %v6161_v63 = vcombine.high %v229_v57, %v233_v60 }
  0xdf   :  { %185 = vst [vmem:[#allocation2 + $0x20] sm:$0xff] %v7930_v61  ;;  %v436_v5 = vld [vmem:[#allocation8 + $0x780] sm:$0xff]  ;;  %v6239_v9 = vcombine.high %v308_v2, %v312_v4  ;;  %v6238_v16 = vcombine.low %v308_v2, %v312_v4  ;;  %2996 = vmatpush1.bf16.msra.mxu0 %v6358_v8  ;;  %v237_v2 = vld [vmem:[#allocation8 + $0x148] sm:$0xff] }
  0xe0   :  { %v440_v6 = vld [vmem:[#allocation8 + $0x7a0] sm:$0xff] }
  0xe1   :  { %v6367_v10 = vcombine.high %v436_v5, %v440_v6  ;;  %v316_v12 = vld [vmem:[#allocation8 + $0x3c0] sm:$0xff]  ;;  %2954 = vmatprep.subr.bf16.mxu1 %v6239_v9  ;;  %v6366_v18 = vcombine.low %v436_v5, %v440_v6  ;;  %v241_v5 = vld [vmem:[#allocation8 + $0x168] sm:$0xff]  ;;  %v6160_v6 = vcombine.low %v229_v57, %v233_v60 }
  0xe2   :  { %v320_v13 = vld [vmem:[#allocation8 + $0x3e0] sm:$0xff]  ;;  %2955 = vmatpush1.bf16.msra.mxu1 %v6238_v16  ;;  %v6169_v8 = vcombine.high %v237_v2, %v241_v5 }
  0xe3   :  { %v444_v14 = vld [vmem:[#allocation8 + $0x7c0] sm:$0xff]  ;;  %v6247_v19 = vcombine.high %v316_v12, %v320_v13  ;;  %2997 = vmatprep.subr.bf16.mxu0 %v6367_v10  ;;  %v6246_v28 = vcombine.low %v316_v12, %v320_v13  ;;  %v245_v12 = vld [vmem:[#allocation8 + $0x188] sm:$0xff] }
  0xe4   :  { %v448_v15 = vld [vmem:[#allocation8 + $0x7e0] sm:$0xff]  ;;  %2998 = vmatpush1.bf16.msra.mxu0 %v6366_v18 }
  0xe5   :  { %v6375_v21 = vcombine.high %v444_v14, %v448_v15  ;;  %v452_v25 = vld [vmem:[#allocation8 + $0x800] sm:$0xff]  ;;  %2956 = vmatprep.subr.bf16.mxu1 %v6247_v19  ;;  %v6374_v29 = vcombine.low %v444_v14, %v448_v15  ;;  %v249_v14 = vld [vmem:[#allocation8 + $0x1a8] sm:$0xff]  ;;  %v6168_v15 = vcombine.low %v237_v2, %v241_v5 }
  0xe6   :  { %v456_v26 = vld [vmem:[#allocation8 + $0x820] sm:$0xff]  ;;  %2957 = vmatpush1.bf16.msra.mxu1 %v6246_v28  ;;  %v6177_v17 = vcombine.high %v245_v12, %v249_v14  ;;  %v6176_v23 = vcombine.low %v245_v12, %v249_v14  ;;  %v261_v28 = vld [vmem:[#allocation8 + $0x208] sm:$0xff] }
  0xe7   :  { %2999 = vmatprep.subr.bf16.mxu0 %v6375_v21  ;;  %v6383_v31 = vcombine.high %v452_v25, %v456_v26  ;;  %v460_v34 = vld [vmem:[#allocation8 + $0x840] sm:$0xff]  ;;  %v6382_v37 = vcombine.low %v452_v25, %v456_v26  ;;  %3098 = vmatprep.subr.bf16.mxu1 %v6129_v30  ;;  %v6185_v25 = vcombine.high %v253_v20, %v257_v22  ;;  %v265_v30 = vld [vmem:[#allocation8 + $0x228] sm:$0xff] }
  0xe8   :  { %v464_v35 = vld [vmem:[#allocation8 + $0x860] sm:$0xff]  ;;  %3000 = vmatpush1.bf16.msra.mxu0 %v6374_v29  ;;  %v6193_v33 = vcombine.high %v261_v28, %v265_v30 }
  0xe9   :  { %3012 = vmatprep.subr.bf16.mxu0 %v6383_v31  ;;  %v6391_v39 = vcombine.high %v460_v34, %v464_v35  ;;  %2959 = vmatmul.mubr.bf16.vlgmr.msra.gmra.mrb[0].mxu1 %v7915_v0  ;;  %v468_v42 = vld [vmem:[#allocation8 + $0x880] sm:$0xff]  ;;  %v6390_v45 = vcombine.low %v460_v34, %v464_v35  ;;  %v6184_v31 = vcombine.low %v253_v20, %v257_v22 }
  0xea   :  { %v472_v43 = vld [vmem:[#allocation8 + $0x8a0] sm:$0xff]  ;;  %3099 = vmatpush1.bf16.msra.mxu1 %v6128_v36  ;;  %3130 = vmatprep.mubr.bf16.mxu1 %v7913_v58  ;;  %v269_v36 = vld [vmem:[#allocation8 + $0x248] sm:$0xff] }
  0xeb   :  { %3002 = vmatmul.mubr.bf16.vlgmr.msra.gmra.mrb[0].mxu0 %v7924_v11  ;;  %3100 = vmatprep.subr.bf16.mxu1 %v6137_v38  ;;  %v6399_v47 = vcombine.high %v468_v42, %v472_v43  ;;  %v476_v50 = vld [vmem:[#allocation8 + $0x8c0] sm:$0xff]  ;;  %v6398_v11 = vcombine.low %v468_v42, %v472_v43  ;;  %v273_v38 = vld [vmem:[#allocation8 + $0x268] sm:$0xff] }
  0xec   :  { %3013 = vmatpush1.bf16.msra.mxu0 %v6382_v37  ;;  %3044 = vmatprep.mubr.bf16.mxu0 %v7927_v55  ;;  %v480_v51 = vld [vmem:[#allocation8 + $0x8e0] sm:$0xff]  ;;  %v6201_v41 = vcombine.high %v269_v36, %v273_v38 }
  0xed   :  { %3014 = vmatprep.subr.bf16.mxu0 %v6391_v39  ;;  %v484_v54 = vld [vmem:[#allocation8 + $0x900] sm:$0xff]  ;;  %v6407_v59 = vcombine.high %v476_v50, %v480_v51  ;;  %v6406_v55 = vcombine.low %v476_v50, %v480_v51  ;;  %v6192_v39 = vcombine.low %v261_v28, %v265_v30 }
  0xee   :  { %3101 = vmatpush1.bf16.msra.mxu1 %v6136_v44  ;;  %v488_v56 = vld [vmem:[#allocation8 + $0x920] sm:$0xff]  ;;  %v277_v44 = vld [vmem:[#allocation8 + $0x288] sm:$0xff] }
  0xef   :  { %3102 = vmatprep.subr.bf16.mxu1 %v6145_v46  ;;  %v492_v1 = vld [vmem:[#allocation8 + $0x940] sm:$0xff]  ;;  %v6415_v4 = vcombine.high %v484_v54, %v488_v56  ;;  %v6414_v7 = vcombine.low %v484_v54, %v488_v56  ;;  %v281_v46 = vld [vmem:[#allocation8 + $0x2a8] sm:$0xff] }
  0xf0   :  { %3015 = vmatpush1.bf16.msra.mxu0 %v6390_v45  ;;  %v496_v58 = vld [vmem:[#allocation8 + $0x960] sm:$0xff]  ;;  %v6209_v49 = vcombine.high %v277_v44, %v281_v46  ;;  %v6208_v54 = vcombine.low %v277_v44, %v281_v46 }
  0xf1   :  { %3016 = vmatprep.subr.bf16.mxu0 %v6399_v47  ;;  %v500_v9 = vld [vmem:[#allocation8 + $0x980] sm:$0xff]  ;;  %v6423_v13 = vcombine.high %v492_v1, %v496_v58  ;;  %v6422_v16 = vcombine.low %v492_v1, %v496_v58  ;;  %v6200_v47 = vcombine.low %v269_v36, %v273_v38 }
  0xf2   :  { %3103 = vmatpush1.bf16.msra.mxu1 %v6144_v52  ;;  %v504_v10 = vld [vmem:[#allocation8 + $0x9a0] sm:$0xff]  ;;  %v285_v52 = vld [vmem:[#allocation8 + $0x2c8] sm:$0xff] }
  0xf3   :  { %3104 = vmatprep.subr.bf16.mxu1 %v6153_v53  ;;  %v508_v18 = vld [vmem:[#allocation8 + $0x9c0] sm:$0xff]  ;;  %v6431_v21 = vcombine.high %v500_v9, %v504_v10  ;;  %v6430_v24 = vcombine.low %v500_v9, %v504_v10  ;;  %v289_v53 = vld [vmem:[#allocation8 + $0x2e8] sm:$0xff] }
  0xf4   :  { %3017 = vmatpush1.bf16.msra.mxu0 %v6398_v11  ;;  %v512_v19 = vld [vmem:[#allocation8 + $0x9e0] sm:$0xff]  ;;  %v6217_v57 = vcombine.high %v285_v52, %v289_v53  ;;  %v6216_v1 = vcombine.low %v285_v52, %v289_v53 }
  0xf5   :  { %3018 = vmatprep.subr.bf16.mxu0 %v6407_v59  ;;  %v516_v26 = vld [vmem:[#allocation8 + $0xa00] sm:$0xff]  ;;  %v6439_v29 = vcombine.high %v508_v18, %v512_v19  ;;  %v6438_v32 = vcombine.low %v508_v18, %v512_v19 }
  0xf6   :  { %3105 = vmatpush1.bf16.msra.mxu1 %v6152_v62  ;;  %v520_v27 = vld [vmem:[#allocation8 + $0xa20] sm:$0xff]  ;;  %v293_v62 = vld [vmem:[#allocation8 + $0x308] sm:$0xff] }
  0xf7   :  { %3106 = vmatprep.subr.bf16.mxu1 %v6161_v63  ;;  %v524_v34 = vld [vmem:[#allocation8 + $0xa40] sm:$0xff]  ;;  %v6447_v37 = vcombine.high %v516_v26, %v520_v27  ;;  %v6446_v40 = vcombine.low %v516_v26, %v520_v27  ;;  %v297_v63 = vld [vmem:[#allocation8 + $0x328] sm:$0xff] }
  0xf8   :  { %3019 = vmatpush1.bf16.msra.mxu0 %v6406_v55  ;;  %v528_v35 = vld [vmem:[#allocation8 + $0xa60] sm:$0xff]  ;;  %v6225_v2 = vcombine.high %v293_v62, %v297_v63  ;;  %v6224_v9 = vcombine.low %v293_v62, %v297_v63  ;;  %v357_v63 = vld [vmem:[#allocation8 + $0x508] sm:$0xff] }
  0xf9   :  { %3020 = vmatprep.subr.bf16.mxu0 %v6415_v4  ;;  %v532_v42 = vld [vmem:[#allocation8 + $0xa80] sm:$0xff]  ;;  %v6455_v45 = vcombine.high %v524_v34, %v528_v35  ;;  %v6454_v48 = vcombine.low %v524_v34, %v528_v35 }
  0xfa   :  { %3107 = vmatpush1.bf16.msra.mxu1 %v6160_v6  ;;  %v536_v43 = vld [vmem:[#allocation8 + $0xaa0] sm:$0xff]  ;;  %v301_v6 = vld [vmem:[#allocation8 + $0x348] sm:$0xff] }
  0xfb   :  { %3108 = vmatprep.subr.bf16.mxu1 %v6169_v8  ;;  %v540_v50 = vld [vmem:[#allocation8 + $0xac0] sm:$0xff]  ;;  %v6463_v11 = vcombine.high %v532_v42, %v536_v43  ;;  %v6462_v56 = vcombine.low %v532_v42, %v536_v43  ;;  %v305_v8 = vld [vmem:[#allocation8 + $0x368] sm:$0xff] }
  0xfc   :  { %3021 = vmatpush1.bf16.msra.mxu0 %v6414_v7  ;;  %v544_v51 = vld [vmem:[#allocation8 + $0xae0] sm:$0xff]  ;;  %v6233_v12 = vcombine.high %v301_v6, %v305_v8  ;;  %v6232_v18 = vcombine.low %v301_v6, %v305_v8 }
  0xfd   :  { %3022 = vmatprep.subr.bf16.mxu0 %v6423_v13  ;;  %v548_v59 = vld [vmem:[#allocation8 + $0xb00] sm:$0xff]  ;;  %v6471_v55 = vcombine.high %v540_v50, %v544_v51  ;;  %v6470_v58 = vcombine.low %v540_v50, %v544_v51 }
  0xfe   :  { %3109 = vmatpush1.bf16.msra.mxu1 %v6168_v15  ;;  %v552_v60 = vld [vmem:[#allocation8 + $0xb20] sm:$0xff]  ;;  %v309_v15 = vld [vmem:[#allocation8 + $0x388] sm:$0xff] }
  0xff   :  { %3110 = vmatprep.subr.bf16.mxu1 %v6177_v17  ;;  %v556_v4 = vld [vmem:[#allocation8 + $0xb40] sm:$0xff]  ;;  %v6479_v7 = vcombine.high %v548_v59, %v552_v60  ;;  %v6478_v10 = vcombine.low %v548_v59, %v552_v60  ;;  %v313_v17 = vld [vmem:[#allocation8 + $0x3a8] sm:$0xff]  ;;  %v7749_v59 = vmov 0  }
 0x100   :  { %3023 = vmatpush1.bf16.msra.mxu0 %v6422_v16  ;;  %v560_v5 = vld [vmem:[#allocation8 + $0xb60] sm:$0xff]  ;;  %v6241_v20 = vcombine.high %v309_v15, %v313_v17  ;;  %v6240_v26 = vcombine.low %v309_v15, %v313_v17 }
 0x101   :  { %3024 = vmatprep.subr.bf16.mxu0 %v6431_v21  ;;  %v564_v13 = vld [vmem:[#allocation8 + $0xb80] sm:$0xff]  ;;  %v6487_v16 = vcombine.high %v556_v4, %v560_v5  ;;  %v6486_v19 = vcombine.low %v556_v4, %v560_v5 }
 0x102   :  { %3111 = vmatpush1.bf16.msra.mxu1 %v6176_v23  ;;  %v568_v14 = vld [vmem:[#allocation8 + $0xba0] sm:$0xff]  ;;  %v317_v23 = vld [vmem:[#allocation8 + $0x3c8] sm:$0xff] }
 0x103   :  { %3112 = vmatprep.subr.bf16.mxu1 %v6185_v25  ;;  %v572_v21 = vld [vmem:[#allocation8 + $0xbc0] sm:$0xff]  ;;  %v321_v25 = vld [vmem:[#allocation8 + $0x3e8] sm:$0xff]  ;;  %v6494_v27 = vcombine.low %v564_v13, %v568_v14 }
 0x104   :  { %3025 = vmatpush1.bf16.msra.mxu0 %v6430_v24  ;;  %v576_v22 = vld [vmem:[#allocation8 + $0xbe0] sm:$0xff]  ;;  %v6495_v24 = vcombine.high %v564_v13, %v568_v14  ;;  %v6249_v28 = vcombine.high %v317_v23, %v321_v25  ;;  %v6248_v34 = vcombine.low %v317_v23, %v321_v25  ;;  %v381_v25 = vld [vmem:[#allocation8 + $0x5c8] sm:$0xff] }
 0x105   :  { %3026 = vmatprep.subr.bf16.mxu0 %v6439_v29  ;;  %v580_v29 = vld [vmem:[#allocation8 + $0xc00] sm:$0xff]  ;;  %v6502_v35 = vcombine.low %v572_v21, %v576_v22 }
 0x106   :  { %3113 = vmatpush1.bf16.msra.mxu1 %v6184_v31  ;;  %v584_v30 = vld [vmem:[#allocation8 + $0xc20] sm:$0xff]  ;;  %v325_v31 = vld [vmem:[#allocation8 + $0x408] sm:$0xff] }
 0x107   :  { %3114 = vmatprep.subr.bf16.mxu1 %v6193_v33  ;;  %v329_v33 = vld [vmem:[#allocation8 + $0x428] sm:$0xff]  ;;  %v592_v38 = vld [vmem:[#allocation8 + $0xc60] sm:$0xff]  ;;  %v6510_v43 = vcombine.low %v580_v29, %v584_v30 }
 0x108   :  { %3027 = vmatpush1.bf16.msra.mxu0 %v6438_v32  ;;  %v6503_v32 = vcombine.high %v572_v21, %v576_v22  ;;  %v6257_v36 = vcombine.high %v325_v31, %v329_v33  ;;  %v6256_v42 = vcombine.low %v325_v31, %v329_v33  ;;  %v600_v46 = vld [vmem:[#allocation8 + $0xca0] sm:$0xff]  ;;  %v393_v31 = vld [vmem:[#allocation8 + $0x628] sm:$0xff] }
 0x109   :  { %3028 = vmatprep.subr.bf16.mxu0 %v6447_v37  ;;  %v588_v37 = vld [vmem:[#allocation8 + $0xc40] sm:$0xff] }
 0x10a   :  { %3115 = vmatpush1.bf16.msra.mxu1 %v6192_v39  ;;  %v333_v39 = vld [vmem:[#allocation8 + $0x448] sm:$0xff]  ;;  %v6518_v51 = vcombine.low %v588_v37, %v592_v38  ;;  %v608_v53 = vld [vmem:[#allocation8 + $0xce0] sm:$0xff] }
 0x10b   :  { %3116 = vmatprep.subr.bf16.mxu1 %v6201_v41  ;;  %v337_v41 = vld [vmem:[#allocation8 + $0x468] sm:$0xff]  ;;  %v612_v62 = vld [vmem:[#allocation8 + $0xd00] sm:$0xff] }
 0x10c   :  { %3029 = vmatpush1.bf16.msra.mxu0 %v6446_v40  ;;  %v6511_v40 = vcombine.high %v580_v29, %v584_v30  ;;  %v6265_v44 = vcombine.high %v333_v39, %v337_v41  ;;  %v6264_v50 = vcombine.low %v333_v39, %v337_v41  ;;  %v620_v6 = vld [vmem:[#allocation8 + $0xd40] sm:$0xff]  ;;  %v389_v30 = vld [vmem:[#allocation8 + $0x608] sm:$0xff] }
 0x10d   :  { %3030 = vmatprep.subr.bf16.mxu0 %v6455_v45  ;;  %v596_v45 = vld [vmem:[#allocation8 + $0xc80] sm:$0xff]  ;;  %v401_v39 = vld [vmem:[#allocation8 + $0x668] sm:$0xff] }
 0x10e   :  { %3117 = vmatpush1.bf16.msra.mxu1 %v6200_v47  ;;  %v341_v47 = vld [vmem:[#allocation8 + $0x488] sm:$0xff]  ;;  %v628_v14 = vld [vmem:[#allocation8 + $0xd80] sm:$0xff] }
 0x10f   :  { %3118 = vmatprep.subr.bf16.mxu1 %v6209_v49  ;;  %v345_v49 = vld [vmem:[#allocation8 + $0x4a8] sm:$0xff]  ;;  %v632_v15 = vld [vmem:[#allocation8 + $0xda0] sm:$0xff] }
 0x110   :  { %3031 = vmatpush1.bf16.msra.mxu0 %v6454_v48  ;;  %v6519_v48 = vcombine.high %v588_v37, %v592_v38  ;;  %v6273_v52 = vcombine.high %v341_v47, %v345_v49  ;;  %v636_v22 = vld [vmem:[#allocation8 + $0xdc0] sm:$0xff]  ;;  %v6321_v37 = vcombine.high %v389_v30, %v393_v31  ;;  %v397_v38 = vld [vmem:[#allocation8 + $0x648] sm:$0xff] }
 0x111   :  { %3032 = vmatprep.subr.bf16.mxu0 %v6463_v11  ;;  %v604_v11 = vld [vmem:[#allocation8 + $0xcc0] sm:$0xff] }
 0x112   :  { %3119 = vmatpush1.bf16.msra.mxu1 %v6208_v54  ;;  %v349_v54 = vld [vmem:[#allocation8 + $0x4c8] sm:$0xff]  ;;  %v6534_v4 = vcombine.low %v604_v11, %v608_v53  ;;  %v640_v23 = vld [vmem:[#allocation8 + $0xde0] sm:$0xff] }
 0x113   :  { %3120 = vmatprep.subr.bf16.mxu1 %v6217_v57  ;;  %v353_v57 = vld [vmem:[#allocation8 + $0x4e8] sm:$0xff]  ;;  %v6567_v33 = vcombine.high %v636_v22, %v640_v23 }
 0x114   :  { %3033 = vmatpush1.bf16.msra.mxu0 %v6462_v56  ;;  %v6527_v56 = vcombine.high %v596_v45, %v600_v46  ;;  %v6281_v60 = vcombine.high %v349_v54, %v353_v57 }
 0x115   :  { %3034 = vmatprep.subr.bf16.mxu0 %v6471_v55  ;;  %v616_v55 = vld [vmem:[#allocation8 + $0xd20] sm:$0xff] }
 0x116   :  { %3121 = vmatpush1.bf16.msra.mxu1 %v6216_v1  ;;  %v6535_v1 = vcombine.high %v604_v11, %v608_v53  ;;  %v6543_v8 = vcombine.high %v612_v62, %v616_v55 }
 0x117   :  { %3122 = vmatprep.subr.bf16.mxu1 %v6225_v2  ;;  %v6280_v2 = vcombine.low %v349_v54, %v353_v57  ;;  %v413_v54 = vld [vmem:[#allocation8 + $0x6c8] sm:$0xff]  ;;  %v222_v57 = vld [vmem:[#allocation8 + $0xd0] sm:$0xff] }
 0x118   :  { %3035 = vmatpush1.bf16.msra.mxu0 %v6470_v58  ;;  %v361_v58 = vld [vmem:[#allocation8 + $0x528] sm:$0xff] }
 0x119   :  { %3036 = vmatprep.subr.bf16.mxu0 %v6479_v7  ;;  %v6289_v5 = vcombine.high %v357_v63, %v361_v58  ;;  %v365_v7 = vld [vmem:[#allocation8 + $0x548] sm:$0xff] }
 0x11a   :  { %3123 = vmatpush1.bf16.msra.mxu1 %v6224_v9  ;;  %v369_v9 = vld [vmem:[#allocation8 + $0x568] sm:$0xff] }
 0x11b   :  { %3124 = vmatprep.subr.bf16.mxu1 %v6233_v12  ;;  %v6542_v12 = vcombine.low %v612_v62, %v616_v55  ;;  %v6297_v13 = vcombine.high %v365_v7, %v369_v9 }
 0x11c   :  { %3037 = vmatpush1.bf16.msra.mxu0 %v6478_v10  ;;  %v6288_v10 = vcombine.low %v357_v63, %v361_v58  ;;  %v425_v58 = vld [vmem:[#allocation8 + $0x728] sm:$0xff] }
 0x11d   :  { %3038 = vmatprep.subr.bf16.mxu0 %v6487_v16  ;;  %v373_v16 = vld [vmem:[#allocation8 + $0x588] sm:$0xff] }
 0x11e   :  { %3125 = vmatpush1.bf16.msra.mxu1 %v6232_v18  ;;  %v377_v18 = vld [vmem:[#allocation8 + $0x5a8] sm:$0xff] }
 0x11f   :  { %3126 = vmatprep.subr.bf16.mxu1 %v6241_v20  ;;  %v6305_v21 = vcombine.high %v373_v16, %v377_v18 }
 0x120   :  { %3039 = vmatpush1.bf16.msra.mxu0 %v6486_v19  ;;  %v6296_v19 = vcombine.low %v365_v7, %v369_v9  ;;  %v433_v9 = vld [vmem:[#allocation8 + $0x768] sm:$0xff] }
 0x121   :  { %3040 = vmatprep.subr.bf16.mxu0 %v6495_v24  ;;  %v6559_v24 = vcombine.high %v628_v14, %v632_v15 }
 0x122   :  { %3127 = vmatpush1.bf16.msra.mxu1 %v6240_v26  ;;  %v385_v26 = vld [vmem:[#allocation8 + $0x5e8] sm:$0xff] }
 0x123   :  { %3128 = vmatprep.subr.bf16.mxu1 %v6249_v28  ;;  %v6558_v28 = vcombine.low %v628_v14, %v632_v15  ;;  %v6313_v29 = vcombine.high %v381_v25, %v385_v26 }
 0x124   :  { %3041 = vmatpush1.bf16.msra.mxu0 %v6494_v27  ;;  %v6304_v27 = vcombine.low %v373_v16, %v377_v18  ;;  %v441_v18 = vld [vmem:[#allocation8 + $0x7a8] sm:$0xff] }
 0x125   :  { %3042 = vmatprep.subr.bf16.mxu0 %v6503_v32  ;;  %v198_v32 = vld [vmem:[#allocation8 + $0x10] sm:$0xff] }
 0x126   :  { %3129 = vmatpush1.bf16.msra.mxu1 %v6248_v34  ;;  %v202_v34 = vld [vmem:[#allocation8 + $0x30] sm:$0xff] }
 0x127   :  { %3141 = vmatprep.subr.bf16.mxu1 %v6257_v36  ;;  %v6566_v36 = vcombine.low %v636_v22, %v640_v23  ;;  %v6131_v41 = vcombine.high %v198_v32, %v202_v34 }
 0x128   :  { %3043 = vmatpush1.bf16.msra.mxu0 %v6502_v35  ;;  %v6312_v35 = vcombine.low %v381_v25, %v385_v26  ;;  %v445_v25 = vld [vmem:[#allocation8 + $0x7c8] sm:$0xff] }
 0x129   :  { %3055 = vmatprep.subr.bf16.mxu0 %v6511_v40  ;;  %3131 = vmatmul.mubr.bf16.vlgmr.msra.gmra.mrb[4].mxu1 %v7915_v0  ;;  %v6272_v0 = vcombine.low %v341_v47, %v345_v49  ;;  %v206_v40 = vld [vmem:[#allocation8 + $0x50] sm:$0xff]  ;;  %v6329_v47 = vcombine.high %v397_v38, %v401_v39  ;;  %v449_v26 = vld [vmem:[#allocation8 + $0x7e8] sm:$0xff] }
 0x12a   :  { %3142 = vmatpush1.bf16.msra.mxu1 %v6256_v42  ;;  %3173 = vmatprep.mubr.bf16.mxu1 %v7919_v3  ;;  %v624_v3 = vld [vmem:[#allocation8 + $0xd60] sm:$0xff]  ;;  %v210_v42 = vld [vmem:[#allocation8 + $0x70] sm:$0xff] }
 0x12b   :  { %3045 = vmatmul.mubr.bf16.vlgmr.msra.gmra.mrb[0].mxu0 %v7930_v61  ;;  %3143 = vmatprep.subr.bf16.mxu1 %v6265_v44  ;;  %v6526_v61 = vcombine.low %v596_v45, %v600_v46  ;;  %v6551_v17 = vcombine.high %v620_v6, %v624_v3  ;;  %v6550_v20 = vcombine.low %v620_v6, %v624_v3  ;;  %v405_v44 = vld [vmem:[#allocation8 + $0x688] sm:$0xff]  ;;  %v195_v45 = vld [vmem:[#allocation2 + $0x30] sm:$0xff]  ;;  %v214_v49 = vld [vmem:[#allocation8 + $0x90] sm:$0xff] }
 0x12c   :  { %3056 = vmatpush1.bf16.msra.mxu0 %v6510_v43  ;;  %3087 = vmatprep.mubr.bf16.mxu0 %v7749_v59  ;;  %v6320_v43 = vcombine.low %v389_v30, %v393_v31  ;;  %v6130_v46 = vcombine.low %v198_v32, %v202_v34  ;;  %v6138_v11 = vcombine.low %v206_v40, %v210_v42  ;;  %v457_v34 = vld [vmem:[#allocation8 + $0x828] sm:$0xff] }
 0x12d   :  { %3057 = vmatprep.subr.bf16.mxu0 %v6519_v48  ;;  %v409_v48 = vld [vmem:[#allocation8 + $0x6a8] sm:$0xff]  ;;  %v6377_v32 = vcombine.high %v445_v25, %v449_v26 }
 0x12e   :  { %3144 = vmatpush1.bf16.msra.mxu1 %v6264_v50  ;;  %v6139_v50 = vcombine.high %v206_v40, %v210_v42  ;;  %v6337_v53 = vcombine.high %v405_v44, %v409_v48  ;;  %v6336_v62 = vcombine.low %v405_v44, %v409_v48  ;;  %v465_v42 = vld [vmem:[#allocation8 + $0x868] sm:$0xff] }
 0x12f   :  { %3145 = vmatprep.subr.bf16.mxu1 %v6273_v52  ;;  %v6328_v52 = vcombine.low %v397_v38, %v401_v39  ;;  %v6376_v38 = vcombine.low %v445_v25, %v449_v26 }
 0x130   :  { %3058 = vmatpush1.bf16.msra.mxu0 %v6518_v51  ;;  %v218_v51 = vld [vmem:[#allocation8 + $0xb0] sm:$0xff] }
 0x131   :  { %3059 = vmatprep.subr.bf16.mxu0 %v6527_v56  ;;  %v417_v56 = vld [vmem:[#allocation8 + $0x6e8] sm:$0xff]  ;;  %v6146_v55 = vcombine.low %v214_v49, %v218_v51 }
 0x132   :  { %3146 = vmatpush1.bf16.msra.mxu1 %v6272_v0  ;;  %v6147_v0 = vcombine.high %v214_v49, %v218_v51  ;;  %v6345_v63 = vcombine.high %v413_v54, %v417_v56  ;;  %v6344_v6 = vcombine.low %v413_v54, %v417_v56  ;;  %v469_v49 = vld [vmem:[#allocation8 + $0x888] sm:$0xff]  ;;  %v278_v51 = vld [vmem:[#allocation8 + $0x290] sm:$0xff]  ;;  %v7944_v56 = vld [vmem:[#allocation2 + $0x28] sm:$0xff] }
 0x133   :  { %3147 = vmatprep.subr.bf16.mxu1 %v6281_v60  ;;  %v7509_v60 = vld [vmem:[#allocation2 + $0x8] sm:$0xff] }
 0x134   :  { %3060 = vmatpush1.bf16.msra.mxu0 %v6526_v61  ;;  %v226_v61 = vld [vmem:[#allocation8 + $0xf0] sm:$0xff] }
 0x135   :  { %3061 = vmatprep.subr.bf16.mxu0 %v6535_v1  ;;  %v421_v1 = vld [vmem:[#allocation8 + $0x708] sm:$0xff]  ;;  %v6154_v3 = vcombine.low %v222_v57, %v226_v61 }
 0x136   :  { %3148 = vmatpush1.bf16.msra.mxu1 %v6280_v2  ;;  %v230_v2 = vld [vmem:[#allocation8 + $0x110] sm:$0xff]  ;;  %v6353_v7 = vcombine.high %v421_v1, %v425_v58  ;;  %v6352_v14 = vcombine.low %v421_v1, %v425_v58 }
 0x137   :  { %3149 = vmatprep.subr.bf16.mxu1 %v6289_v5  ;;  %v234_v5 = vld [vmem:[#allocation8 + $0x130] sm:$0xff] }
 0x138   :  { %3062 = vmatpush1.bf16.msra.mxu0 %v6534_v4  ;;  %v6155_v4 = vcombine.high %v222_v57, %v226_v61  ;;  %v6162_v15 = vcombine.low %v230_v2, %v234_v5  ;;  %v477_v61 = vld [vmem:[#allocation8 + $0x8c8] sm:$0xff] }
 0x139   :  { %3063 = vmatprep.subr.bf16.mxu0 %v6543_v8  ;;  %v429_v8 = vld [vmem:[#allocation8 + $0x748] sm:$0xff] }
 0x13a   :  { %3150 = vmatpush1.bf16.msra.mxu1 %v6288_v10  ;;  %v238_v10 = vld [vmem:[#allocation8 + $0x150] sm:$0xff]  ;;  %v6361_v16 = vcombine.high %v429_v8, %v433_v9  ;;  %v6360_v22 = vcombine.low %v429_v8, %v433_v9 }
 0x13b   :  { %3151 = vmatprep.subr.bf16.mxu1 %v6297_v13  ;;  %v242_v13 = vld [vmem:[#allocation8 + $0x170] sm:$0xff] }
 0x13c   :  { %3064 = vmatpush1.bf16.msra.mxu0 %v6542_v12  ;;  %v6163_v12 = vcombine.high %v230_v2, %v234_v5  ;;  %v6170_v23 = vcombine.low %v238_v10, %v242_v13  ;;  %v489_v5 = vld [vmem:[#allocation8 + $0x928] sm:$0xff] }
 0x13d   :  { %3065 = vmatprep.subr.bf16.mxu0 %v6551_v17  ;;  %v437_v17 = vld [vmem:[#allocation8 + $0x788] sm:$0xff] }
 0x13e   :  { %3152 = vmatpush1.bf16.msra.mxu1 %v6296_v19  ;;  %v246_v19 = vld [vmem:[#allocation8 + $0x190] sm:$0xff]  ;;  %v6368_v30 = vcombine.low %v437_v17, %v441_v18 }
 0x13f   :  { %3153 = vmatprep.subr.bf16.mxu1 %v6305_v21  ;;  %v250_v21 = vld [vmem:[#allocation8 + $0x1b0] sm:$0xff] }
 0x140   :  { %3066 = vmatpush1.bf16.msra.mxu0 %v6550_v20  ;;  %v6171_v20 = vcombine.high %v238_v10, %v242_v13  ;;  %v6178_v31 = vcombine.low %v246_v19, %v250_v21  ;;  %v497_v13 = vld [vmem:[#allocation8 + $0x968] sm:$0xff] }
 0x141   :  { %3067 = vmatprep.subr.bf16.mxu0 %v6559_v24  ;;  %v6369_v24 = vcombine.high %v437_v17, %v441_v18 }
 0x142   :  { %3154 = vmatpush1.bf16.msra.mxu1 %v6304_v27  ;;  %v254_v27 = vld [vmem:[#allocation8 + $0x1d0] sm:$0xff] }
 0x143   :  { %3155 = vmatprep.subr.bf16.mxu1 %v6313_v29  ;;  %v258_v29 = vld [vmem:[#allocation8 + $0x1f0] sm:$0xff] }
 0x144   :  { %3068 = vmatpush1.bf16.msra.mxu0 %v6558_v28  ;;  %v6179_v28 = vcombine.high %v246_v19, %v250_v21  ;;  %v6186_v39 = vcombine.low %v254_v27, %v258_v29  ;;  %v505_v21 = vld [vmem:[#allocation8 + $0x9a8] sm:$0xff] }
 0x145   :  { %3069 = vmatprep.subr.bf16.mxu0 %v6567_v33  ;;  %v453_v33 = vld [vmem:[#allocation8 + $0x808] sm:$0xff] }
 0x146   :  { %3156 = vmatpush1.bf16.msra.mxu1 %v6312_v35  ;;  %v262_v35 = vld [vmem:[#allocation8 + $0x210] sm:$0xff]  ;;  %v6385_v40 = vcombine.high %v453_v33, %v457_v34 }
 0x147   :  { %3157 = vmatprep.subr.bf16.mxu1 %v6321_v37  ;;  %v266_v37 = vld [vmem:[#allocation8 + $0x230] sm:$0xff] }
 0x148   :  { %3070 = vmatpush1.bf16.msra.mxu0 %v6566_v36  ;;  %v6187_v36 = vcombine.high %v254_v27, %v258_v29  ;;  %v6195_v44 = vcombine.high %v262_v35, %v266_v37  ;;  %v513_v29 = vld [vmem:[#allocation8 + $0x9e8] sm:$0xff] }
 0x149   :  { %3270 = vmatprep.subr.bf16.mxu0 %v6131_v41  ;;  %v461_v41 = vld [vmem:[#allocation8 + $0x848] sm:$0xff] }
 0x14a   :  { %3158 = vmatpush1.bf16.msra.mxu1 %v6320_v43  ;;  %v270_v43 = vld [vmem:[#allocation8 + $0x250] sm:$0xff]  ;;  %v6393_v48 = vcombine.high %v461_v41, %v465_v42  ;;  %v6392_v54 = vcombine.low %v461_v41, %v465_v42 }
 0x14b   :  { %3088 = vmatmul.mubr.bf16.vlgmr.msra.gmra.mrb[0].mxu0 %v195_v45  ;;  %3159 = vmatprep.subr.bf16.mxu1 %v6329_v47  ;;  %v274_v45 = vld [vmem:[#allocation8 + $0x270] sm:$0xff]  ;;  %v6194_v47 = vcombine.low %v262_v35, %v266_v37  ;;  %v521_v37 = vld [vmem:[#allocation8 + $0xa28] sm:$0xff] }
 0x14c   :  { %3271 = vmatpush1.bf16.msra.mxu0 %v6130_v46  ;;  %3302 = vmatprep.mubr.bf16.mxu0 %v7509_v60  ;;  %v6384_v46 = vcombine.low %v453_v33, %v457_v34  ;;  %v6202_v57 = vcombine.low %v270_v43, %v274_v45  ;;  %v481_v60 = vld [vmem:[#allocation8 + $0x8e8] sm:$0xff] }
 0x14d   :  { %3272 = vmatprep.subr.bf16.mxu0 %v6139_v50  ;;  %v473_v50 = vld [vmem:[#allocation8 + $0x8a8] sm:$0xff]  ;;  %v6409_v2 = vcombine.high %v477_v61, %v481_v60  ;;  %v6408_v8 = vcombine.low %v477_v61, %v481_v60  ;;  %v7947_v61 = vld [vmem:[#allocation2] sm:$0xff] }
 0x14e   :  { %3160 = vmatpush1.bf16.msra.mxu1 %v6328_v52  ;;  %v6203_v52 = vcombine.high %v270_v43, %v274_v45  ;;  %v6400_v1 = vcombine.low %v469_v49, %v473_v50  ;;  %v529_v45 = vld [vmem:[#allocation8 + $0xa68] sm:$0xff] }
 0x14f   :  { %3161 = vmatprep.subr.bf16.mxu1 %v6337_v53  ;;  %v7941_v53 = vld [vmem:[#allocation2 + $0x10] sm:$0xff] }
 0x150   :  { %3273 = vmatpush1.bf16.msra.mxu0 %v6138_v11  ;;  %v282_v11 = vld [vmem:[#allocation8 + $0x2b0] sm:$0xff] }
 0x151   :  { %3274 = vmatprep.subr.bf16.mxu0 %v6147_v0  ;;  %v6401_v0 = vcombine.high %v469_v49, %v473_v50  ;;  %v6210_v58 = vcombine.low %v278_v51, %v282_v11 }
 0x152   :  { %3162 = vmatpush1.bf16.msra.mxu1 %v6336_v62  ;;  %v286_v62 = vld [vmem:[#allocation8 + $0x2d0] sm:$0xff] }
 0x153   :  { %3163 = vmatprep.subr.bf16.mxu1 %v6345_v63  ;;  %v290_v63 = vld [vmem:[#allocation8 + $0x2f0] sm:$0xff] }
 0x154   :  { %3275 = vmatpush1.bf16.msra.mxu0 %v6146_v55  ;;  %v6211_v55 = vcombine.high %v278_v51, %v282_v11  ;;  %v6218_v9 = vcombine.low %v286_v62, %v290_v63  ;;  %v537_v11 = vld [vmem:[#allocation8 + $0xaa8] sm:$0xff] }
 0x155   :  { %3276 = vmatprep.subr.bf16.mxu0 %v6155_v4  ;;  %v485_v4 = vld [vmem:[#allocation8 + $0x908] sm:$0xff] }
 0x156   :  { %3164 = vmatpush1.bf16.msra.mxu1 %v6344_v6  ;;  %v294_v6 = vld [vmem:[#allocation8 + $0x310] sm:$0xff]  ;;  %v6417_v10 = vcombine.high %v485_v4, %v489_v5  ;;  %v6416_v17 = vcombine.low %v485_v4, %v489_v5  ;;  %v7950_v5 = vld [vmem:[#allocation2 + $0x18] sm:$0xff] }
 0x157   :  { %3165 = vmatprep.subr.bf16.mxu1 %v6353_v7  ;;  %v298_v7 = vld [vmem:[#allocation8 + $0x330] sm:$0xff] }
 0x158   :  { %3277 = vmatpush1.bf16.msra.mxu0 %v6154_v3  ;;  %v6219_v3 = vcombine.high %v286_v62, %v290_v63  ;;  %v6226_v18 = vcombine.low %v294_v6, %v298_v7  ;;  %v541_v63 = vld [vmem:[#allocation8 + $0xac8] sm:$0xff]  ;;  %v354_v4 = vld [vmem:[#allocation8 + $0x4f0] sm:$0xff] }
 0x159   :  { %3278 = vmatprep.subr.bf16.mxu0 %v6163_v12  ;;  %v493_v12 = vld [vmem:[#allocation8 + $0x948] sm:$0xff] }
 0x15a   :  { %3166 = vmatpush1.bf16.msra.mxu1 %v6352_v14  ;;  %v302_v14 = vld [vmem:[#allocation8 + $0x350] sm:$0xff]  ;;  %v6425_v19 = vcombine.high %v493_v12, %v497_v13  ;;  %v6424_v25 = vcombine.low %v493_v12, %v497_v13 }
 0x15b   :  { %3167 = vmatprep.subr.bf16.mxu1 %v6361_v16  ;;  %v306_v16 = vld [vmem:[#allocation8 + $0x370] sm:$0xff] }
 0x15c   :  { %3279 = vmatpush1.bf16.msra.mxu0 %v6162_v15  ;;  %v6227_v15 = vcombine.high %v294_v6, %v298_v7  ;;  %v6234_v26 = vcombine.low %v302_v14, %v306_v16  ;;  %v358_v12 = vld [vmem:[#allocation8 + $0x510] sm:$0xff] }
 0x15d   :  { %3280 = vmatprep.subr.bf16.mxu0 %v6171_v20  ;;  %v501_v20 = vld [vmem:[#allocation8 + $0x988] sm:$0xff]  ;;  %v362_v13 = vld [vmem:[#allocation8 + $0x530] sm:$0xff] }
 0x15e   :  { %3168 = vmatpush1.bf16.msra.mxu1 %v6360_v22  ;;  %v310_v22 = vld [vmem:[#allocation8 + $0x390] sm:$0xff]  ;;  %v6433_v27 = vcombine.high %v501_v20, %v505_v21  ;;  %v6432_v33 = vcombine.low %v501_v20, %v505_v21 }
 0x15f   :  { %3169 = vmatprep.subr.bf16.mxu1 %v6369_v24  ;;  %v314_v24 = vld [vmem:[#allocation8 + $0x3b0] sm:$0xff] }
 0x160   :  { %3281 = vmatpush1.bf16.msra.mxu0 %v6170_v23  ;;  %v6235_v23 = vcombine.high %v302_v14, %v306_v16  ;;  %v6242_v34 = vcombine.low %v310_v22, %v314_v24  ;;  %v366_v20 = vld [vmem:[#allocation8 + $0x550] sm:$0xff] }
 0x161   :  { %3282 = vmatprep.subr.bf16.mxu0 %v6179_v28  ;;  %v509_v28 = vld [vmem:[#allocation8 + $0x9c8] sm:$0xff]  ;;  %v370_v21 = vld [vmem:[#allocation8 + $0x570] sm:$0xff] }
 0x162   :  { %3170 = vmatpush1.bf16.msra.mxu1 %v6368_v30  ;;  %v318_v30 = vld [vmem:[#allocation8 + $0x3d0] sm:$0xff]  ;;  %v6441_v35 = vcombine.high %v509_v28, %v513_v29  ;;  %v6440_v41 = vcombine.low %v509_v28, %v513_v29 }
 0x163   :  { %3171 = vmatprep.subr.bf16.mxu1 %v6377_v32  ;;  %v322_v32 = vld [vmem:[#allocation8 + $0x3f0] sm:$0xff] }
 0x164   :  { %3283 = vmatpush1.bf16.msra.mxu0 %v6178_v31  ;;  %v6243_v31 = vcombine.high %v310_v22, %v314_v24  ;;  %v6250_v42 = vcombine.low %v318_v30, %v322_v32  ;;  %v374_v28 = vld [vmem:[#allocation8 + $0x590] sm:$0xff] }
 0x165   :  { %3284 = vmatprep.subr.bf16.mxu0 %v6187_v36  ;;  %v517_v36 = vld [vmem:[#allocation8 + $0xa08] sm:$0xff]  ;;  %v378_v29 = vld [vmem:[#allocation8 + $0x5b0] sm:$0xff] }
 0x166   :  { %3172 = vmatpush1.bf16.msra.mxu1 %v6376_v38  ;;  %v326_v38 = vld [vmem:[#allocation8 + $0x410] sm:$0xff]  ;;  %v6449_v43 = vcombine.high %v517_v36, %v521_v37  ;;  %v6448_v49 = vcombine.low %v517_v36, %v521_v37 }
 0x167   :  { %3184 = vmatprep.subr.bf16.mxu1 %v6385_v40  ;;  %v330_v40 = vld [vmem:[#allocation8 + $0x430] sm:$0xff] }
 0x168   :  { %3285 = vmatpush1.bf16.msra.mxu0 %v6186_v39  ;;  %v6251_v39 = vcombine.high %v318_v30, %v322_v32  ;;  %v6258_v50 = vcombine.low %v326_v38, %v330_v40  ;;  %v382_v36 = vld [vmem:[#allocation8 + $0x5d0] sm:$0xff] }
 0x169   :  { %3286 = vmatprep.subr.bf16.mxu0 %v6195_v44  ;;  %3174 = vmatmul.mubr.bf16.vlgmr.msra.gmra.mrb[4].mxu1 %v7941_v53  ;;  %v525_v44 = vld [vmem:[#allocation8 + $0xa48] sm:$0xff]  ;;  %v386_v37 = vld [vmem:[#allocation8 + $0x5f0] sm:$0xff] }
 0x16a   :  { %3185 = vmatpush1.bf16.msra.mxu1 %v6384_v46  ;;  %3216 = vmatprep.mubr.bf16.mxu1 %v7944_v56  ;;  %v334_v46 = vld [vmem:[#allocation8 + $0x450] sm:$0xff]  ;;  %v6457_v51 = vcombine.high %v525_v44, %v529_v45  ;;  %v6456_v60 = vcombine.low %v525_v44, %v529_v45 }
 0x16b   :  { %3186 = vmatprep.subr.bf16.mxu1 %v6393_v48  ;;  %v338_v48 = vld [vmem:[#allocation8 + $0x470] sm:$0xff] }
 0x16c   :  { %3287 = vmatpush1.bf16.msra.mxu0 %v6194_v47  ;;  %v6259_v47 = vcombine.high %v326_v38, %v330_v40  ;;  %v6266_v62 = vcombine.low %v334_v46, %v338_v48  ;;  %v390_v44 = vld [vmem:[#allocation8 + $0x610] sm:$0xff] }
 0x16d   :  { %3288 = vmatprep.subr.bf16.mxu0 %v6203_v52  ;;  %v533_v52 = vld [vmem:[#allocation8 + $0xa88] sm:$0xff]  ;;  %v394_v45 = vld [vmem:[#allocation8 + $0x630] sm:$0xff] }
 0x16e   :  { %3187 = vmatpush1.bf16.msra.mxu1 %v6392_v54  ;;  %v342_v54 = vld [vmem:[#allocation8 + $0x490] sm:$0xff]  ;;  %v6464_v6 = vcombine.low %v533_v52, %v537_v11 }
 0x16f   :  { %3188 = vmatprep.subr.bf16.mxu1 %v6401_v0  ;;  %v346_v0 = vld [vmem:[#allocation8 + $0x4b0] sm:$0xff] }
 0x170   :  { %3289 = vmatpush1.bf16.msra.mxu0 %v6202_v57  ;;  %v6267_v57 = vcombine.high %v334_v46, %v338_v48 }
 0x171   :  { %3290 = vmatprep.subr.bf16.mxu0 %v6211_v55  ;;  %v6465_v55 = vcombine.high %v533_v52, %v537_v11  ;;  %v398_v52 = vld [vmem:[#allocation8 + $0x650] sm:$0xff] }
 0x172   :  { %3189 = vmatpush1.bf16.msra.mxu1 %v6400_v1  ;;  %v545_v1 = vld [vmem:[#allocation8 + $0xae8] sm:$0xff]  ;;  %v402_v11 = vld [vmem:[#allocation8 + $0x670] sm:$0xff] }
 0x173   :  { %3190 = vmatprep.subr.bf16.mxu1 %v6409_v2  ;;  %v6275_v2 = vcombine.high %v342_v54, %v346_v0  ;;  %v6473_v7 = vcombine.high %v541_v63, %v545_v1  ;;  %v6472_v14 = vcombine.low %v541_v63, %v545_v1  ;;  %v7953_v63 = vld [vmem:[#allocation2 + $0x20] sm:$0xff] }
 0x174   :  { %3291 = vmatpush1.bf16.msra.mxu0 %v6210_v58  ;;  %v350_v58 = vld [vmem:[#allocation8 + $0x4d0] sm:$0xff] }
 0x175   :  { %3292 = vmatprep.subr.bf16.mxu0 %v6219_v3  ;;  %v6274_v3 = vcombine.low %v342_v54, %v346_v0  ;;  %v406_v1 = vld [vmem:[#allocation8 + $0x690] sm:$0xff] }
 0x176   :  { %3191 = vmatpush1.bf16.msra.mxu1 %v6408_v8  ;;  %v6283_v8 = vcombine.high %v350_v58, %v354_v4 }
 0x177   :  { %3192 = vmatprep.subr.bf16.mxu1 %v6417_v10  ;;  %v553_v10 = vld [vmem:[#allocation8 + $0xb28] sm:$0xff] }
 0x178   :  { %3293 = vmatpush1.bf16.msra.mxu0 %v6218_v9  ;;  %v549_v9 = vld [vmem:[#allocation8 + $0xb08] sm:$0xff] }
 0x179   :  { %3294 = vmatprep.subr.bf16.mxu0 %v6227_v15  ;;  %v6282_v15 = vcombine.low %v350_v58, %v354_v4  ;;  %v6481_v16 = vcombine.high %v549_v9, %v553_v10  ;;  %v6480_v22 = vcombine.low %v549_v9, %v553_v10  ;;  %v410_v58 = vld [vmem:[#allocation8 + $0x6b0] sm:$0xff]  ;;  %v6330_v4 = vcombine.low %v398_v52, %v402_v11 }
 0x17a   :  { %3193 = vmatpush1.bf16.msra.mxu1 %v6416_v17  ;;  %v6291_v17 = vcombine.high %v358_v12, %v362_v13  ;;  %v414_v9 = vld [vmem:[#allocation8 + $0x6d0] sm:$0xff] }
 0x17b   :  { %3194 = vmatprep.subr.bf16.mxu1 %v6425_v19  ;;  %v561_v19 = vld [vmem:[#allocation8 + $0xb68] sm:$0xff]  ;;  %v418_v10 = vld [vmem:[#allocation8 + $0x6f0] sm:$0xff] }
 0x17c   :  { %3295 = vmatpush1.bf16.msra.mxu0 %v6226_v18  ;;  %v557_v18 = vld [vmem:[#allocation8 + $0xb48] sm:$0xff] }
 0x17d   :  { %3296 = vmatprep.subr.bf16.mxu0 %v6235_v23  ;;  %v6290_v23 = vcombine.low %v358_v12, %v362_v13  ;;  %v6489_v24 = vcombine.high %v557_v18, %v561_v19  ;;  %v6488_v30 = vcombine.low %v557_v18, %v561_v19  ;;  %v6338_v13 = vcombine.low %v406_v1, %v410_v58  ;;  %v422_v18 = vld [vmem:[#allocation8 + $0x710] sm:$0xff] }
 0x17e   :  { %3195 = vmatpush1.bf16.msra.mxu1 %v6424_v25  ;;  %v6299_v25 = vcombine.high %v366_v20, %v370_v21  ;;  %v426_v19 = vld [vmem:[#allocation8 + $0x730] sm:$0xff] }
 0x17f   :  { %3196 = vmatprep.subr.bf16.mxu1 %v6433_v27  ;;  %v569_v27 = vld [vmem:[#allocation8 + $0xba8] sm:$0xff] }
 0x180   :  { %3297 = vmatpush1.bf16.msra.mxu0 %v6234_v26  ;;  %v565_v26 = vld [vmem:[#allocation8 + $0xb88] sm:$0xff] }
 0x181   :  { %3298 = vmatprep.subr.bf16.mxu0 %v6243_v31  ;;  %v6298_v31 = vcombine.low %v366_v20, %v370_v21  ;;  %v6497_v32 = vcombine.high %v565_v26, %v569_v27  ;;  %v6496_v38 = vcombine.low %v565_v26, %v569_v27  ;;  %v6346_v21 = vcombine.low %v414_v9, %v418_v10  ;;  %v430_v26 = vld [vmem:[#allocation8 + $0x750] sm:$0xff] }
 0x182   :  { %3197 = vmatpush1.bf16.msra.mxu1 %v6432_v33  ;;  %v6307_v33 = vcombine.high %v374_v28, %v378_v29  ;;  %v434_v27 = vld [vmem:[#allocation8 + $0x770] sm:$0xff] }
 0x183   :  { %3198 = vmatprep.subr.bf16.mxu1 %v6441_v35  ;;  %v577_v35 = vld [vmem:[#allocation8 + $0xbe8] sm:$0xff] }
 0x184   :  { %3299 = vmatpush1.bf16.msra.mxu0 %v6242_v34  ;;  %v573_v34 = vld [vmem:[#allocation8 + $0xbc8] sm:$0xff] }
 0x185   :  { %3300 = vmatprep.subr.bf16.mxu0 %v6251_v39  ;;  %v6306_v39 = vcombine.low %v374_v28, %v378_v29  ;;  %v6505_v40 = vcombine.high %v573_v34, %v577_v35  ;;  %v6504_v46 = vcombine.low %v573_v34, %v577_v35  ;;  %v6354_v29 = vcombine.low %v422_v18, %v426_v19  ;;  %v438_v34 = vld [vmem:[#allocation8 + $0x790] sm:$0xff] }
 0x186   :  { %3199 = vmatpush1.bf16.msra.mxu1 %v6440_v41  ;;  %v6315_v41 = vcombine.high %v382_v36, %v386_v37  ;;  %v442_v35 = vld [vmem:[#allocation8 + $0x7b0] sm:$0xff] }
 0x187   :  { %3200 = vmatprep.subr.bf16.mxu1 %v6449_v43  ;;  %v585_v43 = vld [vmem:[#allocation8 + $0xc28] sm:$0xff] }
 0x188   :  { %3301 = vmatpush1.bf16.msra.mxu0 %v6250_v42  ;;  %v581_v42 = vld [vmem:[#allocation8 + $0xc08] sm:$0xff] }
 0x189   :  { %3313 = vmatprep.subr.bf16.mxu0 %v6259_v47  ;;  %v6314_v47 = vcombine.low %v382_v36, %v386_v37  ;;  %v6513_v48 = vcombine.high %v581_v42, %v585_v43  ;;  %v6512_v54 = vcombine.low %v581_v42, %v585_v43  ;;  %v6362_v37 = vcombine.low %v430_v26, %v434_v27  ;;  %v641_v42 = vld [vmem:[#allocation8 + $0xde8] sm:$0xff] }
 0x18a   :  { %3201 = vmatpush1.bf16.msra.mxu1 %v6448_v49  ;;  %v6323_v49 = vcombine.high %v390_v44, %v394_v45 }
 0x18b   :  { %3303 = vmatmul.mubr.bf16.vlgmr.msra.gmra.mrb[4].mxu0 %v7947_v61  ;;  %3202 = vmatprep.subr.bf16.mxu1 %v6457_v51  ;;  %v593_v51 = vld [vmem:[#allocation8 + $0xc68] sm:$0xff] }
 0x18c   :  { %3314 = vmatpush1.bf16.msra.mxu0 %v6258_v50  ;;  %3345 = vmatprep.mubr.bf16.mxu0 %v7950_v5  ;;  %v589_v50 = vld [vmem:[#allocation8 + $0xc48] sm:$0xff] }
 0x18d   :  { %3315 = vmatprep.subr.bf16.mxu0 %v6267_v57  ;;  %v6322_v57 = vcombine.low %v390_v44, %v394_v45  ;;  %v6521_v0 = vcombine.high %v589_v50, %v593_v51  ;;  %v446_v44 = vld [vmem:[#allocation8 + $0x7d0] sm:$0xff] }
 0x18e   :  { %3203 = vmatpush1.bf16.msra.mxu1 %v6456_v60  ;;  %v6331_v60 = vcombine.high %v398_v52, %v402_v11  ;;  %v450_v45 = vld [vmem:[#allocation8 + $0x7f0] sm:$0xff]  ;;  %v199_v52 = vld [vmem:[#allocation8 + $0x18] sm:$0xff] }
 0x18f   :  { %3204 = vmatprep.subr.bf16.mxu1 %v6465_v55  ;;  %v601_v55 = vld [vmem:[#allocation8 + $0xca8] sm:$0xff]  ;;  %v203_v11 = vld [vmem:[#allocation8 + $0x38] sm:$0xff] }
 0x190   :  { %3316 = vmatpush1.bf16.msra.mxu0 %v6266_v62  ;;  %v597_v62 = vld [vmem:[#allocation8 + $0xc88] sm:$0xff] }
 0x191   :  { %3317 = vmatprep.subr.bf16.mxu0 %v6275_v2  ;;  %v6520_v2 = vcombine.low %v589_v50, %v593_v51  ;;  %v6528_v12 = vcombine.low %v597_v62, %v601_v55  ;;  %v6379_v51 = vcombine.high %v446_v44, %v450_v45 }
 0x192   :  { %3205 = vmatpush1.bf16.msra.mxu1 %v6464_v6  ;;  %v6529_v6 = vcombine.high %v597_v62, %v601_v55  ;;  %v6133_v62 = vcombine.high %v199_v52, %v203_v11 }
 0x193   :  { %3206 = vmatprep.subr.bf16.mxu1 %v6473_v7  ;;  %v605_v7 = vld [vmem:[#allocation8 + $0xcc8] sm:$0xff] }
 0x194   :  { %3318 = vmatpush1.bf16.msra.mxu0 %v6274_v3  ;;  %v6339_v3 = vcombine.high %v406_v1, %v410_v58  ;;  %v207_v1 = vld [vmem:[#allocation8 + $0x58] sm:$0xff] }
 0x195   :  { %3319 = vmatprep.subr.bf16.mxu0 %v6283_v8  ;;  %v609_v8 = vld [vmem:[#allocation8 + $0xce8] sm:$0xff]  ;;  %v211_v58 = vld [vmem:[#allocation8 + $0x78] sm:$0xff] }
 0x196   :  { %3207 = vmatpush1.bf16.msra.mxu1 %v6472_v14  ;;  %v6537_v14 = vcombine.high %v605_v7, %v609_v8  ;;  %v6536_v20 = vcombine.low %v605_v7, %v609_v8  ;;  %v6141_v7 = vcombine.high %v207_v1, %v211_v58 }
 0x197   :  { %3208 = vmatprep.subr.bf16.mxu1 %v6481_v16  ;;  %v613_v16 = vld [vmem:[#allocation8 + $0xd08] sm:$0xff] }
 0x198   :  { %3320 = vmatpush1.bf16.msra.mxu0 %v6282_v15  ;;  %v6347_v15 = vcombine.high %v414_v9, %v418_v10  ;;  %v215_v9 = vld [vmem:[#allocation8 + $0x98] sm:$0xff] }
 0x199   :  { %3321 = vmatprep.subr.bf16.mxu0 %v6291_v17  ;;  %v617_v17 = vld [vmem:[#allocation8 + $0xd28] sm:$0xff]  ;;  %v219_v10 = vld [vmem:[#allocation8 + $0xb8] sm:$0xff] }
 0x19a   :  { %3209 = vmatpush1.bf16.msra.mxu1 %v6480_v22  ;;  %v6545_v22 = vcombine.high %v613_v16, %v617_v17  ;;  %v6544_v28 = vcombine.low %v613_v16, %v617_v17  ;;  %v6149_v17 = vcombine.high %v215_v9, %v219_v10 }
 0x19b   :  { %3210 = vmatprep.subr.bf16.mxu1 %v6489_v24  ;;  %v621_v24 = vld [vmem:[#allocation8 + $0xd48] sm:$0xff] }
 0x19c   :  { %3322 = vmatpush1.bf16.msra.mxu0 %v6290_v23  ;;  %v6355_v23 = vcombine.high %v422_v18, %v426_v19  ;;  %v223_v19 = vld [vmem:[#allocation8 + $0xd8] sm:$0xff] }
 0x19d   :  { %3323 = vmatprep.subr.bf16.mxu0 %v6299_v25  ;;  %v625_v25 = vld [vmem:[#allocation8 + $0xd68] sm:$0xff] }
 0x19e   :  { %3211 = vmatpush1.bf16.msra.mxu1 %v6488_v30  ;;  %v6553_v30 = vcombine.high %v621_v24, %v625_v25  ;;  %v6552_v36 = vcombine.low %v621_v24, %v625_v25  ;;  %v6148_v24 = vcombine.low %v215_v9, %v219_v10 }
 0x19f   :  { %3212 = vmatprep.subr.bf16.mxu1 %v6497_v32  ;;  %v629_v32 = vld [vmem:[#allocation8 + $0xd88] sm:$0xff] }
 0x1a0   :  { %3324 = vmatpush1.bf16.msra.mxu0 %v6298_v31  ;;  %v6363_v31 = vcombine.high %v430_v26, %v434_v27  ;;  %v231_v27 = vld [vmem:[#allocation8 + $0x118] sm:$0xff] }
 0x1a1   :  { %3325 = vmatprep.subr.bf16.mxu0 %v6307_v33  ;;  %v633_v33 = vld [vmem:[#allocation8 + $0xda8] sm:$0xff] }
 0x1a2   :  { %3213 = vmatpush1.bf16.msra.mxu1 %v6496_v38  ;;  %v6561_v38 = vcombine.high %v629_v32, %v633_v33 }
 0x1a3   :  { %3214 = vmatprep.subr.bf16.mxu1 %v6505_v40  ;;  %v6371_v40 = vcombine.high %v438_v34, %v442_v35 }
 0x1a4   :  { %3326 = vmatpush1.bf16.msra.mxu0 %v6306_v39 }
 0x1a5   :  { %3327 = vmatprep.subr.bf16.mxu0 %v6315_v41  ;;  %v637_v41 = vld [vmem:[#allocation8 + $0xdc8] sm:$0xff] }
 0x1a6   :  { %3215 = vmatpush1.bf16.msra.mxu1 %v6504_v46  ;;  %v6569_v50 = vcombine.high %v637_v41, %v641_v42 }
 0x1a7   :  { %3227 = vmatprep.subr.bf16.mxu1 %v6513_v48 }
 0x1a8   :  { %3328 = vmatpush1.bf16.msra.mxu0 %v6314_v47  ;;  %v6560_v47 = vcombine.low %v629_v32, %v633_v33 }
 0x1a9   :  { %3329 = vmatprep.subr.bf16.mxu0 %v6323_v49  ;;  %3217 = vmatmul.mubr.bf16.vlgmr.msra.gmra.mrb[4].mxu1 %v7953_v63  ;;  %v6370_v49 = vcombine.low %v438_v34, %v442_v35  ;;  %v239_v34 = vld [vmem:[#allocation8 + $0x158] sm:$0xff] }
 0x1aa   :  { %3228 = vmatpush1.bf16.msra.mxu1 %v6512_v54  ;;  %3259 = vmatprep.mubr.bf16.mxu1 %v7749_v59  ;;  %v454_v54 = vld [vmem:[#allocation8 + $0x810] sm:$0xff]  ;;  %v243_v35 = vld [vmem:[#allocation8 + $0x178] sm:$0xff] }
 0x1ab   :  { %3229 = vmatprep.subr.bf16.mxu1 %v6521_v0  ;;  %v6568_v0 = vcombine.low %v637_v41, %v641_v42  ;;  %v6173_v41 = vcombine.high %v239_v34, %v243_v35 }
 0x1ac   :  { %3330 = vmatpush1.bf16.msra.mxu0 %v6322_v57  ;;  %v458_v57 = vld [vmem:[#allocation8 + $0x830] sm:$0xff] }
 0x1ad   :  { %3331 = vmatprep.subr.bf16.mxu0 %v6331_v60  ;;  %v6378_v60 = vcombine.low %v446_v44, %v450_v45  ;;  %v6387_v55 = vcombine.high %v454_v54, %v458_v57  ;;  %v247_v44 = vld [vmem:[#allocation8 + $0x198] sm:$0xff] }
 0x1ae   :  { %3230 = vmatpush1.bf16.msra.mxu1 %v6520_v2  ;;  %v462_v2 = vld [vmem:[#allocation8 + $0x850] sm:$0xff]  ;;  %v251_v45 = vld [vmem:[#allocation8 + $0x1b8] sm:$0xff] }
 0x1af   :  { %3231 = vmatprep.subr.bf16.mxu1 %v6529_v6  ;;  %v6132_v6 = vcombine.low %v199_v52, %v203_v11  ;;  %v6181_v52 = vcombine.high %v247_v44, %v251_v45 }
 0x1b0   :  { %3332 = vmatpush1.bf16.msra.mxu0 %v6330_v4  ;;  %v466_v4 = vld [vmem:[#allocation8 + $0x870] sm:$0xff] }
 0x1b1   :  { %3333 = vmatprep.subr.bf16.mxu0 %v6339_v3  ;;  %v6386_v3 = vcombine.low %v454_v54, %v458_v57  ;;  %v6395_v8 = vcombine.high %v462_v2, %v466_v4  ;;  %v6394_v16 = vcombine.low %v462_v2, %v466_v4  ;;  %v255_v54 = vld [vmem:[#allocation8 + $0x1d8] sm:$0xff] }
 0x1b2   :  { %3232 = vmatpush1.bf16.msra.mxu1 %v6528_v12  ;;  %v7965_v12 = vld [vmem:[#allocation2 + $0x30] sm:$0xff]  ;;  %v259_v57 = vld [vmem:[#allocation8 + $0x1f8] sm:$0xff] }
 0x1b3   :  { %3233 = vmatprep.subr.bf16.mxu1 %v6537_v14  ;;  %v474_v14 = vld [vmem:[#allocation8 + $0x8b0] sm:$0xff]  ;;  %v263_v2 = vld [vmem:[#allocation8 + $0x218] sm:$0xff] }
 0x1b4   :  { %3334 = vmatpush1.bf16.msra.mxu0 %v6338_v13  ;;  %v470_v13 = vld [vmem:[#allocation8 + $0x890] sm:$0xff]  ;;  %v267_v4 = vld [vmem:[#allocation8 + $0x238] sm:$0xff] }
 0x1b5   :  { %3335 = vmatprep.subr.bf16.mxu0 %v6347_v15  ;;  %v6140_v15 = vcombine.low %v207_v1, %v211_v58  ;;  %v6403_v18 = vcombine.high %v470_v13, %v474_v14  ;;  %v6189_v1 = vcombine.high %v255_v54, %v259_v57  ;;  %v6197_v9 = vcombine.high %v263_v2, %v267_v4 }
 0x1b6   :  { %3234 = vmatpush1.bf16.msra.mxu1 %v6536_v20  ;;  %v227_v20 = vld [vmem:[#allocation8 + $0xf8] sm:$0xff] }
 0x1b7   :  { %3235 = vmatprep.subr.bf16.mxu1 %v6545_v22  ;;  %v482_v22 = vld [vmem:[#allocation8 + $0x8f0] sm:$0xff]  ;;  %v6157_v25 = vcombine.high %v223_v19, %v227_v20 }
 0x1b8   :  { %3336 = vmatpush1.bf16.msra.mxu0 %v6346_v21  ;;  %v478_v21 = vld [vmem:[#allocation8 + $0x8d0] sm:$0xff] }
 0x1b9   :  { %3337 = vmatprep.subr.bf16.mxu0 %v6355_v23  ;;  %v7516_v23 = vld [vmem:[#allocation2 + $0x8] sm:$0xff]  ;;  %v6411_v26 = vcombine.high %v478_v21, %v482_v22 }
 0x1ba   :  { %3236 = vmatpush1.bf16.msra.mxu1 %v6544_v28  ;;  %v235_v28 = vld [vmem:[#allocation8 + $0x138] sm:$0xff] }
 0x1bb   :  { %3237 = vmatprep.subr.bf16.mxu1 %v6553_v30  ;;  %v490_v30 = vld [vmem:[#allocation8 + $0x930] sm:$0xff]  ;;  %v6165_v32 = vcombine.high %v231_v27, %v235_v28 }
 0x1bc   :  { %3338 = vmatpush1.bf16.msra.mxu0 %v6354_v29  ;;  %v7957_v39 = vpop.f32.mrb[0].mxu1  ;;  %v486_v29 = vld [vmem:[#allocation8 + $0x910] sm:$0xff] }
 0x1bd   :  { %3339 = vmatprep.subr.bf16.mxu0 %v6363_v31  ;;  %v7959_v43 = vpop.f32.mrb[1].mxu1  ;;  %v6156_v31 = vcombine.low %v223_v19, %v227_v20  ;;  %v6419_v33 = vcombine.high %v486_v29, %v490_v30 }
 0x1be   :  { %v7961_v46 = vpop.f32.mrb[2].mxu1  ;;  %3238 = vmatpush1.bf16.msra.mxu1 %v6552_v36  ;;  %v494_v36 = vld [vmem:[#allocation8 + $0x950] sm:$0xff] }
 0x1bf   :  { %v7963_v48 = vpop.f32.mrb[3].mxu1  ;;  %3239 = vmatprep.subr.bf16.mxu1 %v6561_v38  ;;  %v6164_v38 = vcombine.low %v231_v27, %v235_v28  ;;  %v287_v28 = vld [vmem:[#allocation8 + $0x2d8] sm:$0xff] }
 0x1c0   :  { %3340 = vmatpush1.bf16.msra.mxu0 %v6362_v37  ;;  %v498_v37 = vld [vmem:[#allocation8 + $0x970] sm:$0xff] }
 0x1c1   :  { %3341 = vmatprep.subr.bf16.mxu0 %v6371_v40  ;;  %v6418_v40 = vcombine.low %v486_v29, %v490_v30  ;;  %v6427_v42 = vcombine.high %v494_v36, %v498_v37  ;;  %v291_v29 = vld [vmem:[#allocation8 + $0x2f8] sm:$0xff]  ;;  %v542_v30 = vld [vmem:[#allocation8 + $0xad0] sm:$0xff] }
 0x1c2   :  { %3240 = vmatpush1.bf16.msra.mxu1 %v6560_v47  ;;  %v502_v47 = vld [vmem:[#allocation8 + $0x990] sm:$0xff] }
 0x1c3   :  { %3241 = vmatprep.subr.bf16.mxu1 %v6569_v50  ;;  %v6172_v50 = vcombine.low %v239_v34, %v243_v35  ;;  %v295_v35 = vld [vmem:[#allocation8 + $0x318] sm:$0xff] }
 0x1c4   :  { %3342 = vmatpush1.bf16.msra.mxu0 %v6370_v49  ;;  %v506_v49 = vld [vmem:[#allocation8 + $0x9b0] sm:$0xff] }
 0x1c5   :  { %3343 = vmatprep.subr.bf16.mxu0 %v6379_v51  ;;  %v6426_v51 = vcombine.low %v494_v36, %v498_v37  ;;  %v6435_v11 = vcombine.high %v502_v47, %v506_v49  ;;  %v299_v36 = vld [vmem:[#allocation8 + $0x338] sm:$0xff]  ;;  %v550_v37 = vld [vmem:[#allocation8 + $0xb10] sm:$0xff] }
 0x1c6   :  { %3242 = vmatpush1.bf16.msra.mxu1 %v6568_v0  ;;  %v510_v0 = vld [vmem:[#allocation8 + $0x9d0] sm:$0xff] }
 0x1c7   :  { %3442 = vmatprep.subr.bf16.mxu1 %v6133_v62  ;;  %v6180_v62 = vcombine.low %v247_v44, %v251_v45  ;;  %v303_v45 = vld [vmem:[#allocation8 + $0x358] sm:$0xff] }
 0x1c8   :  { %3344 = vmatpush1.bf16.msra.mxu0 %v6378_v60  ;;  %v514_v60 = vld [vmem:[#allocation8 + $0x9f0] sm:$0xff] }
 0x1c9   :  { %3356 = vmatprep.subr.bf16.mxu0 %v6387_v55  ;;  %3260 = vmatmul.mubr.bf16.vlgmr.msra.gmra.mrb[4].mxu1 %v7965_v12  ;;  %v6434_v55 = vcombine.low %v502_v47, %v506_v49  ;;  %v6443_v58 = vcombine.high %v510_v0, %v514_v60  ;;  %v307_v47 = vld [vmem:[#allocation8 + $0x378] sm:$0xff]  ;;  %v558_v49 = vld [vmem:[#allocation8 + $0xb50] sm:$0xff] }
 0x1ca   :  { %3443 = vmatpush1.bf16.msra.mxu1 %v6132_v6  ;;  %3474 = vmatprep.mubr.bf16.mxu1 %v7516_v23  ;;  %v518_v6 = vld [vmem:[#allocation8 + $0xa10] sm:$0xff] }
 0x1cb   :  { %3346 = vmatmul.mubr.bf16.vlgmr.msra.gmra.mrb[4].mxu0 %v7941_v53  ;;  %3444 = vmatprep.subr.bf16.mxu1 %v6141_v7  ;;  %v6402_v53 = vcombine.low %v470_v13, %v474_v14  ;;  %v6188_v7 = vcombine.low %v255_v54, %v259_v57  ;;  %v271_v13 = vld [vmem:[#allocation8 + $0x258] sm:$0xff]  ;;  %v534_v23 = vld [vmem:[#allocation8 + $0xa90] sm:$0xff] }
 0x1cc   :  { %3357 = vmatpush1.bf16.msra.mxu0 %v6386_v3  ;;  %3388 = vmatprep.mubr.bf16.mxu0 %v7944_v56  ;;  %v6410_v56 = vcombine.low %v478_v21, %v482_v22  ;;  %v522_v3 = vld [vmem:[#allocation8 + $0xa30] sm:$0xff]  ;;  %v275_v14 = vld [vmem:[#allocation8 + $0x278] sm:$0xff] }
 0x1cd   :  { %3358 = vmatprep.subr.bf16.mxu0 %v6395_v8  ;;  %v6442_v8 = vcombine.low %v510_v0, %v514_v60  ;;  %v6451_v10 = vcombine.high %v518_v6, %v522_v3  ;;  %v6205_v19 = vcombine.high %v271_v13, %v275_v14  ;;  %v279_v21 = vld [vmem:[#allocation8 + $0x298] sm:$0xff]  ;;  %v566_v60 = vld [vmem:[#allocation8 + $0xb90] sm:$0xff] }
 0x1ce   :  { %3445 = vmatpush1.bf16.msra.mxu1 %v6140_v15  ;;  %v526_v15 = vld [vmem:[#allocation8 + $0xa50] sm:$0xff]  ;;  %v283_v22 = vld [vmem:[#allocation8 + $0x2b8] sm:$0xff] }
 0x1cf   :  { %3446 = vmatprep.subr.bf16.mxu1 %v6149_v17  ;;  %v6196_v17 = vcombine.low %v263_v2, %v267_v4  ;;  %v311_v57 = vld [vmem:[#allocation8 + $0x398] sm:$0xff] }
 0x1d0   :  { %3359 = vmatpush1.bf16.msra.mxu0 %v6394_v16  ;;  %v530_v16 = vld [vmem:[#allocation8 + $0xa70] sm:$0xff]  ;;  %v315_v0 = vld [vmem:[#allocation8 + $0x3b8] sm:$0xff] }
 0x1d1   :  { %3360 = vmatprep.subr.bf16.mxu0 %v6403_v18  ;;  %v6450_v18 = vcombine.low %v518_v6, %v522_v3  ;;  %v6459_v20 = vcombine.high %v526_v15, %v530_v16  ;;  %v319_v4 = vld [vmem:[#allocation8 + $0x3d8] sm:$0xff]  ;;  %v574_v3 = vld [vmem:[#allocation8 + $0xbd0] sm:$0xff] }
 0x1d2   :  { %3447 = vmatpush1.bf16.msra.mxu1 %v6148_v24  ;;  %v538_v24 = vld [vmem:[#allocation8 + $0xab0] sm:$0xff]  ;;  %v323_v6 = vld [vmem:[#allocation8 + $0x3f8] sm:$0xff] }
 0x1d3   :  { %3448 = vmatprep.subr.bf16.mxu1 %v6157_v25  ;;  %v6458_v25 = vcombine.low %v526_v15, %v530_v16  ;;  %v6467_v27 = vcombine.high %v534_v23, %v538_v24  ;;  %v331_v15 = vld [vmem:[#allocation8 + $0x438] sm:$0xff]  ;;  %v582_v16 = vld [vmem:[#allocation8 + $0xc10] sm:$0xff] }
 0x1d4   :  { %3361 = vmatpush1.bf16.msra.mxu0 %v6402_v53  ;;  %v6204_v53 = vcombine.low %v271_v13, %v275_v14  ;;  %v327_v14 = vld [vmem:[#allocation8 + $0x418] sm:$0xff] }
 0x1d5   :  { %3362 = vmatprep.subr.bf16.mxu0 %v6411_v26  ;;  %v6213_v26 = vcombine.high %v279_v21, %v283_v22 }
 0x1d6   :  { %3449 = vmatpush1.bf16.msra.mxu1 %v6156_v31  ;;  %v546_v31 = vld [vmem:[#allocation8 + $0xaf0] sm:$0xff] }
 0x1d7   :  { %3450 = vmatprep.subr.bf16.mxu1 %v6165_v32  ;;  %v6466_v32 = vcombine.low %v534_v23, %v538_v24  ;;  %v6475_v34 = vcombine.high %v542_v30, %v546_v31  ;;  %v339_v23 = vld [vmem:[#allocation8 + $0x478] sm:$0xff]  ;;  %v590_v24 = vld [vmem:[#allocation8 + $0xc50] sm:$0xff] }
 0x1d8   :  { %3363 = vmatpush1.bf16.msra.mxu0 %v6410_v56  ;;  %v6212_v56 = vcombine.low %v279_v21, %v283_v22  ;;  %v335_v22 = vld [vmem:[#allocation8 + $0x458] sm:$0xff] }
 0x1d9   :  { %3364 = vmatprep.subr.bf16.mxu0 %v6419_v33  ;;  %v6221_v33 = vcombine.high %v287_v28, %v291_v29 }
 0x1da   :  { %3451 = vmatpush1.bf16.msra.mxu1 %v6164_v38  ;;  %v554_v38 = vld [vmem:[#allocation8 + $0xb30] sm:$0xff] }
 0x1db   :  { %3452 = vmatprep.subr.bf16.mxu1 %v6173_v41  ;;  %v6474_v41 = vcombine.low %v542_v30, %v546_v31  ;;  %v6483_v44 = vcombine.high %v550_v37, %v554_v38  ;;  %v347_v30 = vld [vmem:[#allocation8 + $0x4b8] sm:$0xff]  ;;  %v598_v31 = vld [vmem:[#allocation8 + $0xc90] sm:$0xff] }
 0x1dc   :  { %3365 = vmatpush1.bf16.msra.mxu0 %v6418_v40  ;;  %v6220_v40 = vcombine.low %v287_v28, %v291_v29  ;;  %v343_v29 = vld [vmem:[#allocation8 + $0x498] sm:$0xff] }
 0x1dd   :  { %3366 = vmatprep.subr.bf16.mxu0 %v6427_v42  ;;  %v6229_v42 = vcombine.high %v295_v35, %v299_v36 }
 0x1de   :  { %3453 = vmatpush1.bf16.msra.mxu1 %v6172_v50  ;;  %v562_v50 = vld [vmem:[#allocation8 + $0xb70] sm:$0xff] }
 0x1df   :  { %3454 = vmatprep.subr.bf16.mxu1 %v6181_v52  ;;  %v6482_v52 = vcombine.low %v550_v37, %v554_v38  ;;  %v6491_v54 = vcombine.high %v558_v49, %v562_v50  ;;  %v351_v37 = vld [vmem:[#allocation8 + $0x4d8] sm:$0xff] }
 0x1e0   :  { %3367 = vmatpush1.bf16.msra.mxu0 %v6426_v51  ;;  %v6228_v51 = vcombine.low %v295_v35, %v299_v36  ;;  %v646_v35 = vlaneseq  ;;  %v355_v38 = vld [vmem:[#allocation8 + $0x4f8] sm:$0xff] }
 0x1e1   :  { %3368 = vmatprep.subr.bf16.mxu0 %v6435_v11  ;;  %v6237_v11 = vcombine.high %v303_v45, %v307_v47 }
 0x1e2   :  { %3455 = vmatpush1.bf16.msra.mxu1 %v6180_v62  ;;  %v570_v62 = vld [vmem:[#allocation8 + $0xbb0] sm:$0xff] }
 0x1e3   :  { %3456 = vmatprep.subr.bf16.mxu1 %v6189_v1  ;;  %v6490_v1 = vcombine.low %v558_v49, %v562_v50  ;;  %v6499_v2 = vcombine.high %v566_v60, %v570_v62  ;;  %v363_v49 = vld [vmem:[#allocation8 + $0x538] sm:$0xff]  ;;  %v614_v50 = vld [vmem:[#allocation8 + $0xd10] sm:$0xff] }
 0x1e4   :  { %3369 = vmatpush1.bf16.msra.mxu0 %v6434_v55  ;;  %v6236_v55 = vcombine.low %v303_v45, %v307_v47  ;;  %v359_v47 = vld [vmem:[#allocation8 + $0x518] sm:$0xff] }
 0x1e5   :  { %3370 = vmatprep.subr.bf16.mxu0 %v6443_v58  ;;  %v6245_v58 = vcombine.high %v311_v57, %v315_v0 }
 0x1e6   :  { %3457 = vmatpush1.bf16.msra.mxu1 %v6188_v7  ;;  %v578_v7 = vld [vmem:[#allocation8 + $0xbf0] sm:$0xff] }
 0x1e7   :  { %3458 = vmatprep.subr.bf16.mxu1 %v6197_v9  ;;  %v6498_v9 = vcombine.low %v566_v60, %v570_v62  ;;  %v6507_v13 = vcombine.high %v574_v3, %v578_v7  ;;  %v371_v60 = vld [vmem:[#allocation8 + $0x578] sm:$0xff]  ;;  %v7979_v62 = vld [vmem:[#allocation9] sm:$0xff] }
 0x1e8   :  { %3371 = vmatpush1.bf16.msra.mxu0 %v6442_v8  ;;  %v6244_v8 = vcombine.low %v311_v57, %v315_v0  ;;  %v367_v0 = vld [vmem:[#allocation8 + $0x558] sm:$0xff] }
 0x1e9   :  { %3372 = vmatprep.subr.bf16.mxu0 %v6451_v10  ;;  %v6253_v10 = vcombine.high %v319_v4, %v323_v6 }
 0x1ea   :  { %3459 = vmatpush1.bf16.msra.mxu1 %v6196_v17  ;;  %v586_v17 = vld [vmem:[#allocation8 + $0xc30] sm:$0xff] }
 0x1eb   :  { %3460 = vmatprep.subr.bf16.mxu1 %v6205_v19  ;;  %v6506_v19 = vcombine.low %v574_v3, %v578_v7  ;;  %v6515_v21 = vcombine.high %v582_v16, %v586_v17 }
 0x1ec   :  { %3373 = vmatpush1.bf16.msra.mxu0 %v6450_v18  ;;  %v6252_v18 = vcombine.low %v319_v4, %v323_v6  ;;  %v6301_v6 = vcombine.high %v367_v0, %v371_v60 }
 0x1ed   :  { %3374 = vmatprep.subr.bf16.mxu0 %v6459_v20  ;;  %v6261_v20 = vcombine.high %v327_v14, %v331_v15 }
 0x1ee   :  { %3461 = vmatpush1.bf16.msra.mxu1 %v6204_v53  ;;  %v594_v53 = vld [vmem:[#allocation8 + $0xc70] sm:$0xff] }
 0x1ef   :  { %3462 = vmatprep.subr.bf16.mxu1 %v6213_v26  ;;  %v6514_v26 = vcombine.low %v582_v16, %v586_v17  ;;  %v6523_v28 = vcombine.high %v590_v24, %v594_v53 }
 0x1f0   :  { %3375 = vmatpush1.bf16.msra.mxu0 %v6458_v25  ;;  %v6260_v25 = vcombine.low %v327_v14, %v331_v15  ;;  %v634_v14 = vld [vmem:[#allocation8 + $0xdb0] sm:$0xff]  ;;  %v6300_v15 = vcombine.low %v367_v0, %v371_v60  ;;  %v7026_v60 = vld [vmem:[#allocation11 + $0x24] ss:$16 sps:$4 sm:$0xff]  }
 0x1f1   :  { %3376 = vmatprep.subr.bf16.mxu0 %v6467_v27  ;;  %v6269_v27 = vcombine.high %v335_v22, %v339_v23 }
 0x1f2   :  { %3463 = vmatpush1.bf16.msra.mxu1 %v6212_v56  ;;  %v602_v56 = vld [vmem:[#allocation8 + $0xcb0] sm:$0xff] }
 0x1f3   :  { %3464 = vmatprep.subr.bf16.mxu1 %v6221_v33  ;;  %v6522_v33 = vcombine.low %v590_v24, %v594_v53  ;;  %v6531_v36 = vcombine.high %v598_v31, %v602_v56  ;;  %v638_v24 = vld [vmem:[#allocation8 + $0xdd0] sm:$0xff] }
 0x1f4   :  { %3377 = vmatpush1.bf16.msra.mxu0 %v6466_v32  ;;  %v6268_v32 = vcombine.low %v335_v22, %v339_v23  ;;  %v642_v53 = vld [vmem:[#allocation8 + $0xdf0] sm:$0xff] }
 0x1f5   :  { %3378 = vmatprep.subr.bf16.mxu0 %v6475_v34  ;;  %v6277_v34 = vcombine.high %v343_v29, %v347_v30 }
 0x1f6   :  { %3465 = vmatpush1.bf16.msra.mxu1 %v6220_v40  ;;  %v606_v40 = vld [vmem:[#allocation8 + $0xcd0] sm:$0xff] }
 0x1f7   :  { %3466 = vmatprep.subr.bf16.mxu1 %v6229_v42  ;;  %v6285_v42 = vcombine.high %v351_v37, %v355_v38 }
 0x1f8   :  { %3379 = vmatpush1.bf16.msra.mxu0 %v6474_v41  ;;  %v610_v41 = vld [vmem:[#allocation8 + $0xcf0] sm:$0xff] }
 0x1f9   :  { %3380 = vmatprep.subr.bf16.mxu0 %v6483_v44  ;;  %v7974_v44 = vshrl.u32 %v646_v35, 7  ;;  %v6539_v45 = vcombine.high %v606_v40, %v610_v41  ;;  %v391_v35 = vld [vmem:[#allocation8 + $0x618] sm:$0xff] }
 0x1fa   :  { %3467 = vmatpush1.bf16.msra.mxu1 %v6228_v51  ;;  %v618_v51 = vld [vmem:[#allocation8 + $0xd30] sm:$0xff] }
 0x1fb   :  { %3468 = vmatprep.subr.bf16.mxu1 %v6237_v11  ;;  %v6538_v11 = vcombine.low %v606_v40, %v610_v41  ;;  %v6547_v57 = vcombine.high %v614_v50, %v618_v51  ;;  %v6546_v4 = vcombine.low %v614_v50, %v618_v51  ;;  %v399_v50 = vld [vmem:[#allocation8 + $0x658] sm:$0xff] }
 0x1fc   :  { %3381 = vmatpush1.bf16.msra.mxu0 %v6482_v52  ;;  %v6284_v52 = vcombine.low %v351_v37, %v355_v38  ;;  %v403_v51 = vld [vmem:[#allocation8 + $0x678] sm:$0xff] }
 0x1fd   :  { %3382 = vmatprep.subr.bf16.mxu0 %v6491_v54  ;;  %v7977_v54 = vsub.s32 0, %v7974_v44  ;;  %v6333_v0 = vcombine.high %v399_v50, %v403_v51 }
 0x1fe   :  { %3469 = vmatpush1.bf16.msra.mxu1 %v6236_v55  ;;  %v7982_v55 = vsub.s32 1, %v7974_v44 }
 0x1ff   :  { %3470 = vmatprep.subr.bf16.mxu1 %v6245_v58  ;;  %v626_v58 = vld [vmem:[#allocation8 + $0xd70] sm:$0xff]  ;;  %v649_v3 = vrot.slane %v7979_v62, %v7977_v54 }
 0x200   :  { %3383 = vmatpush1.bf16.msra.mxu0 %v6490_v1  ;;  %v622_v1 = vld [vmem:[#allocation8 + $0xd50] sm:$0xff] }
 0x201   :  { %3384 = vmatprep.subr.bf16.mxu0 %v6499_v2  ;;  %v6292_v2 = vcombine.low %v359_v47, %v363_v49  ;;  %v6555_v7 = vcombine.high %v622_v1, %v626_v58  ;;  %v6554_v16 = vcombine.low %v622_v1, %v626_v58  ;;  %v407_v1 = vld [vmem:[#allocation8 + $0x698] sm:$0xff] }
 0x202   :  { %3471 = vmatpush1.bf16.msra.mxu1 %v6244_v8  ;;  %v375_v8 = vld [vmem:[#allocation8 + $0x598] sm:$0xff] }
 0x203   :  { %3472 = vmatprep.subr.bf16.mxu1 %v6253_v10  ;;  %v653_v10 = vrot.slane %v7979_v62, %v7982_v55  ;;  %v411_v58 = vld [vmem:[#allocation8 + $0x6b8] sm:$0xff] }
 0x204   :  { %3385 = vmatpush1.bf16.msra.mxu0 %v6498_v9  ;;  %v379_v9 = vld [vmem:[#allocation8 + $0x5b8] sm:$0xff] }
 0x205   :  { %3386 = vmatprep.subr.bf16.mxu0 %v6507_v13  ;;  %v630_v13 = vld [vmem:[#allocation8 + $0xd90] sm:$0xff]  ;;  %v6309_v17 = vcombine.high %v375_v8, %v379_v9  ;;  %v2963_v22 = vadd.f32 %v7959_v43, %v653_v10 }
 0x206   :  { %3473 = vmatpush1.bf16.msra.mxu1 %v6252_v18  ;;  %v2961_v18 = vadd.f32 %v7957_v39, %v649_v3 }
 0x207   :  { %3485 = vmatprep.subr.bf16.mxu1 %v6261_v20  ;;  %v383_v20 = vld [vmem:[#allocation8 + $0x5d8] sm:$0xff] }
 0x208   :  { %3387 = vmatpush1.bf16.msra.mxu0 %v6506_v19  ;;  %v6563_v19 = vcombine.high %v630_v13, %v634_v14 }
 0x209   :  { %3399 = vmatprep.subr.bf16.mxu0 %v6515_v21  ;;  %3475 = vmatmul.mubr.bf16.vlgmr.msra.gmra.mrb[8].mxu1 %v7947_v61  ;;  %v6276_v61 = vcombine.low %v343_v29, %v347_v30  ;;  %v387_v21 = vld [vmem:[#allocation8 + $0x5f8] sm:$0xff]  ;;  %v6308_v29 = vcombine.low %v375_v8, %v379_v9  ;;  %v2967_v30 = vadd.f32 %v7963_v48, %v653_v10 }
 0x20a   :  { %3486 = vmatpush1.bf16.msra.mxu1 %v6260_v25  ;;  %3517 = vmatprep.mubr.bf16.mxu1 %v7950_v5  ;;  %v6293_v5 = vcombine.high %v359_v47, %v363_v49  ;;  %v2965_v25 = vadd.f32 %v7961_v46, %v649_v3  ;;  %v6316_v40 = vcombine.low %v383_v20, %v387_v21  ;;  %v7029_v3 = vld [vmem:[#allocation11 + $0x44] ss:$16 sps:$4 sm:$0xff]   ;;  %v7027_v10 = vld [vmem:[#allocation11 + $0x40] ss:$16 sps:$4 sm:$0xff]  }
 0x20b   :  { %3389 = vmatmul.mubr.bf16.vlgmr.msra.gmra.mrb[4].mxu0 %v7953_v63  ;;  %3487 = vmatprep.subr.bf16.mxu1 %v6269_v27  ;;  %v6530_v63 = vcombine.low %v598_v31, %v602_v56  ;;  %v6317_v56 = vcombine.high %v383_v20, %v387_v21  ;;  %v6570_v48 = vcombine.low %v638_v24, %v642_v53  ;;  %v419_v8 = vld [vmem:[#allocation8 + $0x6f8] sm:$0xff] }
 0x20c   :  { %3400 = vmatpush1.bf16.msra.mxu0 %v6514_v26  ;;  %3431 = vmatprep.mubr.bf16.mxu0 %v7749_v59  ;;  %v6340_v9 = vcombine.low %v407_v1, %v411_v58  ;;  %v431_v20 = vld [vmem:[#allocation8 + $0x758] sm:$0xff] }
 0x20d   :  { %3401 = vmatprep.subr.bf16.mxu0 %v6523_v28  ;;  %v6562_v28 = vcombine.low %v630_v13, %v634_v14  ;;  %v423_v14 = vld [vmem:[#allocation8 + $0x718] sm:$0xff] }
 0x20e   :  { %3488 = vmatpush1.bf16.msra.mxu1 %v6268_v32  ;;  %v435_v21 = vld [vmem:[#allocation8 + $0x778] sm:$0xff] }
 0x20f   :  { %3489 = vmatprep.subr.bf16.mxu1 %v6277_v34  ;;  %v6571_v34 = vcombine.high %v638_v24, %v642_v53  ;;  %v6365_v24 = vcombine.high %v431_v20, %v435_v21  ;;  %v7038_v53 = vld [vmem:[#allocation11 + $0xa4] ss:$16 sps:$4 sm:$0xff]  }
 0x210   :  { %3402 = vmatpush1.bf16.msra.mxu0 %v6522_v33 }
 0x211   :  { %3403 = vmatprep.subr.bf16.mxu0 %v6531_v36  ;;  %v395_v36 = vld [vmem:[#allocation8 + $0x638] sm:$0xff] }
 0x212   :  { %3490 = vmatpush1.bf16.msra.mxu1 %v6276_v61  ;;  %v6325_v61 = vcombine.high %v391_v35, %v395_v36 }
 0x213   :  { %3491 = vmatprep.subr.bf16.mxu1 %v6285_v42 }
 0x214   :  { %3404 = vmatpush1.bf16.msra.mxu0 %v6530_v63 }
 0x215   :  { %3405 = vmatprep.subr.bf16.mxu0 %v6539_v45  ;;  %v7023_v45 = vld [vmem:[#allocation11 + $0x4] ss:$16 sps:$4 sm:$0xff]  }
 0x216   :  { %3492 = vmatpush1.bf16.msra.mxu1 %v6284_v52 }
 0x217   :  { %3493 = vmatprep.subr.bf16.mxu1 %v6293_v5  ;;  %v7021_v5 = vld [vmem:[#allocation11] ss:$16 sps:$4 sm:$0xff]  }
 0x218   :  { %3406 = vmatpush1.bf16.msra.mxu0 %v6538_v11  ;;  %v6324_v11 = vcombine.low %v391_v35, %v395_v36  ;;  %v459_v35 = vld [vmem:[#allocation8 + $0x838] sm:$0xff] }
 0x219   :  { %3407 = vmatprep.subr.bf16.mxu0 %v6547_v57 }
 0x21a   :  { %3494 = vmatpush1.bf16.msra.mxu1 %v6292_v2  ;;  %v6332_v2 = vcombine.low %v399_v50, %v403_v51  ;;  %v7518_v51 = vld [vmem:[#allocation2 + $0x28] sm:$0xff] }
 0x21b   :  { %3495 = vmatprep.subr.bf16.mxu1 %v6301_v6  ;;  %v6341_v6 = vcombine.high %v407_v1, %v411_v58  ;;  %v483_v1 = vld [vmem:[#allocation8 + $0x8f8] sm:$0xff] }
 0x21c   :  { %3408 = vmatpush1.bf16.msra.mxu0 %v6546_v4  ;;  %v7024_v4 = vld [vmem:[#allocation11 + $0x20] ss:$16 sps:$4 sm:$0xff]  }
 0x21d   :  { %3409 = vmatprep.subr.bf16.mxu0 %v6555_v7  ;;  %v415_v7 = vld [vmem:[#allocation8 + $0x6d8] sm:$0xff] }
 0x21e   :  { %v3089_v23 = vpop.f32.mrb[0].mxu0  ;;  %3496 = vmatpush1.bf16.msra.mxu1 %v6300_v15  ;;  %v6349_v13 = vcombine.high %v415_v7, %v419_v8  ;;  %v427_v15 = vld [vmem:[#allocation8 + $0x738] sm:$0xff] }
 0x21f   :  { %v6897_v26 = vadd.f32 %v3089_v23, %v2961_v18  ;;  %v3091_v27 = vpop.f32.mrb[1].mxu0  ;;  %3497 = vmatprep.subr.bf16.mxu1 %v6309_v17  ;;  %v7030_v17 = vld [vmem:[#allocation11 + $0x60] ss:$16 sps:$4 sm:$0xff]   ;;  %v6357_v18 = vcombine.high %v423_v14, %v427_v15 }
 0x220   :  { %v6899_v31 = vadd.f32 %v3091_v27, %v2963_v22  ;;  %v3093_v39 = vpop.f32.mrb[2].mxu0  ;;  %3410 = vmatpush1.bf16.msra.mxu0 %v6554_v16  ;;  %v6348_v16 = vcombine.low %v415_v7, %v419_v8  ;;  %v6356_v22 = vcombine.low %v423_v14, %v427_v15  ;;  %v7033_v23 = vld [vmem:[#allocation11 + $0x80] ss:$16 sps:$4 sm:$0xff]   ;;  %v6364_v27 = vcombine.low %v431_v20, %v435_v21 }
 0x221   :  { %v3614_v32 = vmul.f32 0.2, %v6897_v26  ;;  %v6901_v33 = vadd.f32 %v3093_v39, %v2965_v25  ;;  %v3095_v43 = vpop.f32.mrb[3].mxu0  ;;  %3411 = vmatprep.subr.bf16.mxu0 %v6563_v19  ;;  %v7035_v19 = vld [vmem:[#allocation11 + $0x84] ss:$16 sps:$4 sm:$0xff]  }
 0x222   :  { %v3615_v46 = vmul.f32 0.2, %v6899_v31  ;;  %v6903_v37 = vadd.f32 %v3095_v43, %v2967_v30  ;;  %3498 = vmatpush1.bf16.msra.mxu1 %v6308_v29  ;;  %v439_v25 = vld [vmem:[#allocation8 + $0x798] sm:$0xff] }
 0x223   :  { %v3622_v38 = vmul.f32 0.2, %v6901_v33  ;;  %3499 = vmatprep.subr.bf16.mxu1 %v6317_v56  ;;  %v3630_v63 = vmax.f32 %v6897_v26, %v3614_v32  ;;  %v443_v26 = vld [vmem:[#allocation8 + $0x7b8] sm:$0xff] }
 0x224   :  { %v3623_v41 = vmul.f32 0.2, %v6903_v37  ;;  %3412 = vmatpush1.bf16.msra.mxu0 %v6562_v28  ;;  %v3631_v47 = vmax.f32 %v6899_v31, %v3615_v46  ;;  %v7036_v28 = vld [vmem:[#allocation11 + $0xa0] ss:$16 sps:$4 sm:$0xff]   ;;  %v6373_v29 = vcombine.high %v439_v25, %v443_v26  ;;  %v7041_v30 = vld [vmem:[#allocation11 + $0xc4] ss:$16 sps:$4 sm:$0xff]   ;;  %v6372_v56 = vcombine.low %v439_v25, %v443_v26 }
 0x225   :  { %v3638_v42 = vmax.f32 %v6901_v33, %v3622_v38  ;;  %3413 = vmatprep.subr.bf16.mxu0 %v6571_v34  ;;  %v447_v31 = vld [vmem:[#allocation8 + $0x7d8] sm:$0xff] }
 0x226   :  { %v3639_v49 = vmax.f32 %v6903_v37, %v3623_v41  ;;  %3500 = vmatpush1.bf16.msra.mxu1 %v6316_v40  ;;  %v451_v39 = vld [vmem:[#allocation8 + $0x7f8] sm:$0xff] }
 0x227   :  { %v7992_v52 = vpack.c.bf16 %v3638_v42, %v3630_v63  ;;  %3501 = vmatprep.subr.bf16.mxu1 %v6325_v61  ;;  %v7039_v32 = vld [vmem:[#allocation11 + $0xc0] ss:$16 sps:$4 sm:$0xff]   ;;  %v6381_v33 = vcombine.high %v447_v31, %v451_v39  ;;  %v7044_v43 = vld [vmem:[#allocation11 + $0xe4] ss:$16 sps:$4 sm:$0xff]   ;;  %v6380_v36 = vcombine.low %v447_v31, %v451_v39 }
 0x228   :  { %3414 = vmatpush1.bf16.msra.mxu0 %v6570_v48  ;;  %v7994_v57 = vpack.c.bf16 %v3639_v49, %v3631_v47  ;;  %v455_v34 = vld [vmem:[#allocation8 + $0x818] sm:$0xff]  ;;  %v7517_v49 = vld [vmem:[#allocation2 + $0x10] sm:$0xff] }
 0x229   :  { %5212 = vmatprep.subr.bf16.mxu0 %v7023_v45  ;;  %v7042_v46 = vld [vmem:[#allocation11 + $0xe0] ss:$16 sps:$4 sm:$0xff]   ;;  %v6389_v37 = vcombine.high %v455_v34, %v459_v35  ;;  %v7047_v38 = vld [vmem:[#allocation11 + $0x104] ss:$16 sps:$4 sm:$0xff]   ;;  %v6388_v48 = vcombine.low %v455_v34, %v459_v35 }
 0x22a   :  { %3502 = vmatpush1.bf16.msra.mxu1 %v6324_v11  ;;  %v463_v40 = vld [vmem:[#allocation8 + $0x858] sm:$0xff] }
 0x22b   :  { %3432 = vmatmul.mubr.bf16.vlgmr.msra.gmra.mrb[4].mxu0 %v7965_v12  ;;  %3503 = vmatprep.subr.bf16.mxu1 %v6333_v0  ;;  %v7032_v12 = vld [vmem:[#allocation11 + $0x64] ss:$16 sps:$4 sm:$0xff]   ;;  %v7045_v61 = vld [vmem:[#allocation11 + $0x100] ss:$16 sps:$4 sm:$0xff]  }
 0x22c   :  { %5213 = vmatpush1.bf16.msra.mxu0 %v7021_v5  ;;  %5244 = vmatprep.mubr.bf16.mxu0 %v7994_v57  ;;  %v467_v41 = vld [vmem:[#allocation8 + $0x878] sm:$0xff] }
 0x22d   :  { %5214 = vmatprep.subr.bf16.mxu0 %v7026_v60  ;;  %v6397_v63 = vcombine.high %v463_v40, %v467_v41  ;;  %v7050_v42 = vld [vmem:[#allocation11 + $0x124] ss:$16 sps:$4 sm:$0xff]   ;;  %v6396_v50 = vcombine.low %v463_v40, %v467_v41  ;;  %v7048_v11 = vld [vmem:[#allocation11 + $0x120] ss:$16 sps:$4 sm:$0xff]  }
 0x22e   :  { %3504 = vmatpush1.bf16.msra.mxu1 %v6332_v2  ;;  %v471_v45 = vld [vmem:[#allocation8 + $0x898] sm:$0xff] }
 0x22f   :  { %3505 = vmatprep.subr.bf16.mxu1 %v6341_v6  ;;  %v475_v47 = vld [vmem:[#allocation8 + $0x8b8] sm:$0xff] }
 0x230   :  { %5215 = vmatpush1.bf16.msra.mxu0 %v7024_v4  ;;  %v6405_v5 = vcombine.high %v471_v45, %v475_v47  ;;  %v7053_v0 = vld [vmem:[#allocation11 + $0x144] ss:$16 sps:$4 sm:$0xff]   ;;  %v6404_v58 = vcombine.low %v471_v45, %v475_v47  ;;  %v7051_v2 = vld [vmem:[#allocation11 + $0x140] ss:$16 sps:$4 sm:$0xff]  }
 0x231   :  { %5216 = vmatprep.subr.bf16.mxu0 %v7029_v3  ;;  %v479_v60 = vld [vmem:[#allocation8 + $0x8d8] sm:$0xff] }
 0x232   :  { %3506 = vmatpush1.bf16.msra.mxu1 %v6340_v9  ;;  %v6413_v4 = vcombine.high %v479_v60, %v483_v1  ;;  %v7056_v6 = vld [vmem:[#allocation11 + $0x164] ss:$16 sps:$4 sm:$0xff]   ;;  %v6412_v8 = vcombine.low %v479_v60, %v483_v1  ;;  %v7054_v9 = vld [vmem:[#allocation11 + $0x160] ss:$16 sps:$4 sm:$0xff]  }
 0x233   :  { %3507 = vmatprep.subr.bf16.mxu1 %v6349_v13  ;;  %v487_v3 = vld [vmem:[#allocation8 + $0x918] sm:$0xff] }
 0x234   :  { %5217 = vmatpush1.bf16.msra.mxu0 %v7027_v10  ;;  %v491_v7 = vld [vmem:[#allocation8 + $0x938] sm:$0xff] }
 0x235   :  { %5218 = vmatprep.subr.bf16.mxu0 %v7032_v12  ;;  %v6421_v10 = vcombine.high %v487_v3, %v491_v7  ;;  %v7059_v13 = vld [vmem:[#allocation11 + $0x184] ss:$16 sps:$4 sm:$0xff]   ;;  %v6420_v15 = vcombine.low %v487_v3, %v491_v7  ;;  %v7078_v60 = vld [vmem:[#allocation11 + $0x260] ss:$16 sps:$4 sm:$0xff]  }
 0x236   :  { %3508 = vmatpush1.bf16.msra.mxu1 %v6348_v16  ;;  %v495_v12 = vld [vmem:[#allocation8 + $0x958] sm:$0xff] }
 0x237   :  { %3509 = vmatprep.subr.bf16.mxu1 %v6357_v18  ;;  %v499_v14 = vld [vmem:[#allocation8 + $0x978] sm:$0xff] }
 0x238   :  { %5219 = vmatpush1.bf16.msra.mxu0 %v7030_v17  ;;  %v7057_v16 = vld [vmem:[#allocation11 + $0x180] ss:$16 sps:$4 sm:$0xff]   ;;  %v6429_v17 = vcombine.high %v495_v12, %v499_v14  ;;  %v7062_v18 = vld [vmem:[#allocation11 + $0x1a4] ss:$16 sps:$4 sm:$0xff]   ;;  %v6428_v21 = vcombine.low %v495_v12, %v499_v14 }
 0x239   :  { %5220 = vmatprep.subr.bf16.mxu0 %v7035_v19  ;;  %v503_v19 = vld [vmem:[#allocation8 + $0x998] sm:$0xff] }
 0x23a   :  { %3510 = vmatpush1.bf16.msra.mxu1 %v6356_v22  ;;  %v507_v20 = vld [vmem:[#allocation8 + $0x9b8] sm:$0xff] }
 0x23b   :  { %3511 = vmatprep.subr.bf16.mxu1 %v6365_v24  ;;  %v7060_v22 = vld [vmem:[#allocation11 + $0x1a0] ss:$16 sps:$4 sm:$0xff]   ;;  %v7065_v24 = vld [vmem:[#allocation11 + $0x1c4] ss:$16 sps:$4 sm:$0xff]   ;;  %v6436_v26 = vcombine.low %v503_v19, %v507_v20 }
 0x23c   :  { %5221 = vmatpush1.bf16.msra.mxu0 %v7033_v23  ;;  %v6437_v23 = vcombine.high %v503_v19, %v507_v20  ;;  %v515_v25 = vld [vmem:[#allocation8 + $0x9f8] sm:$0xff] }
 0x23d   :  { %5222 = vmatprep.subr.bf16.mxu0 %v7038_v53  ;;  %v511_v53 = vld [vmem:[#allocation8 + $0x9d8] sm:$0xff] }
 0x23e   :  { %3512 = vmatpush1.bf16.msra.mxu1 %v6364_v27  ;;  %v7063_v27 = vld [vmem:[#allocation11 + $0x1c0] ss:$16 sps:$4 sm:$0xff]   ;;  %v6444_v39 = vcombine.low %v511_v53, %v515_v25 }
 0x23f   :  { %3513 = vmatprep.subr.bf16.mxu1 %v6373_v29  ;;  %v7068_v29 = vld [vmem:[#allocation11 + $0x1e4] ss:$16 sps:$4 sm:$0xff]   ;;  %v7081_v3 = vld [vmem:[#allocation11 + $0x280] ss:$16 sps:$4 sm:$0xff]  }
 0x240   :  { %5223 = vmatpush1.bf16.msra.mxu0 %v7036_v28  ;;  %v6445_v28 = vcombine.high %v511_v53, %v515_v25  ;;  %v523_v31 = vld [vmem:[#allocation8 + $0xa38] sm:$0xff] }
 0x241   :  { %5224 = vmatprep.subr.bf16.mxu0 %v7041_v30  ;;  %v519_v30 = vld [vmem:[#allocation8 + $0xa18] sm:$0xff] }
 0x242   :  { %3514 = vmatpush1.bf16.msra.mxu1 %v6372_v56  ;;  %v7066_v56 = vld [vmem:[#allocation11 + $0x1e0] ss:$16 sps:$4 sm:$0xff]   ;;  %v6452_v35 = vcombine.low %v519_v30, %v523_v31 }
 0x243   :  { %3515 = vmatprep.subr.bf16.mxu1 %v6381_v33  ;;  %v7071_v33 = vld [vmem:[#allocation11 + $0x204] ss:$16 sps:$4 sm:$0xff]   ;;  %v7084_v12 = vld [vmem:[#allocation11 + $0x2a0] ss:$16 sps:$4 sm:$0xff]  }
 0x244   :  { %5225 = vmatpush1.bf16.msra.mxu0 %v7039_v32  ;;  %v6453_v32 = vcombine.high %v519_v30, %v523_v31  ;;  %v531_v34 = vld [vmem:[#allocation8 + $0xa78] sm:$0xff] }
 0x245   :  { %5226 = vmatprep.subr.bf16.mxu0 %v7044_v43  ;;  %v527_v43 = vld [vmem:[#allocation8 + $0xa58] sm:$0xff] }
 0x246   :  { %3516 = vmatpush1.bf16.msra.mxu1 %v6380_v36  ;;  %v7069_v36 = vld [vmem:[#allocation11 + $0x200] ss:$16 sps:$4 sm:$0xff]   ;;  %v6460_v41 = vcombine.low %v527_v43, %v531_v34 }
 0x247   :  { %3528 = vmatprep.subr.bf16.mxu1 %v6389_v37  ;;  %v7074_v37 = vld [vmem:[#allocation11 + $0x224] ss:$16 sps:$4 sm:$0xff]   ;;  %v7087_v19 = vld [vmem:[#allocation11 + $0x2c0] ss:$16 sps:$4 sm:$0xff]  }
 0x248   :  { %5227 = vmatpush1.bf16.msra.mxu0 %v7042_v46  ;;  %v6461_v46 = vcombine.high %v527_v43, %v531_v34  ;;  %v539_v40 = vld [vmem:[#allocation8 + $0xab8] sm:$0xff] }
 0x249   :  { %5228 = vmatprep.subr.bf16.mxu0 %v7047_v38  ;;  %3518 = vmatmul.mubr.bf16.vlgmr.msra.gmra.mrb[8].mxu1 %v7517_v49  ;;  %v535_v38 = vld [vmem:[#allocation8 + $0xa98] sm:$0xff] }
 0x24a   :  { %3529 = vmatpush1.bf16.msra.mxu1 %v6388_v48  ;;  %3560 = vmatprep.mubr.bf16.mxu1 %v7518_v51  ;;  %v7072_v48 = vld [vmem:[#allocation11 + $0x220] ss:$16 sps:$4 sm:$0xff]   ;;  %v6468_v47 = vcombine.low %v535_v38, %v539_v40  ;;  %v7080_v51 = vld [vmem:[#allocation11 + $0x264] ss:$16 sps:$4 sm:$0xff]  }
 0x24b   :  { %3530 = vmatprep.subr.bf16.mxu1 %v6397_v63  ;;  %v7077_v63 = vld [vmem:[#allocation11 + $0x244] ss:$16 sps:$4 sm:$0xff]   ;;  %v7075_v49 = vld [vmem:[#allocation11 + $0x240] ss:$16 sps:$4 sm:$0xff]  }
 0x24c   :  { %5229 = vmatpush1.bf16.msra.mxu0 %v7045_v61  ;;  %v6469_v61 = vcombine.high %v535_v38, %v539_v40  ;;  %v547_v45 = vld [vmem:[#allocation8 + $0xaf8] sm:$0xff] }
 0x24d   :  { %5230 = vmatprep.subr.bf16.mxu0 %v7050_v42  ;;  %v543_v42 = vld [vmem:[#allocation8 + $0xad8] sm:$0xff] }
 0x24e   :  { %3531 = vmatpush1.bf16.msra.mxu1 %v6396_v50  ;;  %v6477_v50 = vcombine.high %v543_v42, %v547_v45  ;;  %v7090_v53 = vld [vmem:[#allocation11 + $0x2e0] ss:$16 sps:$4 sm:$0xff]  }
 0x24f   :  { %3532 = vmatprep.subr.bf16.mxu1 %v6405_v5  ;;  %v555_v5 = vld [vmem:[#allocation8 + $0xb38] sm:$0xff] }
 0x250   :  { %5231 = vmatpush1.bf16.msra.mxu0 %v7048_v11  ;;  %v551_v11 = vld [vmem:[#allocation8 + $0xb18] sm:$0xff] }
 0x251   :  { %5232 = vmatprep.subr.bf16.mxu0 %v7053_v0  ;;  %v6476_v0 = vcombine.low %v543_v42, %v547_v45  ;;  %v6485_v1 = vcombine.high %v551_v11, %v555_v5  ;;  %v7093_v30 = vld [vmem:[#allocation11 + $0x300] ss:$16 sps:$4 sm:$0xff]  }
 0x252   :  { %3533 = vmatpush1.bf16.msra.mxu1 %v6404_v58  ;;  %v7083_v58 = vld [vmem:[#allocation11 + $0x284] ss:$16 sps:$4 sm:$0xff]   ;;  %v7096_v34 = vld [vmem:[#allocation11 + $0x320] ss:$16 sps:$4 sm:$0xff]  }
 0x253   :  { %3534 = vmatprep.subr.bf16.mxu1 %v6413_v4  ;;  %v563_v4 = vld [vmem:[#allocation8 + $0xb78] sm:$0xff] }
 0x254   :  { %5233 = vmatpush1.bf16.msra.mxu0 %v7051_v2  ;;  %v559_v2 = vld [vmem:[#allocation8 + $0xb58] sm:$0xff] }
 0x255   :  { %5234 = vmatprep.subr.bf16.mxu0 %v7056_v6  ;;  %v6484_v6 = vcombine.low %v551_v11, %v555_v5  ;;  %v6493_v7 = vcombine.high %v559_v2, %v563_v4  ;;  %v7099_v40 = vld [vmem:[#allocation11 + $0x340] ss:$16 sps:$4 sm:$0xff]   ;;  %v660_v5 = vsub.s32 3, %v7974_v44 }
 0x256   :  { %3535 = vmatpush1.bf16.msra.mxu1 %v6412_v8  ;;  %v7086_v8 = vld [vmem:[#allocation11 + $0x2a4] ss:$16 sps:$4 sm:$0xff]   ;;  %v7102_v42 = vld [vmem:[#allocation11 + $0x360] ss:$16 sps:$4 sm:$0xff]  }
 0x257   :  { %3536 = vmatprep.subr.bf16.mxu1 %v6421_v10  ;;  %v571_v10 = vld [vmem:[#allocation8 + $0xbb8] sm:$0xff] }
 0x258   :  { %5235 = vmatpush1.bf16.msra.mxu0 %v7054_v9  ;;  %v567_v9 = vld [vmem:[#allocation8 + $0xb98] sm:$0xff] }
 0x259   :  { %5236 = vmatprep.subr.bf16.mxu0 %v7059_v13  ;;  %v6492_v13 = vcombine.low %v559_v2, %v563_v4  ;;  %v6501_v14 = vcombine.high %v567_v9, %v571_v10  ;;  %v635_v2 = vld [vmem:[#allocation8 + $0xdb8] sm:$0xff] }
 0x25a   :  { %3537 = vmatpush1.bf16.msra.mxu1 %v6420_v15  ;;  %v7089_v15 = vld [vmem:[#allocation11 + $0x2c4] ss:$16 sps:$4 sm:$0xff]  }
 0x25b   :  { %3538 = vmatprep.subr.bf16.mxu1 %v6429_v17  ;;  %v579_v17 = vld [vmem:[#allocation8 + $0xbf8] sm:$0xff] }
 0x25c   :  { %5237 = vmatpush1.bf16.msra.mxu0 %v7057_v16  ;;  %v575_v16 = vld [vmem:[#allocation8 + $0xbd8] sm:$0xff] }
 0x25d   :  { %5238 = vmatprep.subr.bf16.mxu0 %v7062_v18  ;;  %v6500_v18 = vcombine.low %v567_v9, %v571_v10  ;;  %v6509_v20 = vcombine.high %v575_v16, %v579_v17  ;;  %v7113_v10 = vld [vmem:[#allocation11 + $0x3c4] ss:$16 sps:$4 sm:$0xff]  }
 0x25e   :  { %3539 = vmatpush1.bf16.msra.mxu1 %v6428_v21  ;;  %v7092_v21 = vld [vmem:[#allocation11 + $0x2e4] ss:$16 sps:$4 sm:$0xff]  }
 0x25f   :  { %3540 = vmatprep.subr.bf16.mxu1 %v6437_v23  ;;  %v587_v23 = vld [vmem:[#allocation8 + $0xc38] sm:$0xff] }
 0x260   :  { %5239 = vmatpush1.bf16.msra.mxu0 %v7060_v22  ;;  %v583_v22 = vld [vmem:[#allocation8 + $0xc18] sm:$0xff] }
 0x261   :  { %5240 = vmatprep.subr.bf16.mxu0 %v7065_v24  ;;  %v6508_v24 = vcombine.low %v575_v16, %v579_v17  ;;  %v6517_v25 = vcombine.high %v583_v22, %v587_v23 }
 0x262   :  { %3541 = vmatpush1.bf16.msra.mxu1 %v6436_v26  ;;  %v7095_v26 = vld [vmem:[#allocation11 + $0x304] ss:$16 sps:$4 sm:$0xff]  }
 0x263   :  { %3542 = vmatprep.subr.bf16.mxu1 %v6445_v28  ;;  %v595_v28 = vld [vmem:[#allocation8 + $0xc78] sm:$0xff] }
 0x264   :  { %5241 = vmatpush1.bf16.msra.mxu0 %v7063_v27  ;;  %v591_v27 = vld [vmem:[#allocation8 + $0xc58] sm:$0xff] }
 0x265   :  { %5242 = vmatprep.subr.bf16.mxu0 %v7068_v29  ;;  %v6516_v29 = vcombine.low %v583_v22, %v587_v23  ;;  %v6525_v31 = vcombine.high %v591_v27, %v595_v28  ;;  %v6524_v43 = vcombine.low %v591_v27, %v595_v28 }
 0x266   :  { %3543 = vmatpush1.bf16.msra.mxu1 %v6444_v39  ;;  %v7098_v39 = vld [vmem:[#allocation11 + $0x324] ss:$16 sps:$4 sm:$0xff]  }
 0x267   :  { %3544 = vmatprep.subr.bf16.mxu1 %v6453_v32  ;;  %v603_v32 = vld [vmem:[#allocation8 + $0xcb8] sm:$0xff] }
 0x268   :  { %5243 = vmatpush1.bf16.msra.mxu0 %v7066_v56  ;;  %v599_v56 = vld [vmem:[#allocation8 + $0xc98] sm:$0xff] }
 0x269   :  { %5255 = vmatprep.subr.bf16.mxu0 %v7071_v33  ;;  %v7519_v33 = vld [vmem:[#allocation2 + $0x20] sm:$0xff]  ;;  %v6532_v38 = vcombine.low %v599_v56, %v603_v32 }
 0x26a   :  { %3545 = vmatpush1.bf16.msra.mxu1 %v6452_v35  ;;  %v6533_v35 = vcombine.high %v599_v56, %v603_v32  ;;  %v7143_v32 = vld [vmem:[#allocation11 + $0x404] ss:$16 sps:$4 sm:$0xff]  }
 0x26b   :  { %5245 = vmatmul.mubr.bf16.vlgmr.msra.gmra.mrb[8].mxu0 %v7992_v52  ;;  %3546 = vmatprep.subr.bf16.mxu1 %v6461_v46  ;;  %v607_v46 = vld [vmem:[#allocation8 + $0xcd8] sm:$0xff] }
 0x26c   :  { %5256 = vmatpush1.bf16.msra.mxu0 %v7069_v36  ;;  %v7101_v36 = vld [vmem:[#allocation11 + $0x344] ss:$16 sps:$4 sm:$0xff]  }
 0x26d   :  { %5257 = vmatprep.subr.bf16.mxu0 %v7074_v37  ;;  %v611_v37 = vld [vmem:[#allocation8 + $0xcf8] sm:$0xff] }
 0x26e   :  { %3547 = vmatpush1.bf16.msra.mxu1 %v6460_v41  ;;  %v6541_v41 = vcombine.high %v607_v46, %v611_v37 }
 0x26f   :  { %3548 = vmatprep.subr.bf16.mxu1 %v6469_v61  ;;  %v615_v61 = vld [vmem:[#allocation8 + $0xd18] sm:$0xff] }
 0x270   :  { %5258 = vmatpush1.bf16.msra.mxu0 %v7072_v48  ;;  %v7104_v48 = vld [vmem:[#allocation11 + $0x364] ss:$16 sps:$4 sm:$0xff]  }
 0x271   :  { %5259 = vmatprep.subr.bf16.mxu0 %v7077_v63  ;;  %v619_v63 = vld [vmem:[#allocation8 + $0xd38] sm:$0xff] }
 0x272   :  { %3549 = vmatpush1.bf16.msra.mxu1 %v6468_v47  ;;  %v6549_v45 = vcombine.high %v615_v61, %v619_v63  ;;  %v7107_v47 = vld [vmem:[#allocation11 + $0x384] ss:$16 sps:$4 sm:$0xff]   ;;  %v6548_v11 = vcombine.low %v615_v61, %v619_v63  ;;  %v7123_v61 = vld [vmem:[#allocation11 + $0x48] ss:$16 sps:$4 sm:$0xff]   ;;  %v7128_v63 = vld [vmem:[#allocation11 + $0x6c] ss:$16 sps:$4 sm:$0xff]  }
 0x273   :  { %3550 = vmatprep.subr.bf16.mxu1 %v6477_v50  ;;  %v627_v50 = vld [vmem:[#allocation8 + $0xd78] sm:$0xff] }
 0x274   :  { %5260 = vmatpush1.bf16.msra.mxu0 %v7075_v49  ;;  %v623_v49 = vld [vmem:[#allocation8 + $0xd58] sm:$0xff] }
 0x275   :  { %5261 = vmatprep.subr.bf16.mxu0 %v7080_v51  ;;  %v8001_v51 = vsub.s32 2, %v7974_v44 }
 0x276   :  { %3551 = vmatpush1.bf16.msra.mxu1 %v6476_v0  ;;  %v7105_v0 = vld [vmem:[#allocation11 + $0x380] ss:$16 sps:$4 sm:$0xff]  }
 0x277   :  { %3552 = vmatprep.subr.bf16.mxu1 %v6485_v1  ;;  %v7110_v1 = vld [vmem:[#allocation11 + $0x3a4] ss:$16 sps:$4 sm:$0xff]   ;;  %v657_v4 = vrot.slane %v7979_v62, %v8001_v51 }
 0x278   :  { %5262 = vmatpush1.bf16.msra.mxu0 %v7078_v60  ;;  %v6557_v60 = vcombine.high %v623_v49, %v627_v50 }
 0x279   :  { %5263 = vmatprep.subr.bf16.mxu0 %v7083_v58  ;;  %v631_v58 = vld [vmem:[#allocation8 + $0xd98] sm:$0xff] }
 0x27a   :  { %3553 = vmatpush1.bf16.msra.mxu1 %v6484_v6  ;;  %v661_v6 = vrot.slane %v7979_v62, %v660_v5 }
 0x27b   :  { %3554 = vmatprep.subr.bf16.mxu1 %v6493_v7  ;;  %v7108_v7 = vld [vmem:[#allocation11 + $0x3a0] ss:$16 sps:$4 sm:$0xff]  }
 0x27c   :  { %5264 = vmatpush1.bf16.msra.mxu0 %v7081_v3  ;;  %v6556_v3 = vcombine.low %v623_v49, %v627_v50  ;;  %v7167_v49 = vld [vmem:[#allocation11 + $0x484] ss:$16 sps:$4 sm:$0xff]   ;;  %v7129_v50 = vld [vmem:[#allocation11 + $0x88] ss:$16 sps:$4 sm:$0xff]  }
 0x27d   :  { %5265 = vmatprep.subr.bf16.mxu0 %v7086_v8  ;;  %v6565_v8 = vcombine.high %v631_v58, %v635_v2 }
 0x27e   :  { %3555 = vmatpush1.bf16.msra.mxu1 %v6492_v13  ;;  %v639_v13 = vld [vmem:[#allocation8 + $0xdd8] sm:$0xff] }
 0x27f   :  { %3556 = vmatprep.subr.bf16.mxu1 %v6501_v14 }
 0x280   :  { %5266 = vmatpush1.bf16.msra.mxu0 %v7084_v12  ;;  %v643_v12 = vld [vmem:[#allocation8 + $0xdf8] sm:$0xff] }
 0x281   :  { %5267 = vmatprep.subr.bf16.mxu0 %v7089_v15  ;;  %v6573_v22 = vcombine.high %v639_v13, %v643_v12  ;;  %v6572_v27 = vcombine.low %v639_v13, %v643_v12  ;;  %v7183_v13 = vld [vmem:[#allocation11 + $0x4e0] ss:$16 sps:$4 sm:$0xff]   ;;  %v7191_v12 = vld [vmem:[#allocation11 + $0x504] ss:$16 sps:$4 sm:$0xff]  }
 0x282   :  { %3557 = vmatpush1.bf16.msra.mxu1 %v6500_v18  ;;  %v6564_v18 = vcombine.low %v631_v58, %v635_v2  ;;  %v7137_v58 = vld [vmem:[#allocation11 + $0xcc] ss:$16 sps:$4 sm:$0xff]   ;;  %v7171_v2 = vld [vmem:[#allocation11 + $0x4a0] ss:$16 sps:$4 sm:$0xff]  }
 0x283   :  { %3558 = vmatprep.subr.bf16.mxu1 %v6509_v20 }
 0x284   :  { %5268 = vmatpush1.bf16.msra.mxu0 %v7087_v19 }
 0x285   :  { %5269 = vmatprep.subr.bf16.mxu0 %v7092_v21  ;;  %v7111_v21 = vld [vmem:[#allocation11 + $0x3c0] ss:$16 sps:$4 sm:$0xff]  }
 0x286   :  { %3559 = vmatpush1.bf16.msra.mxu1 %v6508_v24 }
 0x287   :  { %3571 = vmatprep.subr.bf16.mxu1 %v6517_v25 }
 0x288   :  { %5270 = vmatpush1.bf16.msra.mxu0 %v7090_v53  ;;  %v7116_v53 = vld [vmem:[#allocation11 + $0x3e4] ss:$16 sps:$4 sm:$0xff]  }
 0x289   :  { %5271 = vmatprep.subr.bf16.mxu0 %v7095_v26  ;;  %3561 = vmatmul.mubr.bf16.vlgmr.msra.gmra.mrb[8].mxu1 %v7519_v33 }
 0x28a   :  { %3572 = vmatpush1.bf16.msra.mxu1 %v6516_v29  ;;  %3603 = vmatprep.mubr.bf16.mxu1 %v7749_v59  ;;  %v6540_v59 = vcombine.low %v607_v46, %v611_v37  ;;  %v7520_v46 = vld [vmem:[#allocation2 + $0x30] sm:$0xff]  ;;  %v7149_v37 = vld [vmem:[#allocation11 + $0x424] ss:$16 sps:$4 sm:$0xff]  }
 0x28b   :  { %3573 = vmatprep.subr.bf16.mxu1 %v6525_v31  ;;  %v7119_v31 = vld [vmem:[#allocation11 + $0xc] ss:$16 sps:$4 sm:$0xff]  }
 0x28c   :  { %5272 = vmatpush1.bf16.msra.mxu0 %v7093_v30  ;;  %v7114_v30 = vld [vmem:[#allocation11 + $0x3e0] ss:$16 sps:$4 sm:$0xff]  }
 0x28d   :  { %5273 = vmatprep.subr.bf16.mxu0 %v7098_v39 }
 0x28e   :  { %3574 = vmatpush1.bf16.msra.mxu1 %v6524_v43 }
 0x28f   :  { %3575 = vmatprep.subr.bf16.mxu1 %v6533_v35  ;;  %v7122_v35 = vld [vmem:[#allocation11 + $0x2c] ss:$16 sps:$4 sm:$0xff]  }
 0x290   :  { %5274 = vmatpush1.bf16.msra.mxu0 %v7096_v34  ;;  %v7117_v34 = vld [vmem:[#allocation11 + $0x8] ss:$16 sps:$4 sm:$0xff]  }
 0x291   :  { %5275 = vmatprep.subr.bf16.mxu0 %v7101_v36  ;;  %v7141_v36 = vld [vmem:[#allocation11 + $0x400] ss:$16 sps:$4 sm:$0xff]  }
 0x292   :  { %3576 = vmatpush1.bf16.msra.mxu1 %v6532_v38  ;;  %v7120_v38 = vld [vmem:[#allocation11 + $0x28] ss:$16 sps:$4 sm:$0xff]  }
 0x293   :  { %3577 = vmatprep.subr.bf16.mxu1 %v6541_v41  ;;  %v7147_v41 = vld [vmem:[#allocation11 + $0x420] ss:$16 sps:$4 sm:$0xff]  }
 0x294   :  { %5276 = vmatpush1.bf16.msra.mxu0 %v7099_v40  ;;  %v7125_v40 = vld [vmem:[#allocation11 + $0x4c] ss:$16 sps:$4 sm:$0xff]  }
 0x295   :  { %5277 = vmatprep.subr.bf16.mxu0 %v7104_v48  ;;  %v7155_v48 = vld [vmem:[#allocation11 + $0x444] ss:$16 sps:$4 sm:$0xff]  }
 0x296   :  { %3578 = vmatpush1.bf16.msra.mxu1 %v6540_v59  ;;  %v7153_v59 = vld [vmem:[#allocation11 + $0x440] ss:$16 sps:$4 sm:$0xff]  }
 0x297   :  { %3579 = vmatprep.subr.bf16.mxu1 %v6549_v45  ;;  %v7126_v45 = vld [vmem:[#allocation11 + $0x68] ss:$16 sps:$4 sm:$0xff]  }
 0x298   :  { %5278 = vmatpush1.bf16.msra.mxu0 %v7102_v42  ;;  %v7161_v42 = vld [vmem:[#allocation11 + $0x464] ss:$16 sps:$4 sm:$0xff]  }
 0x299   :  { %5279 = vmatprep.subr.bf16.mxu0 %v7107_v47  ;;  %v7131_v47 = vld [vmem:[#allocation11 + $0x8c] ss:$16 sps:$4 sm:$0xff]  }
 0x29a   :  { %3580 = vmatpush1.bf16.msra.mxu1 %v6548_v11  ;;  %v7134_v11 = vld [vmem:[#allocation11 + $0xac] ss:$16 sps:$4 sm:$0xff]  }
 0x29b   :  { %3581 = vmatprep.subr.bf16.mxu1 %v6557_v60  ;;  %v7173_v60 = vld [vmem:[#allocation11 + $0x4a4] ss:$16 sps:$4 sm:$0xff]  }
 0x29c   :  { %5280 = vmatpush1.bf16.msra.mxu0 %v7105_v0  ;;  %v3261_v9 = vpop.f32.mrb[4].mxu1  ;;  %v7165_v0 = vld [vmem:[#allocation11 + $0x480] ss:$16 sps:$4 sm:$0xff]  }
 0x29d   :  { %5281 = vmatprep.subr.bf16.mxu0 %v7110_v1  ;;  %v6904_v14 = vadd.f32 %v3261_v9, %v657_v4  ;;  %v3263_v15 = vpop.f32.mrb[5].mxu1  ;;  %v7132_v1 = vld [vmem:[#allocation11 + $0xa8] ss:$16 sps:$4 sm:$0xff]  }
 0x29e   :  { %v6905_v16 = vadd.f32 %v3263_v15, %v661_v6  ;;  %v3265_v17 = vpop.f32.mrb[6].mxu1  ;;  %3582 = vmatpush1.bf16.msra.mxu1 %v6556_v3  ;;  %v7140_v3 = vld [vmem:[#allocation11 + $0xec] ss:$16 sps:$4 sm:$0xff]   ;;  %v7138_v9 = vld [vmem:[#allocation11 + $0xe8] ss:$16 sps:$4 sm:$0xff]  }
 0x29f   :  { %v3616_v19 = vmul.f32 0.2, %v6904_v14  ;;  %v6906_v20 = vadd.f32 %v3265_v17, %v657_v4  ;;  %v3267_v62 = vpop.f32.mrb[7].mxu1  ;;  %3583 = vmatprep.subr.bf16.mxu1 %v6565_v8  ;;  %v7179_v4 = vld [vmem:[#allocation11 + $0x4c4] ss:$16 sps:$4 sm:$0xff]  }
 0x2a0   :  { %5282 = vmatpush1.bf16.msra.mxu0 %v7108_v7  ;;  %v3617_v23 = vmul.f32 0.2, %v6905_v16  ;;  %v6907_v24 = vadd.f32 %v3267_v62, %v661_v6  ;;  %v7135_v6 = vld [vmem:[#allocation11 + $0xc8] ss:$16 sps:$4 sm:$0xff]   ;;  %v7177_v7 = vld [vmem:[#allocation11 + $0x4c0] ss:$16 sps:$4 sm:$0xff]  }
 0x2a1   :  { %5283 = vmatprep.subr.bf16.mxu0 %v7113_v10  ;;  %v3624_v25 = vmul.f32 0.2, %v6906_v20  ;;  %v3632_v28 = vmax.f32 %v6904_v14, %v3616_v19  ;;  %v7185_v8 = vld [vmem:[#allocation11 + $0x4e4] ss:$16 sps:$4 sm:$0xff]   ;;  %v7146_v10 = vld [vmem:[#allocation11 + $0x10c] ss:$16 sps:$4 sm:$0xff]  }
 0x2a2   :  { %v3625_v26 = vmul.f32 0.2, %v6907_v24  ;;  %3584 = vmatpush1.bf16.msra.mxu1 %v6564_v18  ;;  %v3633_v39 = vmax.f32 %v6905_v16, %v3617_v23  ;;  %v7144_v14 = vld [vmem:[#allocation11 + $0x108] ss:$16 sps:$4 sm:$0xff]   ;;  %v7152_v15 = vld [vmem:[#allocation11 + $0x12c] ss:$16 sps:$4 sm:$0xff]  }
 0x2a3   :  { %v3640_v29 = vmax.f32 %v6906_v20, %v3624_v25  ;;  %3585 = vmatprep.subr.bf16.mxu1 %v6573_v22  ;;  %v7189_v16 = vld [vmem:[#allocation11 + $0x500] ss:$16 sps:$4 sm:$0xff]   ;;  %v7197_v17 = vld [vmem:[#allocation11 + $0x524] ss:$16 sps:$4 sm:$0xff]   ;;  %v7150_v18 = vld [vmem:[#allocation11 + $0x128] ss:$16 sps:$4 sm:$0xff]  }
 0x2a4   :  { %5284 = vmatpush1.bf16.msra.mxu0 %v7111_v21  ;;  %v3641_v56 = vmax.f32 %v6907_v24, %v3625_v26  ;;  %v7158_v19 = vld [vmem:[#allocation11 + $0x14c] ss:$16 sps:$4 sm:$0xff]   ;;  %v7195_v20 = vld [vmem:[#allocation11 + $0x520] ss:$16 sps:$4 sm:$0xff]   ;;  %v7203_v62 = vld [vmem:[#allocation11 + $0x544] ss:$16 sps:$4 sm:$0xff]  }
 0x2a5   :  { %5285 = vmatprep.subr.bf16.mxu0 %v7116_v53  ;;  %v8009_v33 = vpack.c.bf16 %v3640_v29, %v3632_v28  ;;  %v7156_v21 = vld [vmem:[#allocation11 + $0x148] ss:$16 sps:$4 sm:$0xff]   ;;  %v7164_v22 = vld [vmem:[#allocation11 + $0x16c] ss:$16 sps:$4 sm:$0xff]   ;;  %v7201_v23 = vld [vmem:[#allocation11 + $0x540] ss:$16 sps:$4 sm:$0xff]  }
 0x2a6   :  { %3586 = vmatpush1.bf16.msra.mxu1 %v6572_v27  ;;  %v8011_v43 = vpack.c.bf16 %v3641_v56, %v3633_v39  ;;  %v7209_v24 = vld [vmem:[#allocation11 + $0x564] ss:$16 sps:$4 sm:$0xff]   ;;  %v7162_v53 = vld [vmem:[#allocation11 + $0x168] ss:$16 sps:$4 sm:$0xff]   ;;  %v7170_v25 = vld [vmem:[#allocation11 + $0x18c] ss:$16 sps:$4 sm:$0xff]  }
 0x2a7   :  { %5384 = vmatprep.subr.bf16.mxu1 %v7119_v31  ;;  %v7207_v26 = vld [vmem:[#allocation11 + $0x560] ss:$16 sps:$4 sm:$0xff]   ;;  %v7215_v27 = vld [vmem:[#allocation11 + $0x584] ss:$16 sps:$4 sm:$0xff]   ;;  %v7168_v28 = vld [vmem:[#allocation11 + $0x188] ss:$16 sps:$4 sm:$0xff]  }
 0x2a8   :  { %5286 = vmatpush1.bf16.msra.mxu0 %v7114_v30  ;;  %5287 = vmatprep.mubr.bf16.mxu0 %v8011_v43  ;;  %v7176_v29 = vld [vmem:[#allocation11 + $0x1ac] ss:$16 sps:$4 sm:$0xff]   ;;  %v7213_v30 = vld [vmem:[#allocation11 + $0x580] ss:$16 sps:$4 sm:$0xff]   ;;  %v7221_v31 = vld [vmem:[#allocation11 + $0x5a4] ss:$16 sps:$4 sm:$0xff]  }
 0x2a9   :  { %5298 = vmatprep.subr.bf16.mxu0 %v7143_v32  ;;  %3604 = vmatmul.mubr.bf16.vlgmr.msra.gmra.mrb[8].mxu1 %v7520_v46  ;;  %v7174_v39 = vld [vmem:[#allocation11 + $0x1a8] ss:$16 sps:$4 sm:$0xff]   ;;  %v7182_v56 = vld [vmem:[#allocation11 + $0x1cc] ss:$16 sps:$4 sm:$0xff]   ;;  %v7219_v32 = vld [vmem:[#allocation11 + $0x5a0] ss:$16 sps:$4 sm:$0xff]  }
 0x2aa   :  { %5385 = vmatpush1.bf16.msra.mxu1 %v7117_v34  ;;  %5416 = vmatprep.mubr.bf16.mxu1 %v7994_v57  ;;  %v7159_v57 = vld [vmem:[#allocation11 + $0x460] ss:$16 sps:$4 sm:$0xff]   ;;  %v7227_v34 = vld [vmem:[#allocation11 + $0x5c4] ss:$16 sps:$4 sm:$0xff]  }
 0x2ab   :  { %5288 = vmatmul.mubr.bf16.vlgmr.msra.gmra.mrb[8].mxu0 %v8009_v33  ;;  %5386 = vmatprep.subr.bf16.mxu1 %v7122_v35  ;;  %v7180_v35 = vld [vmem:[#allocation11 + $0x1c8] ss:$16 sps:$4 sm:$0xff]   ;;  %v7225_v46 = vld [vmem:[#allocation11 + $0x5c0] ss:$16 sps:$4 sm:$0xff]  }
 0x2ac   :  { %5299 = vmatpush1.bf16.msra.mxu0 %v7141_v36  ;;  %v7188_v36 = vld [vmem:[#allocation11 + $0x1ec] ss:$16 sps:$4 sm:$0xff]  }
 0x2ad   :  { %5300 = vmatprep.subr.bf16.mxu0 %v7149_v37  ;;  %v7233_v37 = vld [vmem:[#allocation11 + $0x5e4] ss:$16 sps:$4 sm:$0xff]  }
 0x2ae   :  { %5387 = vmatpush1.bf16.msra.mxu1 %v7120_v38  ;;  %v7186_v38 = vld [vmem:[#allocation11 + $0x1e8] ss:$16 sps:$4 sm:$0xff]  }
 0x2af   :  { %5388 = vmatprep.subr.bf16.mxu1 %v7125_v40  ;;  %v7194_v40 = vld [vmem:[#allocation11 + $0x20c] ss:$16 sps:$4 sm:$0xff]  }
 0x2b0   :  { %5301 = vmatpush1.bf16.msra.mxu0 %v7147_v41  ;;  %v7231_v41 = vld [vmem:[#allocation11 + $0x5e0] ss:$16 sps:$4 sm:$0xff]  }
 0x2b1   :  { %5302 = vmatprep.subr.bf16.mxu0 %v7155_v48  ;;  %v7287_v48 = vld [vmem:[#allocation11 + $0x604] ss:$16 sps:$4 sm:$0xff]  }
 0x2b2   :  { %5389 = vmatpush1.bf16.msra.mxu1 %v7123_v61  ;;  %v7192_v61 = vld [vmem:[#allocation11 + $0x208] ss:$16 sps:$4 sm:$0xff]  }
 0x2b3   :  { %5390 = vmatprep.subr.bf16.mxu1 %v7128_v63  ;;  %v7200_v63 = vld [vmem:[#allocation11 + $0x22c] ss:$16 sps:$4 sm:$0xff]  }
 0x2b4   :  { %5303 = vmatpush1.bf16.msra.mxu0 %v7153_v59  ;;  %v7198_v59 = vld [vmem:[#allocation11 + $0x228] ss:$16 sps:$4 sm:$0xff]  }
 0x2b5   :  { %5304 = vmatprep.subr.bf16.mxu0 %v7161_v42  ;;  %v7206_v42 = vld [vmem:[#allocation11 + $0x24c] ss:$16 sps:$4 sm:$0xff]  }
 0x2b6   :  { %5391 = vmatpush1.bf16.msra.mxu1 %v7126_v45  ;;  %v7204_v45 = vld [vmem:[#allocation11 + $0x248] ss:$16 sps:$4 sm:$0xff]  }
 0x2b7   :  { %5392 = vmatprep.subr.bf16.mxu1 %v7131_v47  ;;  %v7212_v47 = vld [vmem:[#allocation11 + $0x26c] ss:$16 sps:$4 sm:$0xff]  }
 0x2b8   :  { %5305 = vmatpush1.bf16.msra.mxu0 %v7159_v57  ;;  %v7210_v57 = vld [vmem:[#allocation11 + $0x268] ss:$16 sps:$4 sm:$0xff]  }
 0x2b9   :  { %5306 = vmatprep.subr.bf16.mxu0 %v7167_v49  ;;  %v7218_v49 = vld [vmem:[#allocation11 + $0x28c] ss:$16 sps:$4 sm:$0xff]  }
 0x2ba   :  { %5393 = vmatpush1.bf16.msra.mxu1 %v7129_v50  ;;  %v7216_v50 = vld [vmem:[#allocation11 + $0x288] ss:$16 sps:$4 sm:$0xff]  }
 0x2bb   :  { %5394 = vmatprep.subr.bf16.mxu1 %v7134_v11  ;;  %v664_v11 = vsub.s32 4, %v7974_v44 }
 0x2bc   :  { %5307 = vmatpush1.bf16.msra.mxu0 %v7165_v0  ;;  %v7224_v0 = vld [vmem:[#allocation11 + $0x2ac] ss:$16 sps:$4 sm:$0xff]  }
 0x2bd   :  { %5308 = vmatprep.subr.bf16.mxu0 %v7173_v60 }
 0x2be   :  { %5395 = vmatpush1.bf16.msra.mxu1 %v7132_v1  ;;  %v7222_v1 = vld [vmem:[#allocation11 + $0x2a8] ss:$16 sps:$4 sm:$0xff]  }
 0x2bf   :  { %5396 = vmatprep.subr.bf16.mxu1 %v7137_v58 }
 0x2c0   :  { %5309 = vmatpush1.bf16.msra.mxu0 %v7171_v2  ;;  %v7230_v2 = vld [vmem:[#allocation11 + $0x2cc] ss:$16 sps:$4 sm:$0xff]  }
 0x2c1   :  { %5310 = vmatprep.subr.bf16.mxu0 %v7179_v4 }
 0x2c2   :  { %5397 = vmatpush1.bf16.msra.mxu1 %v7135_v6 }
 0x2c3   :  { %5398 = vmatprep.subr.bf16.mxu1 %v7140_v3 }
 0x2c4   :  { %5311 = vmatpush1.bf16.msra.mxu0 %v7177_v7  ;;  %v7228_v7 = vld [vmem:[#allocation11 + $0x2c8] ss:$16 sps:$4 sm:$0xff]  }
 0x2c5   :  { %5312 = vmatprep.subr.bf16.mxu0 %v7185_v8 }
 0x2c6   :  { %5399 = vmatpush1.bf16.msra.mxu1 %v7138_v9 }
 0x2c7   :  { %5400 = vmatprep.subr.bf16.mxu1 %v7146_v10  ;;  %v7236_v10 = vld [vmem:[#allocation11 + $0x2ec] ss:$16 sps:$4 sm:$0xff]  }
 0x2c8   :  { %5313 = vmatpush1.bf16.msra.mxu0 %v7183_v13 }
 0x2c9   :  { %5314 = vmatprep.subr.bf16.mxu0 %v7191_v12 }
 0x2ca   :  { %5401 = vmatpush1.bf16.msra.mxu1 %v7144_v14 }
 0x2cb   :  { %5402 = vmatprep.subr.bf16.mxu1 %v7152_v15 }
 0x2cc   :  { %5315 = vmatpush1.bf16.msra.mxu0 %v7189_v16 }
 0x2cd   :  { %5316 = vmatprep.subr.bf16.mxu0 %v7197_v17 }
 0x2ce   :  { %5403 = vmatpush1.bf16.msra.mxu1 %v7150_v18  ;;  %v7234_v18 = vld [vmem:[#allocation11 + $0x2e8] ss:$16 sps:$4 sm:$0xff]  }
 0x2cf   :  { %5404 = vmatprep.subr.bf16.mxu1 %v7158_v19 }
 0x2d0   :  { %5317 = vmatpush1.bf16.msra.mxu0 %v7195_v20  ;;  %v7239_v20 = vld [vmem:[#allocation11 + $0x30c] ss:$16 sps:$4 sm:$0xff]  }
 0x2d1   :  { %5318 = vmatprep.subr.bf16.mxu0 %v7203_v62 }
 0x2d2   :  { %5405 = vmatpush1.bf16.msra.mxu1 %v7156_v21 }
 0x2d3   :  { %5406 = vmatprep.subr.bf16.mxu1 %v7164_v22 }
 0x2d4   :  { %5319 = vmatpush1.bf16.msra.mxu0 %v7201_v23 }
 0x2d5   :  { %5320 = vmatprep.subr.bf16.mxu0 %v7209_v24 }
 0x2d6   :  { %5407 = vmatpush1.bf16.msra.mxu1 %v7162_v53  ;;  %v7237_v53 = vld [vmem:[#allocation11 + $0x308] ss:$16 sps:$4 sm:$0xff]  }
 0x2d7   :  { %5408 = vmatprep.subr.bf16.mxu1 %v7170_v25 }
 0x2d8   :  { %5321 = vmatpush1.bf16.msra.mxu0 %v7207_v26  ;;  %v7242_v26 = vld [vmem:[#allocation11 + $0x32c] ss:$16 sps:$4 sm:$0xff]  }
 0x2d9   :  { %5322 = vmatprep.subr.bf16.mxu0 %v7215_v27  ;;  %v7285_v27 = vld [vmem:[#allocation11 + $0x600] ss:$16 sps:$4 sm:$0xff]  }
 0x2da   :  { %5409 = vmatpush1.bf16.msra.mxu1 %v7168_v28  ;;  %v7293_v28 = vld [vmem:[#allocation11 + $0x624] ss:$16 sps:$4 sm:$0xff]  }
 0x2db   :  { %5410 = vmatprep.subr.bf16.mxu1 %v7176_v29  ;;  %v7240_v29 = vld [vmem:[#allocation11 + $0x328] ss:$16 sps:$4 sm:$0xff]  }
 0x2dc   :  { %5323 = vmatpush1.bf16.msra.mxu0 %v7213_v30  ;;  %v7245_v30 = vld [vmem:[#allocation11 + $0x34c] ss:$16 sps:$4 sm:$0xff]  }
 0x2dd   :  { %5324 = vmatprep.subr.bf16.mxu0 %v7221_v31  ;;  %v7291_v31 = vld [vmem:[#allocation11 + $0x620] ss:$16 sps:$4 sm:$0xff]  }
 0x2de   :  { %5411 = vmatpush1.bf16.msra.mxu1 %v7174_v39  ;;  %v7299_v39 = vld [vmem:[#allocation11 + $0x644] ss:$16 sps:$4 sm:$0xff]  }
 0x2df   :  { %5412 = vmatprep.subr.bf16.mxu1 %v7182_v56  ;;  %v7243_v56 = vld [vmem:[#allocation11 + $0x348] ss:$16 sps:$4 sm:$0xff]  }
 0x2e0   :  { %5325 = vmatpush1.bf16.msra.mxu0 %v7219_v32  ;;  %v7248_v32 = vld [vmem:[#allocation11 + $0x36c] ss:$16 sps:$4 sm:$0xff]  }
 0x2e1   :  { %5326 = vmatprep.subr.bf16.mxu0 %v7227_v34  ;;  %v7297_v34 = vld [vmem:[#allocation11 + $0x640] ss:$16 sps:$4 sm:$0xff]  }
 0x2e2   :  { %5413 = vmatpush1.bf16.msra.mxu1 %v7180_v35  ;;  %v7305_v35 = vld [vmem:[#allocation11 + $0x664] ss:$16 sps:$4 sm:$0xff]  }
 0x2e3   :  { %5414 = vmatprep.subr.bf16.mxu1 %v7188_v36  ;;  %v7246_v36 = vld [vmem:[#allocation11 + $0x368] ss:$16 sps:$4 sm:$0xff]  }
 0x2e4   :  { %5327 = vmatpush1.bf16.msra.mxu0 %v7225_v46  ;;  %v7251_v46 = vld [vmem:[#allocation11 + $0x38c] ss:$16 sps:$4 sm:$0xff]  }
 0x2e5   :  { %5328 = vmatprep.subr.bf16.mxu0 %v7233_v37  ;;  %v7303_v37 = vld [vmem:[#allocation11 + $0x660] ss:$16 sps:$4 sm:$0xff]  }
 0x2e6   :  { %5415 = vmatpush1.bf16.msra.mxu1 %v7186_v38  ;;  %v7311_v38 = vld [vmem:[#allocation11 + $0x684] ss:$16 sps:$4 sm:$0xff]  }
 0x2e7   :  { %5427 = vmatprep.subr.bf16.mxu1 %v7194_v40  ;;  %v7249_v40 = vld [vmem:[#allocation11 + $0x388] ss:$16 sps:$4 sm:$0xff]  }
 0x2e8   :  { %5329 = vmatpush1.bf16.msra.mxu0 %v7231_v41  ;;  %v7254_v41 = vld [vmem:[#allocation11 + $0x3ac] ss:$16 sps:$4 sm:$0xff]  }
 0x2e9   :  { %5417 = vmatmul.mubr.bf16.vlgmr.msra.gmra.mrb[12].mxu1 %v7992_v52  ;;  %5341 = vmatprep.subr.bf16.mxu0 %v7287_v48  ;;  %v668_v52 = vsub.s32 5, %v7974_v44  ;;  %v7309_v48 = vld [vmem:[#allocation11 + $0x680] ss:$16 sps:$4 sm:$0xff]  }
 0x2ea   :  { %5428 = vmatpush1.bf16.msra.mxu1 %v7192_v61  ;;  %5459 = vmatprep.mubr.bf16.mxu1 %v8011_v43  ;;  %v8020_v43 = vld [vmem:[#allocation9] sm:$0xff]  ;;  %v7317_v61 = vld [vmem:[#allocation11 + $0x6a4] ss:$16 sps:$4 sm:$0xff]  }
 0x2eb   :  { %5429 = vmatprep.subr.bf16.mxu1 %v7200_v63  ;;  %v665_v60 = vrot.slane %v8020_v43, %v664_v11  ;;  %v669_v58 = vrot.slane %v8020_v43, %v668_v52  ;;  %v7252_v63 = vld [vmem:[#allocation11 + $0x3a8] ss:$16 sps:$4 sm:$0xff]   ;;  %v7263_v52 = vld [vmem:[#allocation11 + $0x40c] ss:$16 sps:$4 sm:$0xff]  }
 0x2ec   :  { %v7258_v11 = vld [vmem:[#allocation11 + $0x3e8] ss:$16 sps:$4 sm:$0xff]  }
 0x2ee   :  { %5430 = vmatpush1.bf16.msra.mxu1 %v7198_v59  ;;  %v7257_v59 = vld [vmem:[#allocation11 + $0x3cc] ss:$16 sps:$4 sm:$0xff]  }
 0x2ef   :  { %5431 = vmatprep.subr.bf16.mxu1 %v7206_v42  ;;  %v7315_v42 = vld [vmem:[#allocation11 + $0x6a0] ss:$16 sps:$4 sm:$0xff]  }
 0x2f2   :  { %5432 = vmatpush1.bf16.msra.mxu1 %v7204_v45  ;;  %v7323_v45 = vld [vmem:[#allocation11 + $0x6c4] ss:$16 sps:$4 sm:$0xff]  }
 0x2f3   :  { %5433 = vmatprep.subr.bf16.mxu1 %v7212_v47  ;;  %v7255_v47 = vld [vmem:[#allocation11 + $0x3c8] ss:$16 sps:$4 sm:$0xff]  }
 0x2f6   :  { %5434 = vmatpush1.bf16.msra.mxu1 %v7210_v57  ;;  %v7260_v57 = vld [vmem:[#allocation11 + $0x3ec] ss:$16 sps:$4 sm:$0xff]  }
 0x2f7   :  { %5435 = vmatprep.subr.bf16.mxu1 %v7218_v49  ;;  %v7321_v49 = vld [vmem:[#allocation11 + $0x6c0] ss:$16 sps:$4 sm:$0xff]  }
 0x2fa   :  { %5436 = vmatpush1.bf16.msra.mxu1 %v7216_v50  ;;  %v7329_v50 = vld [vmem:[#allocation11 + $0x6e4] ss:$16 sps:$4 sm:$0xff]  }
 0x2fb   :  { %5437 = vmatprep.subr.bf16.mxu1 %v7224_v0  ;;  %v7327_v0 = vld [vmem:[#allocation11 + $0x6e0] ss:$16 sps:$4 sm:$0xff]  }
 0x2fe   :  { %v3433_v4 = vpop.f32.mrb[4].mxu0  ;;  %5438 = vmatpush1.bf16.msra.mxu1 %v7222_v1  ;;  %v7261_v1 = vld [vmem:[#allocation11 + $0x408] ss:$16 sps:$4 sm:$0xff]  }
 0x2ff   :  { %v6908_v6 = vadd.f32 %v3433_v4, %v665_v60  ;;  %v3435_v3 = vpop.f32.mrb[5].mxu0  ;;  %5439 = vmatprep.subr.bf16.mxu1 %v7230_v2  ;;  %v7333_v2 = vld [vmem:[#allocation11 + $0x700] ss:$16 sps:$4 sm:$0xff]   ;;  %v7341_v4 = vld [vmem:[#allocation11 + $0x724] ss:$16 sps:$4 sm:$0xff]  }
 0x300   :  { %v6909_v8 = vadd.f32 %v3435_v3, %v669_v58  ;;  %v3437_v9 = vpop.f32.mrb[6].mxu0  ;;  %v7269_v3 = vld [vmem:[#allocation11 + $0x44c] ss:$16 sps:$4 sm:$0xff]  }
 0x301   :  { %v3618_v13 = vmul.f32 0.2, %v6908_v6  ;;  %v6910_v12 = vadd.f32 %v3437_v9, %v665_v60  ;;  %v3439_v14 = vpop.f32.mrb[7].mxu0  ;;  %v7335_v60 = vld [vmem:[#allocation11 + $0x704] ss:$16 sps:$4 sm:$0xff]  }
 0x302   :  { %v3619_v15 = vmul.f32 0.2, %v6909_v8  ;;  %v6911_v16 = vadd.f32 %v3439_v14, %v669_v58  ;;  %5440 = vmatpush1.bf16.msra.mxu1 %v7228_v7  ;;  %v7266_v58 = vld [vmem:[#allocation11 + $0x42c] ss:$16 sps:$4 sm:$0xff]   ;;  %v7339_v7 = vld [vmem:[#allocation11 + $0x720] ss:$16 sps:$4 sm:$0xff]  }
 0x303   :  { %v3626_v17 = vmul.f32 0.2, %v6910_v12  ;;  %5441 = vmatprep.subr.bf16.mxu1 %v7236_v10  ;;  %v3634_v62 = vmax.f32 %v6908_v6, %v3618_v13  ;;  %v7264_v6 = vld [vmem:[#allocation11 + $0x428] ss:$16 sps:$4 sm:$0xff]   ;;  %v7272_v10 = vld [vmem:[#allocation11 + $0x46c] ss:$16 sps:$4 sm:$0xff]  }
 0x304   :  { %v3627_v19 = vmul.f32 0.2, %v6911_v16  ;;  %v3635_v22 = vmax.f32 %v6909_v8, %v3619_v15  ;;  %v7347_v8 = vld [vmem:[#allocation11 + $0x744] ss:$16 sps:$4 sm:$0xff]   ;;  %v7267_v9 = vld [vmem:[#allocation11 + $0x448] ss:$16 sps:$4 sm:$0xff]  }
 0x305   :  { %v3642_v21 = vmax.f32 %v6910_v12, %v3626_v17  ;;  %v7345_v13 = vld [vmem:[#allocation11 + $0x740] ss:$16 sps:$4 sm:$0xff]   ;;  %v7353_v12 = vld [vmem:[#allocation11 + $0x764] ss:$16 sps:$4 sm:$0xff]   ;;  %v7275_v14 = vld [vmem:[#allocation11 + $0x48c] ss:$16 sps:$4 sm:$0xff]  }
 0x306   :  { %v3643_v23 = vmax.f32 %v6911_v16, %v3627_v19  ;;  %5442 = vmatpush1.bf16.msra.mxu1 %v7234_v18  ;;  %v7351_v15 = vld [vmem:[#allocation11 + $0x760] ss:$16 sps:$4 sm:$0xff]   ;;  %v7359_v16 = vld [vmem:[#allocation11 + $0x784] ss:$16 sps:$4 sm:$0xff]   ;;  %v7273_v17 = vld [vmem:[#allocation11 + $0x488] ss:$16 sps:$4 sm:$0xff]  }
 0x307   :  { %v8024_v24 = vpack.c.bf16 %v3642_v21, %v3634_v62  ;;  %5443 = vmatprep.subr.bf16.mxu1 %v7239_v20  ;;  %v7278_v18 = vld [vmem:[#allocation11 + $0x4ac] ss:$16 sps:$4 sm:$0xff]   ;;  %v7357_v19 = vld [vmem:[#allocation11 + $0x780] ss:$16 sps:$4 sm:$0xff]   ;;  %v7365_v20 = vld [vmem:[#allocation11 + $0x7a4] ss:$16 sps:$4 sm:$0xff]  }
 0x308   :  { %v8026_v25 = vpack.c.bf16 %v3643_v23, %v3635_v22  ;;  %v7276_v62 = vld [vmem:[#allocation11 + $0x4a8] ss:$16 sps:$4 sm:$0xff]   ;;  %v7281_v21 = vld [vmem:[#allocation11 + $0x4cc] ss:$16 sps:$4 sm:$0xff]   ;;  %v7363_v22 = vld [vmem:[#allocation11 + $0x7a0] ss:$16 sps:$4 sm:$0xff]  }
 0x309   :  { %v7371_v23 = vld [vmem:[#allocation11 + $0x7c4] ss:$16 sps:$4 sm:$0xff]  }
 0x30a   :  { %5330 = vmatprep.mubr.bf16.mxu0 %v8026_v25  ;;  %5444 = vmatpush1.bf16.msra.mxu1 %v7237_v53  ;;  %v7279_v53 = vld [vmem:[#allocation11 + $0x4c8] ss:$16 sps:$4 sm:$0xff]  }
 0x30b   :  { %5331 = vmatmul.mubr.bf16.vlgmr.msra.gmra.mrb[8].mxu0 %v8024_v24  ;;  %5445 = vmatprep.subr.bf16.mxu1 %v7242_v26  ;;  %v7369_v26 = vld [vmem:[#allocation11 + $0x7c0] ss:$16 sps:$4 sm:$0xff]  }
 0x30c   :  { %5342 = vmatpush1.bf16.msra.mxu0 %v7285_v27  ;;  %v7377_v27 = vld [vmem:[#allocation11 + $0x7e4] ss:$16 sps:$4 sm:$0xff]  }
 0x30d   :  { %5343 = vmatprep.subr.bf16.mxu0 %v7293_v28  ;;  %v7282_v28 = vld [vmem:[#allocation11 + $0x4e8] ss:$16 sps:$4 sm:$0xff]  }
 0x30e   :  { %5446 = vmatpush1.bf16.msra.mxu1 %v7240_v29  ;;  %v7290_v29 = vld [vmem:[#allocation11 + $0x50c] ss:$16 sps:$4 sm:$0xff]  }
 0x30f   :  { %5447 = vmatprep.subr.bf16.mxu1 %v7245_v30  ;;  %v7375_v30 = vld [vmem:[#allocation11 + $0x7e0] ss:$16 sps:$4 sm:$0xff]  }
 0x310   :  { %5344 = vmatpush1.bf16.msra.mxu0 %v7291_v31  ;;  %v7407_v31 = vld [vmem:[#allocation14 + $0x4] ss:$8 sps:$4 sm:$0xff]  }
 0x311   :  { %5345 = vmatprep.subr.bf16.mxu0 %v7299_v39  ;;  %v7288_v39 = vld [vmem:[#allocation11 + $0x508] ss:$16 sps:$4 sm:$0xff]  }
 0x312   :  { %5448 = vmatpush1.bf16.msra.mxu1 %v7243_v56  ;;  %v7296_v56 = vld [vmem:[#allocation11 + $0x52c] ss:$16 sps:$4 sm:$0xff]  }
 0x313   :  { %5449 = vmatprep.subr.bf16.mxu1 %v7248_v32  ;;  %v7294_v32 = vld [vmem:[#allocation11 + $0x528] ss:$16 sps:$4 sm:$0xff]  }
 0x314   :  { %5346 = vmatpush1.bf16.msra.mxu0 %v7297_v34  ;;  %v7302_v34 = vld [vmem:[#allocation11 + $0x54c] ss:$16 sps:$4 sm:$0xff]  }
 0x315   :  { %5347 = vmatprep.subr.bf16.mxu0 %v7305_v35  ;;  %v7300_v35 = vld [vmem:[#allocation11 + $0x548] ss:$16 sps:$4 sm:$0xff]  }
 0x316   :  { %5450 = vmatpush1.bf16.msra.mxu1 %v7246_v36  ;;  %v7308_v36 = vld [vmem:[#allocation11 + $0x56c] ss:$16 sps:$4 sm:$0xff]  }
 0x317   :  { %5451 = vmatprep.subr.bf16.mxu1 %v7251_v46  ;;  %v7306_v46 = vld [vmem:[#allocation11 + $0x568] ss:$16 sps:$4 sm:$0xff]  }
 0x318   :  { %5348 = vmatpush1.bf16.msra.mxu0 %v7303_v37  ;;  %v7314_v37 = vld [vmem:[#allocation11 + $0x58c] ss:$16 sps:$4 sm:$0xff]  }
 0x319   :  { %5349 = vmatprep.subr.bf16.mxu0 %v7311_v38  ;;  %v7312_v38 = vld [vmem:[#allocation11 + $0x588] ss:$16 sps:$4 sm:$0xff]  }
 0x31a   :  { %5452 = vmatpush1.bf16.msra.mxu1 %v7249_v40  ;;  %v7320_v40 = vld [vmem:[#allocation11 + $0x5ac] ss:$16 sps:$4 sm:$0xff]  }
 0x31b   :  { %5453 = vmatprep.subr.bf16.mxu1 %v7254_v41  ;;  %v7318_v41 = vld [vmem:[#allocation11 + $0x5a8] ss:$16 sps:$4 sm:$0xff]  }
 0x31c   :  { %5350 = vmatpush1.bf16.msra.mxu0 %v7309_v48  ;;  %v7326_v48 = vld [vmem:[#allocation11 + $0x5cc] ss:$16 sps:$4 sm:$0xff]  }
 0x31d   :  { %5351 = vmatprep.subr.bf16.mxu0 %v7317_v61  ;;  %v7324_v61 = vld [vmem:[#allocation11 + $0x5c8] ss:$16 sps:$4 sm:$0xff]  }
 0x31e   :  { %5454 = vmatpush1.bf16.msra.mxu1 %v7252_v63  ;;  %v7332_v63 = vld [vmem:[#allocation11 + $0x5ec] ss:$16 sps:$4 sm:$0xff]  }
 0x31f   :  { %5455 = vmatprep.subr.bf16.mxu1 %v7257_v59  ;;  %v7330_v59 = vld [vmem:[#allocation11 + $0x5e8] ss:$16 sps:$4 sm:$0xff]  }
 0x320   :  { %5352 = vmatpush1.bf16.msra.mxu0 %v7315_v42  ;;  %v7338_v42 = vld [vmem:[#allocation11 + $0x60c] ss:$16 sps:$4 sm:$0xff]  }
 0x321   :  { %5353 = vmatprep.subr.bf16.mxu0 %v7323_v45  ;;  %v7336_v45 = vld [vmem:[#allocation11 + $0x608] ss:$16 sps:$4 sm:$0xff]  }
 0x322   :  { %5456 = vmatpush1.bf16.msra.mxu1 %v7255_v47  ;;  %v7344_v47 = vld [vmem:[#allocation11 + $0x62c] ss:$16 sps:$4 sm:$0xff]  }
 0x323   :  { %5457 = vmatprep.subr.bf16.mxu1 %v7260_v57  ;;  %v7342_v57 = vld [vmem:[#allocation11 + $0x628] ss:$16 sps:$4 sm:$0xff]  }
 0x324   :  { %5354 = vmatpush1.bf16.msra.mxu0 %v7321_v49  ;;  %v7350_v49 = vld [vmem:[#allocation11 + $0x64c] ss:$16 sps:$4 sm:$0xff]  }
 0x325   :  { %5355 = vmatprep.subr.bf16.mxu0 %v7329_v50  ;;  %v7348_v50 = vld [vmem:[#allocation11 + $0x648] ss:$16 sps:$4 sm:$0xff]  }
 0x326   :  { %5458 = vmatpush1.bf16.msra.mxu1 %v7258_v11  ;;  %v7356_v11 = vld [vmem:[#allocation11 + $0x66c] ss:$16 sps:$4 sm:$0xff]  }
 0x327   :  { %5470 = vmatprep.subr.bf16.mxu1 %v7263_v52  ;;  %v7354_v52 = vld [vmem:[#allocation11 + $0x668] ss:$16 sps:$4 sm:$0xff]  }
 0x328   :  { %5356 = vmatpush1.bf16.msra.mxu0 %v7327_v0  ;;  %v7362_v0 = vld [vmem:[#allocation11 + $0x68c] ss:$16 sps:$4 sm:$0xff]  }
 0x329   :  { %5357 = vmatprep.subr.bf16.mxu0 %v7335_v60  ;;  %5460 = vmatmul.mubr.bf16.vlgmr.msra.gmra.mrb[12].mxu1 %v8009_v33  ;;  %v7270_v33 = vld [vmem:[#allocation11 + $0x468] ss:$16 sps:$4 sm:$0xff]   ;;  %v672_v60 = vsub.s32 6, %v7974_v44 }
 0x32a   :  { %5471 = vmatpush1.bf16.msra.mxu1 %v7261_v1  ;;  %5502 = vmatprep.mubr.bf16.mxu1 %v8026_v25  ;;  %v7284_v25 = vld [vmem:[#allocation11 + $0x4ec] ss:$16 sps:$4 sm:$0xff]   ;;  %v7360_v1 = vld [vmem:[#allocation11 + $0x688] ss:$16 sps:$4 sm:$0xff]  }
 0x32b   :  { %5472 = vmatprep.subr.bf16.mxu1 %v7266_v58  ;;  %v676_v58 = vsub.s32 7, %v7974_v44  ;;  %v7474_v44 = vld [vmem:[#allocation14 + $0x170] ss:$8 sps:$4 sm:$0xff]  }
 0x32c   :  { %5358 = vmatpush1.bf16.msra.mxu0 %v7333_v2  ;;  %v673_v2 = vrot.slane %v8020_v43, %v672_v60  ;;  %v7426_v60 = vld [vmem:[#allocation14 + $0x70] ss:$8 sps:$4 sm:$0xff]  }
 0x32d   :  { %5359 = vmatprep.subr.bf16.mxu0 %v7341_v4  ;;  %v677_v4 = vrot.slane %v8020_v43, %v676_v58  ;;  %v7378_v43 = vld [vmem:[#allocation11 + $0x6e8] ss:$16 sps:$4 sm:$0xff]   ;;  %v7429_v58 = vld [vmem:[#allocation14 + $0x80] ss:$8 sps:$4 sm:$0xff]  }
 0x32e   :  { %5473 = vmatpush1.bf16.msra.mxu1 %v7264_v6  ;;  %v7366_v6 = vld [vmem:[#allocation11 + $0x6a8] ss:$16 sps:$4 sm:$0xff]  }
 0x32f   :  { %5474 = vmatprep.subr.bf16.mxu1 %v7269_v3  ;;  %v7374_v3 = vld [vmem:[#allocation11 + $0x6cc] ss:$16 sps:$4 sm:$0xff]  }
 0x330   :  { %5360 = vmatpush1.bf16.msra.mxu0 %v7339_v7 }
 0x331   :  { %5361 = vmatprep.subr.bf16.mxu0 %v7347_v8 }
 0x332   :  { %5475 = vmatpush1.bf16.msra.mxu1 %v7267_v9 }
 0x333   :  { %5476 = vmatprep.subr.bf16.mxu1 %v7272_v10 }
 0x334   :  { %5362 = vmatpush1.bf16.msra.mxu0 %v7345_v13 }
 0x335   :  { %5363 = vmatprep.subr.bf16.mxu0 %v7353_v12  ;;  %v7372_v12 = vld [vmem:[#allocation11 + $0x6c8] ss:$16 sps:$4 sm:$0xff]  }
 0x336   :  { %5477 = vmatpush1.bf16.msra.mxu1 %v7270_v33 }
 0x337   :  { %5478 = vmatprep.subr.bf16.mxu1 %v7275_v14 }
 0x338   :  { %5364 = vmatpush1.bf16.msra.mxu0 %v7351_v15 }
 0x339   :  { %5365 = vmatprep.subr.bf16.mxu0 %v7359_v16  ;;  %v7380_v16 = vld [vmem:[#allocation11 + $0x6ec] ss:$16 sps:$4 sm:$0xff]  }
 0x33a   :  { %5479 = vmatpush1.bf16.msra.mxu1 %v7273_v17 }
 0x33b   :  { %5480 = vmatprep.subr.bf16.mxu1 %v7278_v18 }
 0x33c   :  { %5366 = vmatpush1.bf16.msra.mxu0 %v7357_v19 }
 0x33d   :  { %5367 = vmatprep.subr.bf16.mxu0 %v7365_v20 }
 0x33e   :  { %5481 = vmatpush1.bf16.msra.mxu1 %v7276_v62 }
 0x33f   :  { %5482 = vmatprep.subr.bf16.mxu1 %v7281_v21 }
 0x340   :  { %5368 = vmatpush1.bf16.msra.mxu0 %v7363_v22  ;;  %v7383_v22 = vld [vmem:[#allocation11 + $0x70c] ss:$16 sps:$4 sm:$0xff]  }
 0x341   :  { %5369 = vmatprep.subr.bf16.mxu0 %v7371_v23 }
 0x342   :  { %5483 = vmatpush1.bf16.msra.mxu1 %v7279_v53 }
 0x343   :  { %5484 = vmatprep.subr.bf16.mxu1 %v7284_v25 }
 0x344   :  { %5370 = vmatpush1.bf16.msra.mxu0 %v7369_v26 }
 0x345   :  { %5371 = vmatprep.subr.bf16.mxu0 %v7377_v27  ;;  %v7381_v27 = vld [vmem:[#allocation11 + $0x708] ss:$16 sps:$4 sm:$0xff]  }
 0x346   :  { %5485 = vmatpush1.bf16.msra.mxu1 %v7282_v28  ;;  %v7405_v28 = vld [vmem:[#allocation14] ss:$8 sps:$4 sm:$0xff]  }
 0x347   :  { %5486 = vmatprep.subr.bf16.mxu1 %v7290_v29  ;;  %v7386_v29 = vld [vmem:[#allocation11 + $0x72c] ss:$16 sps:$4 sm:$0xff]  }
 0x348   :  { %5372 = vmatpush1.bf16.msra.mxu0 %v7375_v30  ;;  %v7410_v30 = vld [vmem:[#allocation14 + $0x14] ss:$8 sps:$4 sm:$0xff]  }
 0x349   :  { %5972 = vmatprep.subr.bf16.mxu0 %v7407_v31  ;;  %v7384_v31 = vld [vmem:[#allocation11 + $0x728] ss:$16 sps:$4 sm:$0xff]  }
 0x34a   :  { %5487 = vmatpush1.bf16.msra.mxu1 %v7288_v39  ;;  %v7408_v39 = vld [vmem:[#allocation14 + $0x10] ss:$8 sps:$4 sm:$0xff]  }
 0x34b   :  { %5488 = vmatprep.subr.bf16.mxu1 %v7296_v56  ;;  %v7389_v56 = vld [vmem:[#allocation11 + $0x74c] ss:$16 sps:$4 sm:$0xff]  }
 0x34e   :  { %5489 = vmatpush1.bf16.msra.mxu1 %v7294_v32  ;;  %v7413_v32 = vld [vmem:[#allocation14 + $0x24] ss:$8 sps:$4 sm:$0xff]  }
 0x34f   :  { %5490 = vmatprep.subr.bf16.mxu1 %v7302_v34  ;;  %v7387_v34 = vld [vmem:[#allocation11 + $0x748] ss:$16 sps:$4 sm:$0xff]  }
 0x352   :  { %5491 = vmatpush1.bf16.msra.mxu1 %v7300_v35  ;;  %v7411_v35 = vld [vmem:[#allocation14 + $0x20] ss:$8 sps:$4 sm:$0xff]  }
 0x353   :  { %5492 = vmatprep.subr.bf16.mxu1 %v7308_v36  ;;  %v7392_v36 = vld [vmem:[#allocation11 + $0x76c] ss:$16 sps:$4 sm:$0xff]  }
 0x356   :  { %5493 = vmatpush1.bf16.msra.mxu1 %v7306_v46  ;;  %v7416_v46 = vld [vmem:[#allocation14 + $0x34] ss:$8 sps:$4 sm:$0xff]  }
 0x357   :  { %5494 = vmatprep.subr.bf16.mxu1 %v7314_v37  ;;  %v7390_v37 = vld [vmem:[#allocation11 + $0x768] ss:$16 sps:$4 sm:$0xff]  }
 0x35a   :  { %5495 = vmatpush1.bf16.msra.mxu1 %v7312_v38  ;;  %v7414_v38 = vld [vmem:[#allocation14 + $0x30] ss:$8 sps:$4 sm:$0xff]  }
 0x35b   :  { %5496 = vmatprep.subr.bf16.mxu1 %v7320_v40  ;;  %v7395_v40 = vld [vmem:[#allocation11 + $0x78c] ss:$16 sps:$4 sm:$0xff]  }
 0x35e   :  { %5497 = vmatpush1.bf16.msra.mxu1 %v7318_v41  ;;  %v7419_v41 = vld [vmem:[#allocation14 + $0x44] ss:$8 sps:$4 sm:$0xff]  }
 0x35f   :  { %5498 = vmatprep.subr.bf16.mxu1 %v7326_v48  ;;  %v7393_v48 = vld [vmem:[#allocation11 + $0x788] ss:$16 sps:$4 sm:$0xff]  }
 0x362   :  { %5499 = vmatpush1.bf16.msra.mxu1 %v7324_v61  ;;  %v7417_v61 = vld [vmem:[#allocation14 + $0x40] ss:$8 sps:$4 sm:$0xff]  }
 0x363   :  { %5500 = vmatprep.subr.bf16.mxu1 %v7332_v63  ;;  %v7398_v63 = vld [vmem:[#allocation11 + $0x7ac] ss:$16 sps:$4 sm:$0xff]  }
 0x366   :  { %5501 = vmatpush1.bf16.msra.mxu1 %v7330_v59  ;;  %v7422_v59 = vld [vmem:[#allocation14 + $0x54] ss:$8 sps:$4 sm:$0xff]  }
 0x367   :  { %5513 = vmatprep.subr.bf16.mxu1 %v7338_v42  ;;  %v7396_v42 = vld [vmem:[#allocation11 + $0x7a8] ss:$16 sps:$4 sm:$0xff]  }
 0x369   :  { %5503 = vmatmul.mubr.bf16.vlgmr.msra.gmra.mrb[12].mxu1 %v8024_v24  ;;  %v7368_v24 = vld [vmem:[#allocation11 + $0x6ac] ss:$16 sps:$4 sm:$0xff]  }
 0x36a   :  { %5514 = vmatpush1.bf16.msra.mxu1 %v7336_v45  ;;  %v7420_v45 = vld [vmem:[#allocation14 + $0x50] ss:$8 sps:$4 sm:$0xff]  }
 0x36b   :  { %5515 = vmatprep.subr.bf16.mxu1 %v7344_v47  ;;  %v7401_v47 = vld [vmem:[#allocation11 + $0x7cc] ss:$16 sps:$4 sm:$0xff]  }
 0x36e   :  { %5516 = vmatpush1.bf16.msra.mxu1 %v7342_v57  ;;  %v7425_v57 = vld [vmem:[#allocation14 + $0x64] ss:$8 sps:$4 sm:$0xff]  }
 0x36f   :  { %5517 = vmatprep.subr.bf16.mxu1 %v7350_v49  ;;  %v7399_v49 = vld [vmem:[#allocation11 + $0x7c8] ss:$16 sps:$4 sm:$0xff]  }
 0x372   :  { %5518 = vmatpush1.bf16.msra.mxu1 %v7348_v50  ;;  %v7423_v50 = vld [vmem:[#allocation14 + $0x60] ss:$8 sps:$4 sm:$0xff]  }
 0x373   :  { %5519 = vmatprep.subr.bf16.mxu1 %v7356_v11  ;;  %v7404_v11 = vld [vmem:[#allocation11 + $0x7ec] ss:$16 sps:$4 sm:$0xff]  }
 0x376   :  { %5520 = vmatpush1.bf16.msra.mxu1 %v7354_v52  ;;  %v7428_v52 = vld [vmem:[#allocation14 + $0x74] ss:$8 sps:$4 sm:$0xff]  }
 0x377   :  { %5521 = vmatprep.subr.bf16.mxu1 %v7362_v0  ;;  %v7402_v0 = vld [vmem:[#allocation11 + $0x7e8] ss:$16 sps:$4 sm:$0xff]  }
 0x37a   :  { %5522 = vmatpush1.bf16.msra.mxu1 %v7360_v1  ;;  %v7431_v1 = vld [vmem:[#allocation14 + $0x84] ss:$8 sps:$4 sm:$0xff]  }
 0x37b   :  { %5523 = vmatprep.subr.bf16.mxu1 %v7368_v24  ;;  %v7434_v24 = vld [vmem:[#allocation14 + $0x94] ss:$8 sps:$4 sm:$0xff]  }
 0x37c   :  { %v3605_v7 = vpop.f32.mrb[8].mxu1 }
 0x37d   :  { %v6912_v8 = vadd.f32 %v3605_v7, %v673_v2  ;;  %v3607_v9 = vpop.f32.mrb[9].mxu1  ;;  %v7438_v7 = vld [vmem:[#allocation14 + $0xb0] ss:$8 sps:$4 sm:$0xff]  }
 0x37e   :  { %v6913_v10 = vadd.f32 %v3607_v9, %v677_v4  ;;  %v3609_v13 = vpop.f32.mrb[10].mxu1  ;;  %5524 = vmatpush1.bf16.msra.mxu1 %v7366_v6  ;;  %v7435_v6 = vld [vmem:[#allocation14 + $0xa0] ss:$8 sps:$4 sm:$0xff]  }
 0x37f   :  { %v3620_v33 = vmul.f32 0.2, %v6912_v8  ;;  %v6914_v14 = vadd.f32 %v3609_v13, %v673_v2  ;;  %v3611_v15 = vpop.f32.mrb[11].mxu1  ;;  %5525 = vmatprep.subr.bf16.mxu1 %v7374_v3  ;;  %v7432_v2 = vld [vmem:[#allocation14 + $0x90] ss:$8 sps:$4 sm:$0xff]  }
 0x380   :  { %v3621_v17 = vmul.f32 0.2, %v6913_v10  ;;  %v6915_v18 = vadd.f32 %v3611_v15, %v677_v4  ;;  %v7437_v4 = vld [vmem:[#allocation14 + $0xa4] ss:$8 sps:$4 sm:$0xff]   ;;  %v7440_v3 = vld [vmem:[#allocation14 + $0xb4] ss:$8 sps:$4 sm:$0xff]  }
 0x381   :  { %v3628_v19 = vmul.f32 0.2, %v6914_v14  ;;  %v3636_v62 = vmax.f32 %v6912_v8, %v3620_v33  ;;  %v7443_v8 = vld [vmem:[#allocation14 + $0xc4] ss:$8 sps:$4 sm:$0xff]   ;;  %v7441_v9 = vld [vmem:[#allocation14 + $0xc0] ss:$8 sps:$4 sm:$0xff]  }
 0x382   :  { %v3629_v20 = vmul.f32 0.2, %v6915_v18  ;;  %5526 = vmatpush1.bf16.msra.mxu1 %v7372_v12  ;;  %v3637_v23 = vmax.f32 %v6913_v10, %v3621_v17  ;;  %v7446_v10 = vld [vmem:[#allocation14 + $0xd4] ss:$8 sps:$4 sm:$0xff]   ;;  %v7444_v13 = vld [vmem:[#allocation14 + $0xd0] ss:$8 sps:$4 sm:$0xff]  }
 0x383   :  { %v3644_v21 = vmax.f32 %v6914_v14, %v3628_v19  ;;  %5527 = vmatprep.subr.bf16.mxu1 %v7380_v16  ;;  %v7449_v12 = vld [vmem:[#allocation14 + $0xe4] ss:$8 sps:$4 sm:$0xff]   ;;  %v7447_v33 = vld [vmem:[#allocation14 + $0xe0] ss:$8 sps:$4 sm:$0xff]   ;;  %v7452_v14 = vld [vmem:[#allocation14 + $0xf4] ss:$8 sps:$4 sm:$0xff]  }
 0x384   :  { %v3645_v53 = vmax.f32 %v6915_v18, %v3629_v20  ;;  %v7450_v15 = vld [vmem:[#allocation14 + $0xf0] ss:$8 sps:$4 sm:$0xff]   ;;  %v7455_v16 = vld [vmem:[#allocation14 + $0x104] ss:$8 sps:$4 sm:$0xff]   ;;  %v3910_v17 = vld [vmem:[#allocation12] sm:$0xf] }
 0x385   :  { %v8037_v25 = vpack.c.bf16 %v3644_v21, %v3636_v62  ;;  %v3915_v18 = vrot.slane %v3910_v17, %v7977_v54  ;;  %v3919_v19 = vrot.slane %v3910_v17, %v7982_v55 }
 0x386   :  { %5528 = vmatpush1.bf16.msra.mxu1 %v7378_v43  ;;  %v3653_v26 = vpack.c.bf16 %v3645_v53, %v3637_v23 }
 0x387   :  { %5529 = vmatprep.subr.bf16.mxu1 %v7383_v22 }
 0x388   :  { %5373 = vmatprep.mubr.bf16.mxu0 %v3653_v26  ;;  %5545 = vmatprep.mubr.bf16.mxu1 %v3653_v26 }
 0x389   :  { %5374 = vmatmul.mubr.bf16.vlgmr.msra.gmra.mrb[8].mxu0 %v8037_v25 }
 0x38a   :  { %5530 = vmatpush1.bf16.msra.mxu1 %v7381_v27  ;;  %5973 = vmatpush1.bf16.msra.mxu0 %v7405_v28 }
 0x38b   :  { %5531 = vmatprep.subr.bf16.mxu1 %v7386_v29  ;;  %5974 = vmatprep.subr.bf16.mxu0 %v7410_v30 }
 0x38e   :  { %5532 = vmatpush1.bf16.msra.mxu1 %v7384_v31  ;;  %5975 = vmatpush1.bf16.msra.mxu0 %v7408_v39 }
 0x38f   :  { %5533 = vmatprep.subr.bf16.mxu1 %v7389_v56  ;;  %5976 = vmatprep.subr.bf16.mxu0 %v7413_v32 }
 0x392   :  { %5534 = vmatpush1.bf16.msra.mxu1 %v7387_v34  ;;  %5977 = vmatpush1.bf16.msra.mxu0 %v7411_v35  ;;  %v7453_v35 = vld [vmem:[#allocation14 + $0x100] ss:$8 sps:$4 sm:$0xff]  }
 0x393   :  { %5535 = vmatprep.subr.bf16.mxu1 %v7392_v36  ;;  %5978 = vmatprep.subr.bf16.mxu0 %v7416_v46  ;;  %v7458_v36 = vld [vmem:[#allocation14 + $0x114] ss:$8 sps:$4 sm:$0xff]   ;;  %v7456_v46 = vld [vmem:[#allocation14 + $0x110] ss:$8 sps:$4 sm:$0xff]  }
 0x396   :  { %5536 = vmatpush1.bf16.msra.mxu1 %v7390_v37  ;;  %5979 = vmatpush1.bf16.msra.mxu0 %v7414_v38  ;;  %v7461_v37 = vld [vmem:[#allocation14 + $0x124] ss:$8 sps:$4 sm:$0xff]   ;;  %v7459_v38 = vld [vmem:[#allocation14 + $0x120] ss:$8 sps:$4 sm:$0xff]  }
 0x397   :  { %5537 = vmatprep.subr.bf16.mxu1 %v7395_v40  ;;  %5980 = vmatprep.subr.bf16.mxu0 %v7419_v41  ;;  %v7464_v40 = vld [vmem:[#allocation14 + $0x134] ss:$8 sps:$4 sm:$0xff]   ;;  %v7462_v41 = vld [vmem:[#allocation14 + $0x130] ss:$8 sps:$4 sm:$0xff]  }
 0x39a   :  { %5538 = vmatpush1.bf16.msra.mxu1 %v7393_v48  ;;  %5981 = vmatpush1.bf16.msra.mxu0 %v7417_v61  ;;  %v7467_v48 = vld [vmem:[#allocation14 + $0x144] ss:$8 sps:$4 sm:$0xff]   ;;  %v7465_v61 = vld [vmem:[#allocation14 + $0x140] ss:$8 sps:$4 sm:$0xff]  }
 0x39b   :  { %5539 = vmatprep.subr.bf16.mxu1 %v7398_v63  ;;  %5982 = vmatprep.subr.bf16.mxu0 %v7422_v59  ;;  %v7470_v63 = vld [vmem:[#allocation14 + $0x154] ss:$8 sps:$4 sm:$0xff]   ;;  %v3923_v59 = vrot.slane %v3910_v17, %v8001_v51 }
 0x39e   :  { %5540 = vmatpush1.bf16.msra.mxu1 %v7396_v42  ;;  %5983 = vmatpush1.bf16.msra.mxu0 %v7420_v45  ;;  %v7468_v42 = vld [vmem:[#allocation14 + $0x150] ss:$8 sps:$4 sm:$0xff]   ;;  %v3927_v45 = vrot.slane %v3910_v17, %v660_v5  ;;  %v7483_v17 = vld [vmem:[#allocation14 + $0x1a0] ss:$8 sps:$4 sm:$0xff]  }
 0x39f   :  { %5541 = vmatprep.subr.bf16.mxu1 %v7401_v47  ;;  %5984 = vmatprep.subr.bf16.mxu0 %v7425_v57  ;;  %v7473_v47 = vld [vmem:[#allocation14 + $0x164] ss:$8 sps:$4 sm:$0xff]  }
 0x3a2   :  { %5542 = vmatpush1.bf16.msra.mxu1 %v7399_v49  ;;  %5985 = vmatpush1.bf16.msra.mxu0 %v7423_v50 }
 0x3a3   :  { %5543 = vmatprep.subr.bf16.mxu1 %v7404_v11  ;;  %5986 = vmatprep.subr.bf16.mxu0 %v7428_v52 }
 0x3a6   :  { %5544 = vmatpush1.bf16.msra.mxu1 %v7402_v0  ;;  %5987 = vmatpush1.bf16.msra.mxu0 %v7426_v60  ;;  %v7471_v0 = vld [vmem:[#allocation14 + $0x160] ss:$8 sps:$4 sm:$0xff]  }
 0x3a7   :  { %5988 = vmatprep.subr.bf16.mxu0 %v7431_v1 }
 0x3a9   :  { %5546 = vmatmul.mubr.bf16.vlgmr.msra.gmra.mrb[12].mxu1 %v8037_v25 }
 0x3aa   :  { %5989 = vmatpush1.bf16.msra.mxu0 %v7429_v58 }
 0x3ab   :  { %5990 = vmatprep.subr.bf16.mxu0 %v7434_v24  ;;  %v7476_v24 = vld [vmem:[#allocation14 + $0x174] ss:$8 sps:$4 sm:$0xff]  }
 0x3ae   :  { %5991 = vmatpush1.bf16.msra.mxu0 %v7432_v2 }
 0x3af   :  { %5992 = vmatprep.subr.bf16.mxu0 %v7437_v4 }
 0x3b2   :  { %5993 = vmatpush1.bf16.msra.mxu0 %v7435_v6 }
 0x3b3   :  { %5994 = vmatprep.subr.bf16.mxu0 %v7440_v3 }
 0x3b6   :  { %5995 = vmatpush1.bf16.msra.mxu0 %v7438_v7 }
 0x3b7   :  { %5996 = vmatprep.subr.bf16.mxu0 %v7443_v8  ;;  %v7479_v8 = vld [vmem:[#allocation14 + $0x184] ss:$8 sps:$4 sm:$0xff]  }
 0x3ba   :  { %5997 = vmatpush1.bf16.msra.mxu0 %v7441_v9 }
 0x3bb   :  { %5998 = vmatprep.subr.bf16.mxu0 %v7446_v10 }
 0x3be   :  { %5999 = vmatpush1.bf16.msra.mxu0 %v7444_v13 }
 0x3bf   :  { %6000 = vmatprep.subr.bf16.mxu0 %v7449_v12  ;;  %v7477_v12 = vld [vmem:[#allocation14 + $0x180] ss:$8 sps:$4 sm:$0xff]  }
 0x3c2   :  { %6001 = vmatpush1.bf16.msra.mxu0 %v7447_v33 }
 0x3c3   :  { %6002 = vmatprep.subr.bf16.mxu0 %v7452_v14  ;;  %v7482_v14 = vld [vmem:[#allocation14 + $0x194] ss:$8 sps:$4 sm:$0xff]  }
 0x3c6   :  { %6003 = vmatpush1.bf16.msra.mxu0 %v7450_v15  ;;  %v7480_v15 = vld [vmem:[#allocation14 + $0x190] ss:$8 sps:$4 sm:$0xff]  }
 0x3c7   :  { %6015 = vmatprep.subr.bf16.mxu0 %v7455_v16  ;;  %v7485_v16 = vld [vmem:[#allocation14 + $0x1a4] ss:$8 sps:$4 sm:$0xff]  }
 0x45c   :  { %v5375_v20 = vpop.f32.mrb[8].mxu0 }
 0x45d   :  { %v6916_v43 = vadd.f32 %v5375_v20, %v3915_v18  ;;  %v5377_v62 = vpop.f32.mrb[9].mxu0  ;;  %v7491_v20 = vld [vmem:[#allocation14 + $0x1c4] ss:$8 sps:$4 sm:$0xff]  }
 0x45e   :  { %v6917_v21 = vadd.f32 %v5377_v62, %v3919_v19  ;;  %v5379_v22 = vpop.f32.mrb[10].mxu0  ;;  %v7494_v62 = vld [vmem:[#allocation14 + $0x1d4] ss:$8 sps:$4 sm:$0xff]  }
 0x45f   :  { %v5556_v23 = vmul.f32 0.2, %v6916_v43  ;;  %v6918_v53 = vadd.f32 %v5379_v22, %v3915_v18  ;;  %v5381_v25 = vpop.f32.mrb[11].mxu0  ;;  %v7488_v18 = vld [vmem:[#allocation14 + $0x1b4] ss:$8 sps:$4 sm:$0xff]  }
 0x460   :  { %v5557_v26 = vmul.f32 0.2, %v6917_v21  ;;  %v6919_v27 = vadd.f32 %v5381_v25, %v3919_v19  ;;  %v7486_v19 = vld [vmem:[#allocation14 + $0x1b0] ss:$8 sps:$4 sm:$0xff]   ;;  %v7497_v22 = vld [vmem:[#allocation14 + $0x1e4] ss:$8 sps:$4 sm:$0xff]  }
 0x461   :  { %v5560_v28 = vmul.f32 0.2, %v6918_v53  ;;  %v5564_v30 = vmax.f32 %v6916_v43, %v5556_v23  ;;  %v7489_v43 = vld [vmem:[#allocation14 + $0x1c0] ss:$8 sps:$4 sm:$0xff]   ;;  %v7498_v25 = vld [vmem:[#allocation14 + $0x1f0] ss:$8 sps:$4 sm:$0xff]  }
 0x462   :  { %v5561_v29 = vmul.f32 0.2, %v6919_v27  ;;  %v5565_v39 = vmax.f32 %v6917_v21, %v5557_v26  ;;  %v7492_v21 = vld [vmem:[#allocation14 + $0x1d0] ss:$8 sps:$4 sm:$0xff]   ;;  %v7495_v23 = vld [vmem:[#allocation14 + $0x1e0] ss:$8 sps:$4 sm:$0xff]  }
 0x463   :  { %v5568_v31 = vmax.f32 %v6918_v53, %v5560_v28  ;;  %v7500_v53 = vld [vmem:[#allocation14 + $0x1f4] ss:$8 sps:$4 sm:$0xff]   ;;  %v6066_v26 = vld [vmem:[#allocation17] sm:$0x3] }
 0x464   :  { %v5569_v56 = vmax.f32 %v6919_v27, %v5561_v29  ;;  %v5640_v27 = vld [vmem:[#allocation15] sm:$0x3]  ;;  %v6067_v28 = vunpack.c.l.bf16 %v6066_v26 }
 0x465   :  { %v5572_v32 = vpack.c.bf16 %v5568_v31, %v5564_v30  ;;  %v5645_v29 = vrot.slane %v5640_v27, %v7977_v54  ;;  %v5649_v30 = vrot.slane %v5640_v27, %v7982_v55 }
 0x466   :  { %v5573_v34 = vpack.c.bf16 %v5569_v56, %v5565_v39  ;;  %v6072_v31 = vrot.slane %v6067_v28, %v7977_v54  ;;  %v6076_v56 = vrot.slane %v6067_v28, %v8001_v51 }
 0x468   :  { %6004 = vmatprep.mubr.bf16.mxu0 %v5573_v34 }
 0x469   :  { %6005 = vmatmul.mubr.bf16.vlgmr.msra.gmra.mrb[12].mxu0 %v5572_v32 }
 0x46a   :  { %6016 = vmatpush1.bf16.msra.mxu0 %v7453_v35 }
 0x46b   :  { %6017 = vmatprep.subr.bf16.mxu0 %v7458_v36 }
 0x46e   :  { %6018 = vmatpush1.bf16.msra.mxu0 %v7456_v46 }
 0x46f   :  { %6019 = vmatprep.subr.bf16.mxu0 %v7461_v37 }
 0x472   :  { %6020 = vmatpush1.bf16.msra.mxu0 %v7459_v38 }
 0x473   :  { %6021 = vmatprep.subr.bf16.mxu0 %v7464_v40  ;;  %v6082_v40 = vrot.slane %v6072_v31, %v7977_v54 }
 0x476   :  { %6022 = vmatpush1.bf16.msra.mxu0 %v7462_v41 }
 0x477   :  { %6023 = vmatprep.subr.bf16.mxu0 %v7467_v48 }
 0x47a   :  { %6024 = vmatpush1.bf16.msra.mxu0 %v7465_v61  ;;  %v6086_v61 = vrot.slane %v6076_v56, %v7977_v54 }
 0x47b   :  { %6025 = vmatprep.subr.bf16.mxu0 %v7470_v63 }
 0x47c   :  { %v5547_v57 = vpop.f32.mrb[12].mxu1 }
 0x47d   :  { %v6920_v49 = vadd.f32 %v5547_v57, %v3923_v59  ;;  %v5549_v50 = vpop.f32.mrb[13].mxu1 }
 0x47e   :  { %v6921_v11 = vadd.f32 %v5549_v50, %v3927_v45  ;;  %6026 = vmatpush1.bf16.msra.mxu0 %v7468_v42  ;;  %v5551_v52 = vpop.f32.mrb[14].mxu1 }
 0x47f   :  { %v5558_v60 = vmul.f32 0.2, %v6920_v49  ;;  %v6922_v1 = vadd.f32 %v5551_v52, %v3923_v59  ;;  %v5553_v58 = vpop.f32.mrb[15].mxu1  ;;  %6027 = vmatprep.subr.bf16.mxu0 %v7473_v47 }
 0x480   :  { %v5559_v2 = vmul.f32 0.2, %v6921_v11  ;;  %v6923_v4 = vadd.f32 %v5553_v58, %v3927_v45 }
 0x481   :  { %v5562_v6 = vmul.f32 0.2, %v6922_v1  ;;  %v5566_v5 = vmax.f32 %v6920_v49, %v5558_v60 }
 0x482   :  { %v5563_v3 = vmul.f32 0.2, %v6923_v4  ;;  %6028 = vmatpush1.bf16.msra.mxu0 %v7471_v0  ;;  %v5567_v9 = vmax.f32 %v6921_v11, %v5559_v2  ;;  %v6098_v0 = vstv %s8070_s9 }
 0x483   :  { %v5570_v7 = vmax.f32 %v6922_v1, %v5562_v6  ;;  %6029 = vmatprep.subr.bf16.mxu0 %v7476_v24 }
 0x484   :  { %v5571_v10 = vmax.f32 %v6923_v4, %v5563_v3 }
 0x485   :  { %v5574_v13 = vpack.c.bf16 %v5570_v7, %v5566_v5 }
 0x486   :  { %6030 = vmatpush1.bf16.msra.mxu0 %v7474_v44  ;;  %v5575_v33 = vpack.c.bf16 %v5571_v10, %v5567_v9 }
 0x487   :  { %6031 = vmatprep.subr.bf16.mxu0 %v7479_v8 }
 0x488   :  { %6047 = vmatprep.mubr.bf16.mxu0 %v5575_v33 }
 0x48a   :  { %6032 = vmatpush1.bf16.msra.mxu0 %v7477_v12 }
 0x48b   :  { %6033 = vmatprep.subr.bf16.mxu0 %v7482_v14 }
 0x48e   :  { %6034 = vmatpush1.bf16.msra.mxu0 %v7480_v15 }
 0x48f   :  { %6035 = vmatprep.subr.bf16.mxu0 %v7485_v16 }
 0x492   :  { %6036 = vmatpush1.bf16.msra.mxu0 %v7483_v17 }
 0x493   :  { %6037 = vmatprep.subr.bf16.mxu0 %v7488_v18 }
 0x496   :  { %6038 = vmatpush1.bf16.msra.mxu0 %v7486_v19 }
 0x497   :  { %6039 = vmatprep.subr.bf16.mxu0 %v7491_v20 }
 0x49a   :  { %6040 = vmatpush1.bf16.msra.mxu0 %v7489_v43 }
 0x49b   :  { %6041 = vmatprep.subr.bf16.mxu0 %v7494_v62 }
 0x49e   :  { %6042 = vmatpush1.bf16.msra.mxu0 %v7492_v21 }
 0x49f   :  { %6043 = vmatprep.subr.bf16.mxu0 %v7497_v22 }
 0x4a2   :  { %6044 = vmatpush1.bf16.msra.mxu0 %v7495_v23 }
 0x4a3   :  { %6045 = vmatprep.subr.bf16.mxu0 %v7500_v53 }
 0x4a6   :  { %6046 = vmatpush1.bf16.msra.mxu0 %v7498_v25 }
 0x4a9   :  { %6048 = vmatmul.mubr.bf16.vlgmr.msra.gmra.mrb[12].mxu0 %v5574_v13 }
 0x57c   :  { %v6049_v39 = vpop.f32.mrb[12].mxu0 }
 0x57d   :  { %v6924_v32 = vadd.f32 %v6049_v39, %v5645_v29  ;;  %v6051_v34 = vpop.f32.mrb[13].mxu0 }
 0x57e   :  { %v6925_v35 = vadd.f32 %v6051_v34, %v5649_v30  ;;  %v6053_v36 = vpop.f32.mrb[14].mxu0 }
 0x57f   :  { %v6058_v46 = vmul.f32 0.2, %v6924_v32  ;;  %v6926_v37 = vadd.f32 %v6053_v36, %v5645_v29  ;;  %v6055_v38 = vpop.f32.mrb[15].mxu0 }
 0x580   :  { %v6059_v41 = vmul.f32 0.2, %v6925_v35  ;;  %v6927_v48 = vadd.f32 %v6055_v38, %v5649_v30 }
 0x581   :  { %v6062_v63 = vmax.f32 %v6924_v32, %v6058_v46  ;;  %v6060_v55 = vmul.f32 0.2, %v6926_v37 }
 0x582   :  { %v6063_v59 = vmax.f32 %v6925_v35, %v6059_v41  ;;  %v6061_v42 = vmul.f32 0.2, %v6927_v48 }
 0x583   :  { %v6064_v45 = vmax.f32 %v6926_v37, %v6060_v55  ;;  %v6087_v47 = vmul.f32 %v6082_v40, %v6062_v63 }
 0x584   :  { %v6065_v51 = vmax.f32 %v6927_v48, %v6061_v42  ;;  %v6088_v57 = vmul.f32 %v6086_v61, %v6063_v59 }
 0x585   :  { %v6089_v49 = vmul.f32 %v6082_v40, %v6064_v45 }
 0x586   :  { %v6091_v50 = vadd.f32 %v6088_v57, %v6087_v47  ;;  %v6090_v11 = vmul.f32 %v6086_v61, %v6065_v51 }
 0x588   :  { %6092 = vadd.xlane.f32.xlu0 %v6091_v50  ;;  %v6094_v52 = vadd.f32 %v6090_v11, %v6089_v49 }
 0x58c   :  { %6095 = vadd.xlane.f32.xlu0 %v6094_v52 }
 0x615   :  { %v6093_v60 = vpop.xlane.xlu0 %6092 }
 0x616   :  { %v6099_v54 = vadd.f32 %v6098_v0, %v6093_v60 }
 0x618   :  { %v6894_v1 = vmul.f32 -1.442695, %v6099_v54 }
 0x619   :  { %v6096_v58 = vpop.xlane.xlu0 %6095 }
 0x61a   :  { %7501 = vpow2.f32 %v6894_v1  ;;  %v6100_v24 = vadd.f32 %v6098_v0, %v6096_v58 }
 0x61c   :  { %v6895_v2 = vmul.f32 -1.442695, %v6100_v24 }
 0x61e   :  { %7503 = vpow2.f32 %v6895_v2 }
 0x624   :  { %v7502_v4 = vpop.eup %7501 }
 0x625   :  { %v6107_v6 = vadd.f32 1.0, %v7502_v4 }
 0x627   :  { %7505 = vrcp.f32 %v6107_v6 }
 0x628   :  { %v7504_v3 = vpop.eup %7503 }
 0x629   :  { %v6108_v44 = vadd.f32 1.0, %v7504_v3 }
 0x62b   :  { %7507 = vrcp.f32 %v6108_v44 }
 0x631   :  { %v7506_v5 = vpop.eup %7505 }
 0x632   :  { %6114 = vst.msk [vmem:[%s8071_s10] sm:$0xff] %vm6113_vm1, %v7506_v5 }
 0x635   :  { %v7508_v7 = vpop.eup %7507 }
 0x636   :  { %6115 = vst.msk [vmem:[%s8071_s10 + $0x8] sm:$0xff] %vm6113_vm1, %v7508_v7 }
 0x637   :  { %6120 = vsyncpa [#allocation5], 1 }
 0x638   :  { %6121 = vsyncpa [#allocation7], 1 }
 0x639   :  { %6122 = vsyncpa [#allocation10], 1 }
 0x63a   :  { %6123 = vsyncpa [#allocation13], 1 }
 0x63b   :  { %6124 = vsyncpa [#allocation16], 1 }

</bundles_post_ra>
